<compile_context>
chip_gen: v6e
topology: v6e:2x2x1
jax: 0.10.0
libtpu: 0.0.40
codegen_flags: <defaults>
</compile_context>

<pallas_src>
import numpy as np
import jax
import jax.numpy as jnp
from jax.experimental import pallas as pl
from jax.experimental.pallas import tpu as pltpu

IN_FEATURES = 1024          # nn.Linear(1024, 512)
OUT_FEATURES = 512
CHILD_DIM = IN_FEATURES // 2

# Minimum row-padding granularity (sublane size).  For production-sized trees
# round the per-level batch up to 128 (v5e) / 256 (v6e, v7x) instead.
ROW_ALIGN = 8


def _round_up(x, m):
    return ((x + m - 1) // m) * m


def _build_schedule(left, right, is_leaf, root):
    """Host-side: flatten the recursion into a level schedule.

    Every internal node is assigned to level = 1 + max(level(children)); all
    nodes of a level are independent and get batched into one MXU tile.
    """
    left = np.asarray(left, dtype=np.int64)
    right = np.asarray(right, dtype=np.int64)
    is_leaf = np.asarray(is_leaf).astype(bool)

    level = {}
    stack = [(int(root), False)]
    while stack:
        node, expanded = stack.pop()
        if node in level:
            continue
        if is_leaf[node]:
            level[node] = 0
            continue
        if expanded:
            level[node] = 1 + max(level[int(left[node])],
                                  level[int(right[node])])
        else:
            stack.append((node, True))
            stack.append((int(right[node]), False))
            stack.append((int(left[node]), False))

    leaves = sorted(n for n, lv in level.items() if lv == 0)
    internal_by_level = {}
    for n, lv in level.items():
        if lv > 0:
            internal_by_level.setdefault(lv, []).append(n)
    for lv in internal_by_level:
        internal_by_level[lv].sort()

    n_levels = max(level.values())
    m_pad = _round_up(max(len(v) for v in internal_by_level.values()),
                      ROW_ALIGN)
    n_leaf_pad = _round_up(len(leaves), ROW_ALIGN)

    # Slot assignment inside the VMEM node table:
    #   [0, n_leaf_pad)                     : leaf embeddings
    #   [n_leaf_pad + (lv-1)*m_pad, ...)    : level-lv results (contiguous)
    slot = {n: i for i, n in enumerate(leaves)}
    for lv in range(1, n_levels + 1):
        for m, n in enumerate(internal_by_level[lv]):
            slot[n] = n_leaf_pad + (lv - 1) * m_pad + m

    a_slot = np.zeros((n_levels, m_pad), dtype=np.int32)   # padded rows -> 0
    b_slot = np.zeros((n_levels, m_pad), dtype=np.int32)
    for lv in range(1, n_levels + 1):
        for m, n in enumerate(internal_by_level[lv]):
            a_slot[lv - 1, m] = slot[int(left[n])]
            b_slot[lv - 1, m] = slot[int(right[n])]

    return dict(leaves=leaves, n_levels=n_levels, m_pad=m_pad,
                n_leaf_pad=n_leaf_pad, a_slot=a_slot, b_slot=b_slot,
                root_row=slot[int(root)] - n_leaf_pad)


def _make_tree_kernel(n_levels, m_pad, n_leaf_pad):
    def kernel(a_slot_ref, b_slot_ref, leaves_ref, w_ref, bias_ref,
               out_ref, emb_ref, abuf_ref, bbuf_ref):
        # Leaf embeddings occupy the first n_leaf_pad rows of the node table.
        emb_ref[0:n_leaf_pad, :] = leaves_ref[...]

        # Level-by-level evaluation.  The demo tree is tiny, so both loops are
        # trace-time unrolled; for large trees turn the outer loop into
        # lax.fori_loop (or a grid axis) and keep m_pad at 128/256.
        for k in range(n_levels):
            # Gather this level's children into contiguous (m_pad, 512) tiles.
            for m in range(m_pad):
                ia = a_slot_ref[k, m]
                ib = b_slot_ref[k, m]
                abuf_ref[m:m + 1, :] = emb_ref[pl.ds(ia, 1), :]
                bbuf_ref[m:m + 1, :] = emb_ref[pl.ds(ib, 1), :]

            # cat(a, b) @ W^T as a split matmul on the two resident weight
            # halves: one batched bf16 MXU pass each, f32 accumulation.
            a = abuf_ref[...].astype(jnp.bfloat16)
            b = bbuf_ref[...].astype(jnp.bfloat16)
            e = jnp.dot(a, w_ref[0:CHILD_DIM, :],
                        preferred_element_type=jnp.float32)
            e = e + jnp.dot(b, w_ref[CHILD_DIM:IN_FEATURES, :],
                            preferred_element_type=jnp.float32)
            h = jnp.tanh(e + bias_ref[...])

            row0 = n_leaf_pad + k * m_pad            # static, 8-aligned
            emb_ref[row0:row0 + m_pad, :] = h

        # Emit every internal-node embedding (lane-dense (M, 512) output).
        out_ref[...] = emb_ref[n_leaf_pad:n_leaf_pad + n_levels * m_pad, :]

    return kernel


def prepare_params(weight, bias):
    """One-time parameter prep (outside the hot path): pre-transpose the
    nn.Linear weight to (K, N) = (1024, 512) and cast it to bfloat16."""
    w_t = jnp.asarray(weight).T.astype(jnp.bfloat16)
    bias2 = jnp.asarray(bias, jnp.float32).reshape(1, OUT_FEATURES)
    return w_t, bias2


def rae_forward(left, right, is_leaf, inp, root, w_t, bias2):
    """Whole-tree RAE forward; returns the (512,) embedding of `root`."""
    inp = jnp.asarray(inp, jnp.float32)
    if bool(np.asarray(is_leaf)[root]):
        return inp[root]

    sched = _build_schedule(left, right, is_leaf, root)
    n_levels = sched["n_levels"]
    m_pad = sched["m_pad"]
    n_leaf_pad = sched["n_leaf_pad"]
    total_slots = n_leaf_pad + n_levels * m_pad

    # Leaf embeddings reordered into their table slots (padding rows = 0).
    leaves = jnp.zeros((n_leaf_pad, CHILD_DIM), jnp.float32)
    leaves = leaves.at[jnp.arange(len(sched["leaves"]))].set(
        inp[jnp.asarray(sched["leaves"], dtype=jnp.int32)])

    vmem = pl.BlockSpec(memory_space=pltpu.MemorySpace.VMEM)
    smem = pl.BlockSpec(memory_space=pltpu.MemorySpace.SMEM)

    table = pl.pallas_call(
        _make_tree_kernel(n_levels, m_pad, n_leaf_pad),
        out_shape=jax.ShapeDtypeStruct((n_levels * m_pad, OUT_FEATURES),
                                       jnp.float32),
        in_specs=[smem, smem, vmem, vmem, vmem],
        out_specs=vmem,
        scratch_shapes=[
            pltpu.VMEM((total_slots, OUT_FEATURES), jnp.float32),  # node table
            pltpu.VMEM((m_pad, CHILD_DIM), jnp.float32),           # left batch
            pltpu.VMEM((m_pad, CHILD_DIM), jnp.float32),           # right batch
        ],
    )(jnp.asarray(sched["a_slot"]), jnp.asarray(sched["b_slot"]),
      leaves, w_t, bias2)

    # TODO(synk): on v7x, split each level's rows across the 2 TensorCores
    # (core_map + per-level barrier) for the batched production variant.
    return table[sched["root_row"]]


if __name__ == "__main__":
    key = jax.random.PRNGKey(0)
    k_w, k_b, k_inp = jax.random.split(key, 3)

    # nn.Linear(1024, 512)-style init: U(-1/sqrt(K), 1/sqrt(K)).
    bound = 1.0 / (IN_FEATURES ** 0.5)
    weight = jax.random.uniform(k_w, (OUT_FEATURES, IN_FEATURES),
                                jnp.float32, -bound, bound)
    bias = jax.random.uniform(k_b, (OUT_FEATURES,), jnp.float32, -bound, bound)

    # Small complete binary tree: internal nodes 0..6, leaves 7..14, root 0.
    n_nodes = 15
    left = np.array([2 * i + 1 if i < 7 else -1 for i in range(n_nodes)],
                    np.int32)
    right = np.array([2 * i + 2 if i < 7 else -1 for i in range(n_nodes)],
                     np.int32)
    is_leaf = np.array([i >= 7 for i in range(n_nodes)])
    root = 0
    inp = jax.random.normal(k_inp, (n_nodes, CHILD_DIM), jnp.float32)

    w_t, bias2 = prepare_params(weight, bias)        # once, outside hot path
    out = jax.block_until_ready(
        rae_forward(left, right, is_leaf, inp, root, w_t, bias2))

    # Pure-JAX recursive reference with the original f32 PyTorch semantics.
    def ref_node(n):
        if is_leaf[n]:
            return inp[n]
        a = ref_node(int(left[n]))
        b = ref_node(int(right[n]))
        return jnp.tanh(jnp.concatenate([a, b]) @ weight.T + bias)

    ref = ref_node(root)
    assert out.shape == (OUT_FEATURES,)
    # bf16 weights/activations on the MXU -> loosened tolerance vs f32 ref.
    assert jnp.allclose(out, ref, atol=5e-2, rtol=0.0), float(
        jnp.max(jnp.abs(out - ref)))
    print("KERNEL_OK")
</pallas_src>

<mosaic_0001>
module attributes {stable_mosaic.version = 11 : i64} {
  func.func @kernel(%arg0: memref<3x8xi32, #tpu.memory_space<smem>>, %arg1: memref<3x8xi32, #tpu.memory_space<smem>>, %arg2: memref<8x512xf32, #tpu.memory_space<vmem>>, %arg3: memref<1024x512xbf16, #tpu.memory_space<vmem>>, %arg4: memref<1x512xf32, #tpu.memory_space<vmem>>, %arg5: memref<24x512xf32, #tpu.memory_space<vmem>>, %arg6: memref<32x512xf32, #tpu.memory_space<vmem>>, %arg7: memref<8x512xf32, #tpu.memory_space<vmem>>, %arg8: memref<8x512xf32, #tpu.memory_space<vmem>>) attributes {dimension_semantics = [], scalar_prefetch = 0 : i64, scratch_operands = 3 : i64, tpu.core_type = #tpu.core_type<tc>} {
    %c0 = arith.constant 0 : index
    %c0_0 = arith.constant 0 : index
    %0 = vector.load %arg2[%c0, %c0_0] : memref<8x512xf32, #tpu.memory_space<vmem>>, vector<8x512xf32>
    %c0_1 = arith.constant 0 : index
    %c0_2 = arith.constant 0 : index
    %1 = vector.load %arg6[%c0_1, %c0_2] : memref<32x512xf32, #tpu.memory_space<vmem>>, vector<8x512xf32>
    tpu.vector_store %arg6[%c0_1, %c0_2], %0 {strides = array<i32>} : memref<32x512xf32, #tpu.memory_space<vmem>>, vector<8x512xf32>,
    %c0_3 = arith.constant 0 : index
    %c0_4 = arith.constant 0 : index
    %2 = memref.load %arg0[%c0_3, %c0_4] : memref<3x8xi32, #tpu.memory_space<smem>>
    %c0_5 = arith.constant 0 : index
    %c0_6 = arith.constant 0 : index
    %3 = memref.load %arg1[%c0_5, %c0_6] : memref<3x8xi32, #tpu.memory_space<smem>>
    %4 = arith.index_cast %2 : i32 to index
    %c0_7 = arith.constant 0 : index
    %5 = vector.load %arg6[%4, %c0_7] : memref<32x512xf32, #tpu.memory_space<vmem>>, vector<1x512xf32>
    %c0_8 = arith.constant 0 : index
    %c0_9 = arith.constant 0 : index
    %6 = vector.load %arg7[%c0_8, %c0_9] : memref<8x512xf32, #tpu.memory_space<vmem>>, vector<1x512xf32>
    tpu.vector_store %arg7[%c0_8, %c0_9], %5 {strides = array<i32>} : memref<8x512xf32, #tpu.memory_space<vmem>>, vector<1x512xf32>,
    %7 = arith.index_cast %3 : i32 to index
    %c0_10 = arith.constant 0 : index
    %8 = vector.load %arg6[%7, %c0_10] : memref<32x512xf32, #tpu.memory_space<vmem>>, vector<1x512xf32>
    %c0_11 = arith.constant 0 : index
    %c0_12 = arith.constant 0 : index
    %9 = vector.load %arg8[%c0_11, %c0_12] : memref<8x512xf32, #tpu.memory_space<vmem>>, vector<1x512xf32>
    tpu.vector_store %arg8[%c0_11, %c0_12], %8 {strides = array<i32>} : memref<8x512xf32, #tpu.memory_space<vmem>>, vector<1x512xf32>,
    %c0_13 = arith.constant 0 : index
    %c1 = arith.constant 1 : index
    %10 = memref.load %arg0[%c0_13, %c1] : memref<3x8xi32, #tpu.memory_space<smem>>
    %c0_14 = arith.constant 0 : index
    %c1_15 = arith.constant 1 : index
    %11 = memref.load %arg1[%c0_14, %c1_15] : memref<3x8xi32, #tpu.memory_space<smem>>
    %12 = arith.index_cast %10 : i32 to index
    %c0_16 = arith.constant 0 : index
    %13 = vector.load %arg6[%12, %c0_16] : memref<32x512xf32, #tpu.memory_space<vmem>>, vector<1x512xf32>
    %c1_17 = arith.constant 1 : index
    %c0_18 = arith.constant 0 : index
    %14 = vector.load %arg7[%c1_17, %c0_18] : memref<8x512xf32, #tpu.memory_space<vmem>>, vector<1x512xf32>
    tpu.vector_store %arg7[%c1_17, %c0_18], %13 {strides = array<i32>} : memref<8x512xf32, #tpu.memory_space<vmem>>, vector<1x512xf32>,
    %15 = arith.index_cast %11 : i32 to index
    %c0_19 = arith.constant 0 : index
    %16 = vector.load %arg6[%15, %c0_19] : memref<32x512xf32, #tpu.memory_space<vmem>>, vector<1x512xf32>
    %c1_20 = arith.constant 1 : index
    %c0_21 = arith.constant 0 : index
    %17 = vector.load %arg8[%c1_20, %c0_21] : memref<8x512xf32, #tpu.memory_space<vmem>>, vector<1x512xf32>
    tpu.vector_store %arg8[%c1_20, %c0_21], %16 {strides = array<i32>} : memref<8x512xf32, #tpu.memory_space<vmem>>, vector<1x512xf32>,
    %c0_22 = arith.constant 0 : index
    %c2 = arith.constant 2 : index
    %18 = memref.load %arg0[%c0_22, %c2] : memref<3x8xi32, #tpu.memory_space<smem>>
    %c0_23 = arith.constant 0 : index
    %c2_24 = arith.constant 2 : index
    %19 = memref.load %arg1[%c0_23, %c2_24] : memref<3x8xi32, #tpu.memory_space<smem>>
    %20 = arith.index_cast %18 : i32 to index
    %c0_25 = arith.constant 0 : index
    %21 = vector.load %arg6[%20, %c0_25] : memref<32x512xf32, #tpu.memory_space<vmem>>, vector<1x512xf32>
    %c2_26 = arith.constant 2 : index
    %c0_27 = arith.constant 0 : index
    %22 = vector.load %arg7[%c2_26, %c0_27] : memref<8x512xf32, #tpu.memory_space<vmem>>, vector<1x512xf32>
    tpu.vector_store %arg7[%c2_26, %c0_27], %21 {strides = array<i32>} : memref<8x512xf32, #tpu.memory_space<vmem>>, vector<1x512xf32>,
    %23 = arith.index_cast %19 : i32 to index
    %c0_28 = arith.constant 0 : index
    %24 = vector.load %arg6[%23, %c0_28] : memref<32x512xf32, #tpu.memory_space<vmem>>, vector<1x512xf32>
    %c2_29 = arith.constant 2 : index
    %c0_30 = arith.constant 0 : index
    %25 = vector.load %arg8[%c2_29, %c0_30] : memref<8x512xf32, #tpu.memory_space<vmem>>, vector<1x512xf32>
    tpu.vector_store %arg8[%c2_29, %c0_30], %24 {strides = array<i32>} : memref<8x512xf32, #tpu.memory_space<vmem>>, vector<1x512xf32>,
    %c0_31 = arith.constant 0 : index
    %c3 = arith.constant 3 : index
    %26 = memref.load %arg0[%c0_31, %c3] : memref<3x8xi32, #tpu.memory_space<smem>>
    %c0_32 = arith.constant 0 : index
    %c3_33 = arith.constant 3 : index
    %27 = memref.load %arg1[%c0_32, %c3_33] : memref<3x8xi32, #tpu.memory_space<smem>>
    %28 = arith.index_cast %26 : i32 to index
    %c0_34 = arith.constant 0 : index
    %29 = vector.load %arg6[%28, %c0_34] : memref<32x512xf32, #tpu.memory_space<vmem>>, vector<1x512xf32>
    %c3_35 = arith.constant 3 : index
    %c0_36 = arith.constant 0 : index
    %30 = vector.load %arg7[%c3_35, %c0_36] : memref<8x512xf32, #tpu.memory_space<vmem>>, vector<1x512xf32>
    tpu.vector_store %arg7[%c3_35, %c0_36], %29 {strides = array<i32>} : memref<8x512xf32, #tpu.memory_space<vmem>>, vector<1x512xf32>,
    %31 = arith.index_cast %27 : i32 to index
    %c0_37 = arith.constant 0 : index
    %32 = vector.load %arg6[%31, %c0_37] : memref<32x512xf32, #tpu.memory_space<vmem>>, vector<1x512xf32>
    %c3_38 = arith.constant 3 : index
    %c0_39 = arith.constant 0 : index
    %33 = vector.load %arg8[%c3_38, %c0_39] : memref<8x512xf32, #tpu.memory_space<vmem>>, vector<1x512xf32>
    tpu.vector_store %arg8[%c3_38, %c0_39], %32 {strides = array<i32>} : memref<8x512xf32, #tpu.memory_space<vmem>>, vector<1x512xf32>,
    %c0_40 = arith.constant 0 : index
    %c4 = arith.constant 4 : index
    %34 = memref.load %arg0[%c0_40, %c4] : memref<3x8xi32, #tpu.memory_space<smem>>
    %c0_41 = arith.constant 0 : index
    %c4_42 = arith.constant 4 : index
    %35 = memref.load %arg1[%c0_41, %c4_42] : memref<3x8xi32, #tpu.memory_space<smem>>
    %36 = arith.index_cast %34 : i32 to index
    %c0_43 = arith.constant 0 : index
    %37 = vector.load %arg6[%36, %c0_43] : memref<32x512xf32, #tpu.memory_space<vmem>>, vector<1x512xf32>
    %c4_44 = arith.constant 4 : index
    %c0_45 = arith.constant 0 : index
    %38 = vector.load %arg7[%c4_44, %c0_45] : memref<8x512xf32, #tpu.memory_space<vmem>>, vector<1x512xf32>
    tpu.vector_store %arg7[%c4_44, %c0_45], %37 {strides = array<i32>} : memref<8x512xf32, #tpu.memory_space<vmem>>, vector<1x512xf32>,
    %39 = arith.index_cast %35 : i32 to index
    %c0_46 = arith.constant 0 : index
    %40 = vector.load %arg6[%39, %c0_46] : memref<32x512xf32, #tpu.memory_space<vmem>>, vector<1x512xf32>
    %c4_47 = arith.constant 4 : index
    %c0_48 = arith.constant 0 : index
    %41 = vector.load %arg8[%c4_47, %c0_48] : memref<8x512xf32, #tpu.memory_space<vmem>>, vector<1x512xf32>
    tpu.vector_store %arg8[%c4_47, %c0_48], %40 {strides = array<i32>} : memref<8x512xf32, #tpu.memory_space<vmem>>, vector<1x512xf32>,
    %c0_49 = arith.constant 0 : index
    %c5 = arith.constant 5 : index
    %42 = memref.load %arg0[%c0_49, %c5] : memref<3x8xi32, #tpu.memory_space<smem>>
    %c0_50 = arith.constant 0 : index
    %c5_51 = arith.constant 5 : index
    %43 = memref.load %arg1[%c0_50, %c5_51] : memref<3x8xi32, #tpu.memory_space<smem>>
    %44 = arith.index_cast %42 : i32 to index
    %c0_52 = arith.constant 0 : index
    %45 = vector.load %arg6[%44, %c0_52] : memref<32x512xf32, #tpu.memory_space<vmem>>, vector<1x512xf32>
    %c5_53 = arith.constant 5 : index
    %c0_54 = arith.constant 0 : index
    %46 = vector.load %arg7[%c5_53, %c0_54] : memref<8x512xf32, #tpu.memory_space<vmem>>, vector<1x512xf32>
    tpu.vector_store %arg7[%c5_53, %c0_54], %45 {strides = array<i32>} : memref<8x512xf32, #tpu.memory_space<vmem>>, vector<1x512xf32>,
    %47 = arith.index_cast %43 : i32 to index
    %c0_55 = arith.constant 0 : index
    %48 = vector.load %arg6[%47, %c0_55] : memref<32x512xf32, #tpu.memory_space<vmem>>, vector<1x512xf32>
    %c5_56 = arith.constant 5 : index
    %c0_57 = arith.constant 0 : index
    %49 = vector.load %arg8[%c5_56, %c0_57] : memref<8x512xf32, #tpu.memory_space<vmem>>, vector<1x512xf32>
    tpu.vector_store %arg8[%c5_56, %c0_57], %48 {strides = array<i32>} : memref<8x512xf32, #tpu.memory_space<vmem>>, vector<1x512xf32>,
    %c0_58 = arith.constant 0 : index
    %c6 = arith.constant 6 : index
    %50 = memref.load %arg0[%c0_58, %c6] : memref<3x8xi32, #tpu.memory_space<smem>>
    %c0_59 = arith.constant 0 : index
    %c6_60 = arith.constant 6 : index
    %51 = memref.load %arg1[%c0_59, %c6_60] : memref<3x8xi32, #tpu.memory_space<smem>>
    %52 = arith.index_cast %50 : i32 to index
    %c0_61 = arith.constant 0 : index
    %53 = vector.load %arg6[%52, %c0_61] : memref<32x512xf32, #tpu.memory_space<vmem>>, vector<1x512xf32>
    %c6_62 = arith.constant 6 : index
    %c0_63 = arith.constant 0 : index
    %54 = vector.load %arg7[%c6_62, %c0_63] : memref<8x512xf32, #tpu.memory_space<vmem>>, vector<1x512xf32>
    tpu.vector_store %arg7[%c6_62, %c0_63], %53 {strides = array<i32>} : memref<8x512xf32, #tpu.memory_space<vmem>>, vector<1x512xf32>,
    %55 = arith.index_cast %51 : i32 to index
    %c0_64 = arith.constant 0 : index
    %56 = vector.load %arg6[%55, %c0_64] : memref<32x512xf32, #tpu.memory_space<vmem>>, vector<1x512xf32>
    %c6_65 = arith.constant 6 : index
    %c0_66 = arith.constant 0 : index
    %57 = vector.load %arg8[%c6_65, %c0_66] : memref<8x512xf32, #tpu.memory_space<vmem>>, vector<1x512xf32>
    tpu.vector_store %arg8[%c6_65, %c0_66], %56 {strides = array<i32>} : memref<8x512xf32, #tpu.memory_space<vmem>>, vector<1x512xf32>,
    %c0_67 = arith.constant 0 : index
    %c7 = arith.constant 7 : index
    %58 = memref.load %arg0[%c0_67, %c7] : memref<3x8xi32, #tpu.memory_space<smem>>
    %c0_68 = arith.constant 0 : index
    %c7_69 = arith.constant 7 : index
    %59 = memref.load %arg1[%c0_68, %c7_69] : memref<3x8xi32, #tpu.memory_space<smem>>
    %60 = arith.index_cast %58 : i32 to index
    %c0_70 = arith.constant 0 : index
    %61 = vector.load %arg6[%60, %c0_70] : memref<32x512xf32, #tpu.memory_space<vmem>>, vector<1x512xf32>
    %c7_71 = arith.constant 7 : index
    %c0_72 = arith.constant 0 : index
    %62 = vector.load %arg7[%c7_71, %c0_72] : memref<8x512xf32, #tpu.memory_space<vmem>>, vector<1x512xf32>
    tpu.vector_store %arg7[%c7_71, %c0_72], %61 {strides = array<i32>} : memref<8x512xf32, #tpu.memory_space<vmem>>, vector<1x512xf32>,
    %63 = arith.index_cast %59 : i32 to index
    %c0_73 = arith.constant 0 : index
    %64 = vector.load %arg6[%63, %c0_73] : memref<32x512xf32, #tpu.memory_space<vmem>>, vector<1x512xf32>
    %c7_74 = arith.constant 7 : index
    %c0_75 = arith.constant 0 : index
    %65 = vector.load %arg8[%c7_74, %c0_75] : memref<8x512xf32, #tpu.memory_space<vmem>>, vector<1x512xf32>
    tpu.vector_store %arg8[%c7_74, %c0_75], %64 {strides = array<i32>} : memref<8x512xf32, #tpu.memory_space<vmem>>, vector<1x512xf32>,
    %c0_76 = arith.constant 0 : index
    %c0_77 = arith.constant 0 : index
    %66 = vector.load %arg7[%c0_76, %c0_77] : memref<8x512xf32, #tpu.memory_space<vmem>>, vector<8x512xf32>
    %67 = arith.truncf %66 : vector<8x512xf32> to vector<8x512xbf16>
    %c0_78 = arith.constant 0 : index
    %c0_79 = arith.constant 0 : index
    %68 = vector.load %arg8[%c0_78, %c0_79] : memref<8x512xf32, #tpu.memory_space<vmem>>, vector<8x512xf32>
    %69 = arith.truncf %68 : vector<8x512xf32> to vector<8x512xbf16>
    %c0_80 = arith.constant 0 : index
    %c0_81 = arith.constant 0 : index
    %70 = vector.load %arg3[%c0_80, %c0_81] : memref<1024x512xbf16, #tpu.memory_space<vmem>>, vector<512x512xbf16>
    %cst = arith.constant dense<0.000000e+00> : vector<8x512xf32>
    %71 = tpu.matmul %67, %70, %cst {dimension_numbers = #tpu.dot_dimension_numbers<[1], [0], [0], [1], [0, 0, 1, 1], [], []>} : vector<8x512xbf16>, vector<512x512xbf16>, vector<8x512xf32> -> vector<8x512xf32>
    %c512 = arith.constant 512 : index
    %c0_82 = arith.constant 0 : index
    %72 = vector.load %arg3[%c512, %c0_82] : memref<1024x512xbf16, #tpu.memory_space<vmem>>, vector<512x512xbf16>
    %cst_83 = arith.constant dense<0.000000e+00> : vector<8x512xf32>
    %73 = tpu.matmul %69, %72, %cst_83 {dimension_numbers = #tpu.dot_dimension_numbers<[1], [0], [0], [1], [0, 0, 1, 1], [], []>} : vector<8x512xbf16>, vector<512x512xbf16>, vector<8x512xf32> -> vector<8x512xf32>
    %74 = arith.addf %71, %73 : vector<8x512xf32>
    %c0_84 = arith.constant 0 : index
    %c0_85 = arith.constant 0 : index
    %75 = vector.load %arg4[%c0_84, %c0_85] : memref<1x512xf32, #tpu.memory_space<vmem>>, vector<1x512xf32>
    %76 = vector.broadcast %75 : vector<1x512xf32> to vector<8x512xf32>
    %77 = arith.addf %74, %76 : vector<8x512xf32>
    %78 = math.tanh %77 : vector<8x512xf32>
    %c8 = arith.constant 8 : index
    %c0_86 = arith.constant 0 : index
    %79 = vector.load %arg6[%c8, %c0_86] : memref<32x512xf32, #tpu.memory_space<vmem>>, vector<8x512xf32>
    tpu.vector_store %arg6[%c8, %c0_86], %78 {strides = array<i32>} : memref<32x512xf32, #tpu.memory_space<vmem>>, vector<8x512xf32>,
    %c1_87 = arith.constant 1 : index
    %c0_88 = arith.constant 0 : index
    %80 = memref.load %arg0[%c1_87, %c0_88] : memref<3x8xi32, #tpu.memory_space<smem>>
    %c1_89 = arith.constant 1 : index
    %c0_90 = arith.constant 0 : index
    %81 = memref.load %arg1[%c1_89, %c0_90] : memref<3x8xi32, #tpu.memory_space<smem>>
    %82 = arith.index_cast %80 : i32 to index
    %c0_91 = arith.constant 0 : index
    %83 = vector.load %arg6[%82, %c0_91] : memref<32x512xf32, #tpu.memory_space<vmem>>, vector<1x512xf32>
    %c0_92 = arith.constant 0 : index
    %c0_93 = arith.constant 0 : index
    %84 = vector.load %arg7[%c0_92, %c0_93] : memref<8x512xf32, #tpu.memory_space<vmem>>, vector<1x512xf32>
    tpu.vector_store %arg7[%c0_92, %c0_93], %83 {strides = array<i32>} : memref<8x512xf32, #tpu.memory_space<vmem>>, vector<1x512xf32>,
    %85 = arith.index_cast %81 : i32 to index
    %c0_94 = arith.constant 0 : index
    %86 = vector.load %arg6[%85, %c0_94] : memref<32x512xf32, #tpu.memory_space<vmem>>, vector<1x512xf32>
    %c0_95 = arith.constant 0 : index
    %c0_96 = arith.constant 0 : index
    %87 = vector.load %arg8[%c0_95, %c0_96] : memref<8x512xf32, #tpu.memory_space<vmem>>, vector<1x512xf32>
    tpu.vector_store %arg8[%c0_95, %c0_96], %86 {strides = array<i32>} : memref<8x512xf32, #tpu.memory_space<vmem>>, vector<1x512xf32>,
    %c1_97 = arith.constant 1 : index
    %c1_98 = arith.constant 1 : index
    %88 = memref.load %arg0[%c1_97, %c1_98] : memref<3x8xi32, #tpu.memory_space<smem>>
    %c1_99 = arith.constant 1 : index
    %c1_100 = arith.constant 1 : index
    %89 = memref.load %arg1[%c1_99, %c1_100] : memref<3x8xi32, #tpu.memory_space<smem>>
    %90 = arith.index_cast %88 : i32 to index
    %c0_101 = arith.constant 0 : index
    %91 = vector.load %arg6[%90, %c0_101] : memref<32x512xf32, #tpu.memory_space<vmem>>, vector<1x512xf32>
    %c1_102 = arith.constant 1 : index
    %c0_103 = arith.constant 0 : index
    %92 = vector.load %arg7[%c1_102, %c0_103] : memref<8x512xf32, #tpu.memory_space<vmem>>, vector<1x512xf32>
    tpu.vector_store %arg7[%c1_102, %c0_103], %91 {strides = array<i32>} : memref<8x512xf32, #tpu.memory_space<vmem>>, vector<1x512xf32>,
    %93 = arith.index_cast %89 : i32 to index
    %c0_104 = arith.constant 0 : index
    %94 = vector.load %arg6[%93, %c0_104] : memref<32x512xf32, #tpu.memory_space<vmem>>, vector<1x512xf32>
    %c1_105 = arith.constant 1 : index
    %c0_106 = arith.constant 0 : index
    %95 = vector.load %arg8[%c1_105, %c0_106] : memref<8x512xf32, #tpu.memory_space<vmem>>, vector<1x512xf32>
    tpu.vector_store %arg8[%c1_105, %c0_106], %94 {strides = array<i32>} : memref<8x512xf32, #tpu.memory_space<vmem>>, vector<1x512xf32>,
    %c1_107 = arith.constant 1 : index
    %c2_108 = arith.constant 2 : index
    %96 = memref.load %arg0[%c1_107, %c2_108] : memref<3x8xi32, #tpu.memory_space<smem>>
    %c1_109 = arith.constant 1 : index
    %c2_110 = arith.constant 2 : index
    %97 = memref.load %arg1[%c1_109, %c2_110] : memref<3x8xi32, #tpu.memory_space<smem>>
    %98 = arith.index_cast %96 : i32 to index
    %c0_111 = arith.constant 0 : index
    %99 = vector.load %arg6[%98, %c0_111] : memref<32x512xf32, #tpu.memory_space<vmem>>, vector<1x512xf32>
    %c2_112 = arith.constant 2 : index
    %c0_113 = arith.constant 0 : index
    %100 = vector.load %arg7[%c2_112, %c0_113] : memref<8x512xf32, #tpu.memory_space<vmem>>, vector<1x512xf32>
    tpu.vector_store %arg7[%c2_112, %c0_113], %99 {strides = array<i32>} : memref<8x512xf32, #tpu.memory_space<vmem>>, vector<1x512xf32>,
    %101 = arith.index_cast %97 : i32 to index
    %c0_114 = arith.constant 0 : index
    %102 = vector.load %arg6[%101, %c0_114] : memref<32x512xf32, #tpu.memory_space<vmem>>, vector<1x512xf32>
    %c2_115 = arith.constant 2 : index
    %c0_116 = arith.constant 0 : index
    %103 = vector.load %arg8[%c2_115, %c0_116] : memref<8x512xf32, #tpu.memory_space<vmem>>, vector<1x512xf32>
    tpu.vector_store %arg8[%c2_115, %c0_116], %102 {strides = array<i32>} : memref<8x512xf32, #tpu.memory_space<vmem>>, vector<1x512xf32>,
    %c1_117 = arith.constant 1 : index
    %c3_118 = arith.constant 3 : index
    %104 = memref.load %arg0[%c1_117, %c3_118] : memref<3x8xi32, #tpu.memory_space<smem>>
    %c1_119 = arith.constant 1 : index
    %c3_120 = arith.constant 3 : index
    %105 = memref.load %arg1[%c1_119, %c3_120] : memref<3x8xi32, #tpu.memory_space<smem>>
    %106 = arith.index_cast %104 : i32 to index
    %c0_121 = arith.constant 0 : index
    %107 = vector.load %arg6[%106, %c0_121] : memref<32x512xf32, #tpu.memory_space<vmem>>, vector<1x512xf32>
    %c3_122 = arith.constant 3 : index
    %c0_123 = arith.constant 0 : index
    %108 = vector.load %arg7[%c3_122, %c0_123] : memref<8x512xf32, #tpu.memory_space<vmem>>, vector<1x512xf32>
    tpu.vector_store %arg7[%c3_122, %c0_123], %107 {strides = array<i32>} : memref<8x512xf32, #tpu.memory_space<vmem>>, vector<1x512xf32>,
    %109 = arith.index_cast %105 : i32 to index
    %c0_124 = arith.constant 0 : index
    %110 = vector.load %arg6[%109, %c0_124] : memref<32x512xf32, #tpu.memory_space<vmem>>, vector<1x512xf32>
    %c3_125 = arith.constant 3 : index
    %c0_126 = arith.constant 0 : index
    %111 = vector.load %arg8[%c3_125, %c0_126] : memref<8x512xf32, #tpu.memory_space<vmem>>, vector<1x512xf32>
    tpu.vector_store %arg8[%c3_125, %c0_126], %110 {strides = array<i32>} : memref<8x512xf32, #tpu.memory_space<vmem>>, vector<1x512xf32>,
    %c1_127 = arith.constant 1 : index
    %c4_128 = arith.constant 4 : index
    %112 = memref.load %arg0[%c1_127, %c4_128] : memref<3x8xi32, #tpu.memory_space<smem>>
    %c1_129 = arith.constant 1 : index
    %c4_130 = arith.constant 4 : index
    %113 = memref.load %arg1[%c1_129, %c4_130] : memref<3x8xi32, #tpu.memory_space<smem>>
    %114 = arith.index_cast %112 : i32 to index
    %c0_131 = arith.constant 0 : index
    %115 = vector.load %arg6[%114, %c0_131] : memref<32x512xf32, #tpu.memory_space<vmem>>, vector<1x512xf32>
    %c4_132 = arith.constant 4 : index
    %c0_133 = arith.constant 0 : index
    %116 = vector.load %arg7[%c4_132, %c0_133] : memref<8x512xf32, #tpu.memory_space<vmem>>, vector<1x512xf32>
    tpu.vector_store %arg7[%c4_132, %c0_133], %115 {strides = array<i32>} : memref<8x512xf32, #tpu.memory_space<vmem>>, vector<1x512xf32>,
    %117 = arith.index_cast %113 : i32 to index
    %c0_134 = arith.constant 0 : index
    %118 = vector.load %arg6[%117, %c0_134] : memref<32x512xf32, #tpu.memory_space<vmem>>, vector<1x512xf32>
    %c4_135 = arith.constant 4 : index
    %c0_136 = arith.constant 0 : index
    %119 = vector.load %arg8[%c4_135, %c0_136] : memref<8x512xf32, #tpu.memory_space<vmem>>, vector<1x512xf32>
    tpu.vector_store %arg8[%c4_135, %c0_136], %118 {strides = array<i32>} : memref<8x512xf32, #tpu.memory_space<vmem>>, vector<1x512xf32>,
    %c1_137 = arith.constant 1 : index
    %c5_138 = arith.constant 5 : index
    %120 = memref.load %arg0[%c1_137, %c5_138] : memref<3x8xi32, #tpu.memory_space<smem>>
    %c1_139 = arith.constant 1 : index
    %c5_140 = arith.constant 5 : index
    %121 = memref.load %arg1[%c1_139, %c5_140] : memref<3x8xi32, #tpu.memory_space<smem>>
    %122 = arith.index_cast %120 : i32 to index
    %c0_141 = arith.constant 0 : index
    %123 = vector.load %arg6[%122, %c0_141] : memref<32x512xf32, #tpu.memory_space<vmem>>, vector<1x512xf32>
    %c5_142 = arith.constant 5 : index
    %c0_143 = arith.constant 0 : index
    %124 = vector.load %arg7[%c5_142, %c0_143] : memref<8x512xf32, #tpu.memory_space<vmem>>, vector<1x512xf32>
    tpu.vector_store %arg7[%c5_142, %c0_143], %123 {strides = array<i32>} : memref<8x512xf32, #tpu.memory_space<vmem>>, vector<1x512xf32>,
    %125 = arith.index_cast %121 : i32 to index
    %c0_144 = arith.constant 0 : index
    %126 = vector.load %arg6[%125, %c0_144] : memref<32x512xf32, #tpu.memory_space<vmem>>, vector<1x512xf32>
    %c5_145 = arith.constant 5 : index
    %c0_146 = arith.constant 0 : index
    %127 = vector.load %arg8[%c5_145, %c0_146] : memref<8x512xf32, #tpu.memory_space<vmem>>, vector<1x512xf32>
    tpu.vector_store %arg8[%c5_145, %c0_146], %126 {strides = array<i32>} : memref<8x512xf32, #tpu.memory_space<vmem>>, vector<1x512xf32>,
    %c1_147 = arith.constant 1 : index
    %c6_148 = arith.constant 6 : index
    %128 = memref.load %arg0[%c1_147, %c6_148] : memref<3x8xi32, #tpu.memory_space<smem>>
    %c1_149 = arith.constant 1 : index
    %c6_150 = arith.constant 6 : index
    %129 = memref.load %arg1[%c1_149, %c6_150] : memref<3x8xi32, #tpu.memory_space<smem>>
    %130 = arith.index_cast %128 : i32 to index
    %c0_151 = arith.constant 0 : index
    %131 = vector.load %arg6[%130, %c0_151] : memref<32x512xf32, #tpu.memory_space<vmem>>, vector<1x512xf32>
    %c6_152 = arith.constant 6 : index
    %c0_153 = arith.constant 0 : index
    %132 = vector.load %arg7[%c6_152, %c0_153] : memref<8x512xf32, #tpu.memory_space<vmem>>, vector<1x512xf32>
    tpu.vector_store %arg7[%c6_152, %c0_153], %131 {strides = array<i32>} : memref<8x512xf32, #tpu.memory_space<vmem>>, vector<1x512xf32>,
    %133 = arith.index_cast %129 : i32 to index
    %c0_154 = arith.constant 0 : index
    %134 = vector.load %arg6[%133, %c0_154] : memref<32x512xf32, #tpu.memory_space<vmem>>, vector<1x512xf32>
    %c6_155 = arith.constant 6 : index
    %c0_156 = arith.constant 0 : index
    %135 = vector.load %arg8[%c6_155, %c0_156] : memref<8x512xf32, #tpu.memory_space<vmem>>, vector<1x512xf32>
    tpu.vector_store %arg8[%c6_155, %c0_156], %134 {strides = array<i32>} : memref<8x512xf32, #tpu.memory_space<vmem>>, vector<1x512xf32>,
    %c1_157 = arith.constant 1 : index
    %c7_158 = arith.constant 7 : index
    %136 = memref.load %arg0[%c1_157, %c7_158] : memref<3x8xi32, #tpu.memory_space<smem>>
    %c1_159 = arith.constant 1 : index
    %c7_160 = arith.constant 7 : index
    %137 = memref.load %arg1[%c1_159, %c7_160] : memref<3x8xi32, #tpu.memory_space<smem>>
    %138 = arith.index_cast %136 : i32 to index
    %c0_161 = arith.constant 0 : index
    %139 = vector.load %arg6[%138, %c0_161] : memref<32x512xf32, #tpu.memory_space<vmem>>, vector<1x512xf32>
    %c7_162 = arith.constant 7 : index
    %c0_163 = arith.constant 0 : index
    %140 = vector.load %arg7[%c7_162, %c0_163] : memref<8x512xf32, #tpu.memory_space<vmem>>, vector<1x512xf32>
    tpu.vector_store %arg7[%c7_162, %c0_163], %139 {strides = array<i32>} : memref<8x512xf32, #tpu.memory_space<vmem>>, vector<1x512xf32>,
    %141 = arith.index_cast %137 : i32 to index
    %c0_164 = arith.constant 0 : index
    %142 = vector.load %arg6[%141, %c0_164] : memref<32x512xf32, #tpu.memory_space<vmem>>, vector<1x512xf32>
    %c7_165 = arith.constant 7 : index
    %c0_166 = arith.constant 0 : index
    %143 = vector.load %arg8[%c7_165, %c0_166] : memref<8x512xf32, #tpu.memory_space<vmem>>, vector<1x512xf32>
    tpu.vector_store %arg8[%c7_165, %c0_166], %142 {strides = array<i32>} : memref<8x512xf32, #tpu.memory_space<vmem>>, vector<1x512xf32>,
    %c0_167 = arith.constant 0 : index
    %c0_168 = arith.constant 0 : index
    %144 = vector.load %arg7[%c0_167, %c0_168] : memref<8x512xf32, #tpu.memory_space<vmem>>, vector<8x512xf32>
    %145 = arith.truncf %144 : vector<8x512xf32> to vector<8x512xbf16>
    %c0_169 = arith.constant 0 : index
    %c0_170 = arith.constant 0 : index
    %146 = vector.load %arg8[%c0_169, %c0_170] : memref<8x512xf32, #tpu.memory_space<vmem>>, vector<8x512xf32>
    %147 = arith.truncf %146 : vector<8x512xf32> to vector<8x512xbf16>
    %c0_171 = arith.constant 0 : index
    %c0_172 = arith.constant 0 : index
    %148 = vector.load %arg3[%c0_171, %c0_172] : memref<1024x512xbf16, #tpu.memory_space<vmem>>, vector<512x512xbf16>
    %cst_173 = arith.constant dense<0.000000e+00> : vector<8x512xf32>
    %149 = tpu.matmul %145, %148, %cst_173 {dimension_numbers = #tpu.dot_dimension_numbers<[1], [0], [0], [1], [0, 0, 1, 1], [], []>} : vector<8x512xbf16>, vector<512x512xbf16>, vector<8x512xf32> -> vector<8x512xf32>
    %c512_174 = arith.constant 512 : index
    %c0_175 = arith.constant 0 : index
    %150 = vector.load %arg3[%c512_174, %c0_175] : memref<1024x512xbf16, #tpu.memory_space<vmem>>, vector<512x512xbf16>
    %cst_176 = arith.constant dense<0.000000e+00> : vector<8x512xf32>
    %151 = tpu.matmul %147, %150, %cst_176 {dimension_numbers = #tpu.dot_dimension_numbers<[1], [0], [0], [1], [0, 0, 1, 1], [], []>} : vector<8x512xbf16>, vector<512x512xbf16>, vector<8x512xf32> -> vector<8x512xf32>
    %152 = arith.addf %149, %151 : vector<8x512xf32>
    %c0_177 = arith.constant 0 : index
    %c0_178 = arith.constant 0 : index
    %153 = vector.load %arg4[%c0_177, %c0_178] : memref<1x512xf32, #tpu.memory_space<vmem>>, vector<1x512xf32>
    %154 = vector.broadcast %153 : vector<1x512xf32> to vector<8x512xf32>
    %155 = arith.addf %152, %154 : vector<8x512xf32>
    %156 = math.tanh %155 : vector<8x512xf32>
    %c16 = arith.constant 16 : index
    %c0_179 = arith.constant 0 : index
    %157 = vector.load %arg6[%c16, %c0_179] : memref<32x512xf32, #tpu.memory_space<vmem>>, vector<8x512xf32>
    tpu.vector_store %arg6[%c16, %c0_179], %156 {strides = array<i32>} : memref<32x512xf32, #tpu.memory_space<vmem>>, vector<8x512xf32>,
    %c2_180 = arith.constant 2 : index
    %c0_181 = arith.constant 0 : index
    %158 = memref.load %arg0[%c2_180, %c0_181] : memref<3x8xi32, #tpu.memory_space<smem>>
    %c2_182 = arith.constant 2 : index
    %c0_183 = arith.constant 0 : index
    %159 = memref.load %arg1[%c2_182, %c0_183] : memref<3x8xi32, #tpu.memory_space<smem>>
    %160 = arith.index_cast %158 : i32 to index
    %c0_184 = arith.constant 0 : index
    %161 = vector.load %arg6[%160, %c0_184] : memref<32x512xf32, #tpu.memory_space<vmem>>, vector<1x512xf32>
    %c0_185 = arith.constant 0 : index
    %c0_186 = arith.constant 0 : index
    %162 = vector.load %arg7[%c0_185, %c0_186] : memref<8x512xf32, #tpu.memory_space<vmem>>, vector<1x512xf32>
    tpu.vector_store %arg7[%c0_185, %c0_186], %161 {strides = array<i32>} : memref<8x512xf32, #tpu.memory_space<vmem>>, vector<1x512xf32>,
    %163 = arith.index_cast %159 : i32 to index
    %c0_187 = arith.constant 0 : index
    %164 = vector.load %arg6[%163, %c0_187] : memref<32x512xf32, #tpu.memory_space<vmem>>, vector<1x512xf32>
    %c0_188 = arith.constant 0 : index
    %c0_189 = arith.constant 0 : index
    %165 = vector.load %arg8[%c0_188, %c0_189] : memref<8x512xf32, #tpu.memory_space<vmem>>, vector<1x512xf32>
    tpu.vector_store %arg8[%c0_188, %c0_189], %164 {strides = array<i32>} : memref<8x512xf32, #tpu.memory_space<vmem>>, vector<1x512xf32>,
    %c2_190 = arith.constant 2 : index
    %c1_191 = arith.constant 1 : index
    %166 = memref.load %arg0[%c2_190, %c1_191] : memref<3x8xi32, #tpu.memory_space<smem>>
    %c2_192 = arith.constant 2 : index
    %c1_193 = arith.constant 1 : index
    %167 = memref.load %arg1[%c2_192, %c1_193] : memref<3x8xi32, #tpu.memory_space<smem>>
    %168 = arith.index_cast %166 : i32 to index
    %c0_194 = arith.constant 0 : index
    %169 = vector.load %arg6[%168, %c0_194] : memref<32x512xf32, #tpu.memory_space<vmem>>, vector<1x512xf32>
    %c1_195 = arith.constant 1 : index
    %c0_196 = arith.constant 0 : index
    %170 = vector.load %arg7[%c1_195, %c0_196] : memref<8x512xf32, #tpu.memory_space<vmem>>, vector<1x512xf32>
    tpu.vector_store %arg7[%c1_195, %c0_196], %169 {strides = array<i32>} : memref<8x512xf32, #tpu.memory_space<vmem>>, vector<1x512xf32>,
    %171 = arith.index_cast %167 : i32 to index
    %c0_197 = arith.constant 0 : index
    %172 = vector.load %arg6[%171, %c0_197] : memref<32x512xf32, #tpu.memory_space<vmem>>, vector<1x512xf32>
    %c1_198 = arith.constant 1 : index
    %c0_199 = arith.constant 0 : index
    %173 = vector.load %arg8[%c1_198, %c0_199] : memref<8x512xf32, #tpu.memory_space<vmem>>, vector<1x512xf32>
    tpu.vector_store %arg8[%c1_198, %c0_199], %172 {strides = array<i32>} : memref<8x512xf32, #tpu.memory_space<vmem>>, vector<1x512xf32>,
    %c2_200 = arith.constant 2 : index
    %c2_201 = arith.constant 2 : index
    %174 = memref.load %arg0[%c2_200, %c2_201] : memref<3x8xi32, #tpu.memory_space<smem>>
    %c2_202 = arith.constant 2 : index
    %c2_203 = arith.constant 2 : index
    %175 = memref.load %arg1[%c2_202, %c2_203] : memref<3x8xi32, #tpu.memory_space<smem>>
    %176 = arith.index_cast %174 : i32 to index
    %c0_204 = arith.constant 0 : index
    %177 = vector.load %arg6[%176, %c0_204] : memref<32x512xf32, #tpu.memory_space<vmem>>, vector<1x512xf32>
    %c2_205 = arith.constant 2 : index
    %c0_206 = arith.constant 0 : index
    %178 = vector.load %arg7[%c2_205, %c0_206] : memref<8x512xf32, #tpu.memory_space<vmem>>, vector<1x512xf32>
    tpu.vector_store %arg7[%c2_205, %c0_206], %177 {strides = array<i32>} : memref<8x512xf32, #tpu.memory_space<vmem>>, vector<1x512xf32>,
    %179 = arith.index_cast %175 : i32 to index
    %c0_207 = arith.constant 0 : index
    %180 = vector.load %arg6[%179, %c0_207] : memref<32x512xf32, #tpu.memory_space<vmem>>, vector<1x512xf32>
    %c2_208 = arith.constant 2 : index
    %c0_209 = arith.constant 0 : index
    %181 = vector.load %arg8[%c2_208, %c0_209] : memref<8x512xf32, #tpu.memory_space<vmem>>, vector<1x512xf32>
    tpu.vector_store %arg8[%c2_208, %c0_209], %180 {strides = array<i32>} : memref<8x512xf32, #tpu.memory_space<vmem>>, vector<1x512xf32>,
    %c2_210 = arith.constant 2 : index
    %c3_211 = arith.constant 3 : index
    %182 = memref.load %arg0[%c2_210, %c3_211] : memref<3x8xi32, #tpu.memory_space<smem>>
    %c2_212 = arith.constant 2 : index
    %c3_213 = arith.constant 3 : index
    %183 = memref.load %arg1[%c2_212, %c3_213] : memref<3x8xi32, #tpu.memory_space<smem>>
    %184 = arith.index_cast %182 : i32 to index
    %c0_214 = arith.constant 0 : index
    %185 = vector.load %arg6[%184, %c0_214] : memref<32x512xf32, #tpu.memory_space<vmem>>, vector<1x512xf32>
    %c3_215 = arith.constant 3 : index
    %c0_216 = arith.constant 0 : index
    %186 = vector.load %arg7[%c3_215, %c0_216] : memref<8x512xf32, #tpu.memory_space<vmem>>, vector<1x512xf32>
    tpu.vector_store %arg7[%c3_215, %c0_216], %185 {strides = array<i32>} : memref<8x512xf32, #tpu.memory_space<vmem>>, vector<1x512xf32>,
    %187 = arith.index_cast %183 : i32 to index
    %c0_217 = arith.constant 0 : index
    %188 = vector.load %arg6[%187, %c0_217] : memref<32x512xf32, #tpu.memory_space<vmem>>, vector<1x512xf32>
    %c3_218 = arith.constant 3 : index
    %c0_219 = arith.constant 0 : index
    %189 = vector.load %arg8[%c3_218, %c0_219] : memref<8x512xf32, #tpu.memory_space<vmem>>, vector<1x512xf32>
    tpu.vector_store %arg8[%c3_218, %c0_219], %188 {strides = array<i32>} : memref<8x512xf32, #tpu.memory_space<vmem>>, vector<1x512xf32>,
    %c2_220 = arith.constant 2 : index
    %c4_221 = arith.constant 4 : index
    %190 = memref.load %arg0[%c2_220, %c4_221] : memref<3x8xi32, #tpu.memory_space<smem>>
    %c2_222 = arith.constant 2 : index
    %c4_223 = arith.constant 4 : index
    %191 = memref.load %arg1[%c2_222, %c4_223] : memref<3x8xi32, #tpu.memory_space<smem>>
    %192 = arith.index_cast %190 : i32 to index
    %c0_224 = arith.constant 0 : index
    %193 = vector.load %arg6[%192, %c0_224] : memref<32x512xf32, #tpu.memory_space<vmem>>, vector<1x512xf32>
    %c4_225 = arith.constant 4 : index
    %c0_226 = arith.constant 0 : index
    %194 = vector.load %arg7[%c4_225, %c0_226] : memref<8x512xf32, #tpu.memory_space<vmem>>, vector<1x512xf32>
    tpu.vector_store %arg7[%c4_225, %c0_226], %193 {strides = array<i32>} : memref<8x512xf32, #tpu.memory_space<vmem>>, vector<1x512xf32>,
    %195 = arith.index_cast %191 : i32 to index
    %c0_227 = arith.constant 0 : index
    %196 = vector.load %arg6[%195, %c0_227] : memref<32x512xf32, #tpu.memory_space<vmem>>, vector<1x512xf32>
    %c4_228 = arith.constant 4 : index
    %c0_229 = arith.constant 0 : index
    %197 = vector.load %arg8[%c4_228, %c0_229] : memref<8x512xf32, #tpu.memory_space<vmem>>, vector<1x512xf32>
    tpu.vector_store %arg8[%c4_228, %c0_229], %196 {strides = array<i32>} : memref<8x512xf32, #tpu.memory_space<vmem>>, vector<1x512xf32>,
    %c2_230 = arith.constant 2 : index
    %c5_231 = arith.constant 5 : index
    %198 = memref.load %arg0[%c2_230, %c5_231] : memref<3x8xi32, #tpu.memory_space<smem>>
    %c2_232 = arith.constant 2 : index
    %c5_233 = arith.constant 5 : index
    %199 = memref.load %arg1[%c2_232, %c5_233] : memref<3x8xi32, #tpu.memory_space<smem>>
    %200 = arith.index_cast %198 : i32 to index
    %c0_234 = arith.constant 0 : index
    %201 = vector.load %arg6[%200, %c0_234] : memref<32x512xf32, #tpu.memory_space<vmem>>, vector<1x512xf32>
    %c5_235 = arith.constant 5 : index
    %c0_236 = arith.constant 0 : index
    %202 = vector.load %arg7[%c5_235, %c0_236] : memref<8x512xf32, #tpu.memory_space<vmem>>, vector<1x512xf32>
    tpu.vector_store %arg7[%c5_235, %c0_236], %201 {strides = array<i32>} : memref<8x512xf32, #tpu.memory_space<vmem>>, vector<1x512xf32>,
    %203 = arith.index_cast %199 : i32 to index
    %c0_237 = arith.constant 0 : index
    %204 = vector.load %arg6[%203, %c0_237] : memref<32x512xf32, #tpu.memory_space<vmem>>, vector<1x512xf32>
    %c5_238 = arith.constant 5 : index
    %c0_239 = arith.constant 0 : index
    %205 = vector.load %arg8[%c5_238, %c0_239] : memref<8x512xf32, #tpu.memory_space<vmem>>, vector<1x512xf32>
    tpu.vector_store %arg8[%c5_238, %c0_239], %204 {strides = array<i32>} : memref<8x512xf32, #tpu.memory_space<vmem>>, vector<1x512xf32>,
    %c2_240 = arith.constant 2 : index
    %c6_241 = arith.constant 6 : index
    %206 = memref.load %arg0[%c2_240, %c6_241] : memref<3x8xi32, #tpu.memory_space<smem>>
    %c2_242 = arith.constant 2 : index
    %c6_243 = arith.constant 6 : index
    %207 = memref.load %arg1[%c2_242, %c6_243] : memref<3x8xi32, #tpu.memory_space<smem>>
    %208 = arith.index_cast %206 : i32 to index
    %c0_244 = arith.constant 0 : index
    %209 = vector.load %arg6[%208, %c0_244] : memref<32x512xf32, #tpu.memory_space<vmem>>, vector<1x512xf32>
    %c6_245 = arith.constant 6 : index
    %c0_246 = arith.constant 0 : index
    %210 = vector.load %arg7[%c6_245, %c0_246] : memref<8x512xf32, #tpu.memory_space<vmem>>, vector<1x512xf32>
    tpu.vector_store %arg7[%c6_245, %c0_246], %209 {strides = array<i32>} : memref<8x512xf32, #tpu.memory_space<vmem>>, vector<1x512xf32>,
    %211 = arith.index_cast %207 : i32 to index
    %c0_247 = arith.constant 0 : index
    %212 = vector.load %arg6[%211, %c0_247] : memref<32x512xf32, #tpu.memory_space<vmem>>, vector<1x512xf32>
    %c6_248 = arith.constant 6 : index
    %c0_249 = arith.constant 0 : index
    %213 = vector.load %arg8[%c6_248, %c0_249] : memref<8x512xf32, #tpu.memory_space<vmem>>, vector<1x512xf32>
    tpu.vector_store %arg8[%c6_248, %c0_249], %212 {strides = array<i32>} : memref<8x512xf32, #tpu.memory_space<vmem>>, vector<1x512xf32>,
    %c2_250 = arith.constant 2 : index
    %c7_251 = arith.constant 7 : index
    %214 = memref.load %arg0[%c2_250, %c7_251] : memref<3x8xi32, #tpu.memory_space<smem>>
    %c2_252 = arith.constant 2 : index
    %c7_253 = arith.constant 7 : index
    %215 = memref.load %arg1[%c2_252, %c7_253] : memref<3x8xi32, #tpu.memory_space<smem>>
    %216 = arith.index_cast %214 : i32 to index
    %c0_254 = arith.constant 0 : index
    %217 = vector.load %arg6[%216, %c0_254] : memref<32x512xf32, #tpu.memory_space<vmem>>, vector<1x512xf32>
    %c7_255 = arith.constant 7 : index
    %c0_256 = arith.constant 0 : index
    %218 = vector.load %arg7[%c7_255, %c0_256] : memref<8x512xf32, #tpu.memory_space<vmem>>, vector<1x512xf32>
    tpu.vector_store %arg7[%c7_255, %c0_256], %217 {strides = array<i32>} : memref<8x512xf32, #tpu.memory_space<vmem>>, vector<1x512xf32>,
    %219 = arith.index_cast %215 : i32 to index
    %c0_257 = arith.constant 0 : index
    %220 = vector.load %arg6[%219, %c0_257] : memref<32x512xf32, #tpu.memory_space<vmem>>, vector<1x512xf32>
    %c7_258 = arith.constant 7 : index
    %c0_259 = arith.constant 0 : index
    %221 = vector.load %arg8[%c7_258, %c0_259] : memref<8x512xf32, #tpu.memory_space<vmem>>, vector<1x512xf32>
    tpu.vector_store %arg8[%c7_258, %c0_259], %220 {strides = array<i32>} : memref<8x512xf32, #tpu.memory_space<vmem>>, vector<1x512xf32>,
    %c0_260 = arith.constant 0 : index
    %c0_261 = arith.constant 0 : index
    %222 = vector.load %arg7[%c0_260, %c0_261] : memref<8x512xf32, #tpu.memory_space<vmem>>, vector<8x512xf32>
    %223 = arith.truncf %222 : vector<8x512xf32> to vector<8x512xbf16>
    %c0_262 = arith.constant 0 : index
    %c0_263 = arith.constant 0 : index
    %224 = vector.load %arg8[%c0_262, %c0_263] : memref<8x512xf32, #tpu.memory_space<vmem>>, vector<8x512xf32>
    %225 = arith.truncf %224 : vector<8x512xf32> to vector<8x512xbf16>
    %c0_264 = arith.constant 0 : index
    %c0_265 = arith.constant 0 : index
    %226 = vector.load %arg3[%c0_264, %c0_265] : memref<1024x512xbf16, #tpu.memory_space<vmem>>, vector<512x512xbf16>
    %cst_266 = arith.constant dense<0.000000e+00> : vector<8x512xf32>
    %227 = tpu.matmul %223, %226, %cst_266 {dimension_numbers = #tpu.dot_dimension_numbers<[1], [0], [0], [1], [0, 0, 1, 1], [], []>} : vector<8x512xbf16>, vector<512x512xbf16>, vector<8x512xf32> -> vector<8x512xf32>
    %c512_267 = arith.constant 512 : index
    %c0_268 = arith.constant 0 : index
    %228 = vector.load %arg3[%c512_267, %c0_268] : memref<1024x512xbf16, #tpu.memory_space<vmem>>, vector<512x512xbf16>
    %cst_269 = arith.constant dense<0.000000e+00> : vector<8x512xf32>
    %229 = tpu.matmul %225, %228, %cst_269 {dimension_numbers = #tpu.dot_dimension_numbers<[1], [0], [0], [1], [0, 0, 1, 1], [], []>} : vector<8x512xbf16>, vector<512x512xbf16>, vector<8x512xf32> -> vector<8x512xf32>
    %230 = arith.addf %227, %229 : vector<8x512xf32>
    %c0_270 = arith.constant 0 : index
    %c0_271 = arith.constant 0 : index
    %231 = vector.load %arg4[%c0_270, %c0_271] : memref<1x512xf32, #tpu.memory_space<vmem>>, vector<1x512xf32>
    %232 = vector.broadcast %231 : vector<1x512xf32> to vector<8x512xf32>
    %233 = arith.addf %230, %232 : vector<8x512xf32>
    %234 = math.tanh %233 : vector<8x512xf32>
    %c24 = arith.constant 24 : index
    %c0_272 = arith.constant 0 : index
    %235 = vector.load %arg6[%c24, %c0_272] : memref<32x512xf32, #tpu.memory_space<vmem>>, vector<8x512xf32>
    tpu.vector_store %arg6[%c24, %c0_272], %234 {strides = array<i32>} : memref<32x512xf32, #tpu.memory_space<vmem>>, vector<8x512xf32>,
    %c8_273 = arith.constant 8 : index
    %c0_274 = arith.constant 0 : index
    %236 = vector.load %arg6[%c8_273, %c0_274] : memref<32x512xf32, #tpu.memory_space<vmem>>, vector<24x512xf32>
    %c0_275 = arith.constant 0 : index
    %c0_276 = arith.constant 0 : index
    %237 = vector.load %arg5[%c0_275, %c0_276] : memref<24x512xf32, #tpu.memory_space<vmem>>, vector<24x512xf32>
    tpu.vector_store %arg5[%c0_275, %c0_276], %236 {strides = array<i32>} : memref<24x512xf32, #tpu.memory_space<vmem>>, vector<24x512xf32>,
    return
  }
}

</mosaic_0001>

<bundles_post_ra>
// kernel: tpu_custom_call.1
= control target key start
LH: loop header
LB: loop body
LE: loop exit
PB: predicated region body
PF: predicated region fallthrough
CT: control target
= control target key end

     0   :  { %s9431_s0 = inlined_call_operand.hbm [shape: s32[3,8], index: 0, kind: input, shape index: {}]   ;;  %s9432_s1 = inlined_call_operand.hbm [shape: s32[3,8], index: 1, kind: input, shape index: {}]   ;;  %s9433_s2 = inlined_call_operand.hbm [shape: f32[8,512], index: 2, kind: input, shape index: {}]   ;;  %s9434_s3 = inlined_call_operand.hbm [shape: bf16[1024,512], index: 3, kind: input, shape index: {}]   ;;  %s9435_s4 = inlined_call_operand.vmem [shape: f32[1,512], index: 4, kind: input, shape index: {}]   ;;  %s9436_s5 = inlined_call_operand.hbm [shape: f32[24,512], index: 5, kind: output, shape index: {}]  }
   0x1   :  { %9439 = sst [smem:[#allocation21_spill]] %s9435_s4 }
   0x2   :  { %9440 = sst [smem:[#allocation22_spill]] %s9436_s5 }
   0x3   :  { %10 = vsyncpa [#allocation8], 0 }
   0x4   :  { %11 = vsyncpa [#allocation10], 0 }
   0x5   :  { %12 = vsyncpa [#allocation6], 0 }
   0x6   :  { %13 = vsyncpa [#allocation13], 0 }
   0x7   :  { %14 = vsyncpa [#allocation7], 0  ;;  %s8829_s18 = smov [#allocation5]   ;;  %s8830_s21 = smov [#allocation9]  }
   0x8   :  { %22 = dma.hbm_to_smem %s9431_s0, 64, %s8829_s18, [#allocation8]  }
   0x9   :  { %30 = dma.hbm_to_smem %s9432_s1, 64, %s8830_s21, [#allocation10]  }
   0xa   :  { %s8831_s24 = smov [#allocation11]   ;;  %s8832_s26 = smov [#allocation12]  }
   0xb   :  { %s37_s25 = sshll.u32 %s8831_s24, 4  ;;  %s46_s27 = sshll.u32 %s8832_s26, 4  ;;  %s38_s25 = int_to_ptr.vmem [resolvable:$true] %s37_s25  ;;  %s47_s27 = int_to_ptr.vmem [resolvable:$true] %s46_s27 }
   0xc   :  { %s8767_s28 = scalar_lea.vmem %s38_s25, 512  ;;  %p8772_p1 = scmp.lt.s32.totalorder %s38_s25, %s38_s25 }
   0xd   :  { %p8768_p0 = scmp.ne.s32.totalorder %s38_s25, %s8767_s28  ;;  %p8773_p2 = scmp.lt.s32.totalorder %s8767_s28, %s8767_s28 }
   0xf   :  { %p8774_p3 = por %p8773_p2, %p8772_p1 }
  0x11   :  { %p8775_p4 = pnand %p8774_p3, %p8768_p0 }
  0x13   :  { %8778 = shalt.err (!%p8775_p4)
}
  0x14   :  { %40 = dma.hbm_to_vmem [thread:$0]  %s9433_s2, 512, %s38_s25, [#allocation6]  }
  0x15   :  { %s8787_s30 = scalar_lea.vmem %s47_s27, 32768  ;;  %p8792_p6 = scmp.lt.s32.totalorder %s47_s27, %s47_s27 }
  0x16   :  { %p8788_p5 = scmp.ne.s32.totalorder %s47_s27, %s8787_s30  ;;  %p8793_p7 = scmp.lt.s32.totalorder %s8787_s30, %s8787_s30 }
  0x18   :  { %p8794_p8 = por %p8793_p7, %p8792_p6 }
  0x1a   :  { %p8795_p9 = pnand %p8794_p8, %p8788_p5 }
  0x1c   :  { %8798 = shalt.err (!%p8795_p9)
}
  0x1d   :  { %s8833_s1 = smov 256   ;;  %s8834_s6 = smov 16  }
  0x1e   :  { %52 = dma.hbm_to_vmem [thread:$0]  %s9434_s3, 32768, %s47_s27, [#allocation13], %s8833_s1, %s8833_s1, %s8834_s6  }
  0x1f   :  { %8819 = dma.done.wait [#allocation8], 64  }
  0x20   :  { %8820 = vsyncadd [#allocation8], 4294967232 }
  0x21   :  { %8821 = dma.done.wait [#allocation10], 64  }
  0x22   :  { %8822 = vsyncadd [#allocation10], 4294967232 }
  0x23   :  { %8823 = dma.done.wait [#allocation6], 512  }
  0x24   :  { %8824 = vsyncadd [#allocation6], 4294966784 }
  0x25   :  { %8825 = dma.done.wait [#allocation13], 32768  }
  0x26   :  { %8826 = vsyncadd [#allocation13], 4294934528 }
  0x27   :  { %67 = sfence }
  0x28   :  { %v7567_v0 = vld [vmem:[#allocation12 + $0x4e4] ss:$16 sps:$4 sm:$0xff]   ;;  %v7571_v2 = vld [vmem:[#allocation12 + $0x4e0] ss:$16 sps:$4 sm:$0xff]   ;;  %s8880_s2 = sld [smem:[#allocation9]]  ;;  %v69_v49 = vld [vmem:[#allocation11 + $0x8] sm:$0xff]  ;;  %v87_v52 = vlaneseq }
  0x29   :  { %v7569_v1 = vld [vmem:[#allocation12 + $0x6e4] ss:$16 sps:$4 sm:$0xff]   ;;  %1198 = vmatprep.subr.bf16.mxu0 %v7567_v0  ;;  %v7572_v3 = vld [vmem:[#allocation12 + $0x6e0] ss:$16 sps:$4 sm:$0xff]   ;;  %s8882_s3 = sld [smem:[#allocation9 + $0x1]]  ;;  %v71_v51 = vld [vmem:[#allocation11 + $0x18] sm:$0xff] }
  0x2a   :  { %1239 = vmatprep.subr.bf16.mxu1 %v7569_v1  ;;  %v7573_v4 = vld [vmem:[#allocation12 + $0x4c4] ss:$16 sps:$4 sm:$0xff]   ;;  %1199 = vmatpush1.bf16.msra.mxu0 %v7571_v2  ;;  %v7577_v6 = vld [vmem:[#allocation12 + $0x4c0] ss:$16 sps:$4 sm:$0xff]   ;;  %s8884_s9 = sld [smem:[#allocation9 + $0x2]]  ;;  %73 = vst [vmem:[#allocation2 + $0x8] sm:$0xff] %v69_v49 }
  0x2b   :  { %1240 = vmatpush1.bf16.msra.mxu1 %v7572_v3  ;;  %v7575_v5 = vld [vmem:[#allocation12 + $0x6c4] ss:$16 sps:$4 sm:$0xff]   ;;  %1200 = vmatprep.subr.bf16.mxu0 %v7573_v4  ;;  %v7578_v7 = vld [vmem:[#allocation12 + $0x6c0] ss:$16 sps:$4 sm:$0xff]   ;;  %s8887_s11 = sld [smem:[#allocation9 + $0x3]]  ;;  %75 = vst [vmem:[#allocation2 + $0x18] sm:$0xff] %v71_v51 }
  0x2c   :  { %1241 = vmatprep.subr.bf16.mxu1 %v7575_v5  ;;  %v7579_v8 = vld [vmem:[#allocation12 + $0x4a4] ss:$16 sps:$4 sm:$0xff]   ;;  %v7583_v10 = vld [vmem:[#allocation12 + $0x4a0] ss:$16 sps:$4 sm:$0xff]   ;;  %s8891_s15 = sld [smem:[#allocation9 + $0x4]]  ;;  %vm8938_vm0 = vcmp.lt.s32.totalorder %v87_v52, 512 }
  0x2d   :  { %v7581_v9 = vld [vmem:[#allocation12 + $0x6a4] ss:$16 sps:$4 sm:$0xff]   ;;  %v7584_v11 = vld [vmem:[#allocation12 + $0x6a0] ss:$16 sps:$4 sm:$0xff]   ;;  %s8896_s19 = sld [smem:[#allocation9 + $0x5]] }
  0x2e   :  { %1201 = vmatpush1.bf16.msra.mxu0 %v7577_v6  ;;  %v7585_v12 = vld [vmem:[#allocation12 + $0x484] ss:$16 sps:$4 sm:$0xff]   ;;  %v7589_v14 = vld [vmem:[#allocation12 + $0x480] ss:$16 sps:$4 sm:$0xff]   ;;  %s93_s10 = sshra.s32 %s8880_s2, 3  ;;  %s96_s12 = sand.u32 7, %s8880_s2 }
  0x2f   :  { %1242 = vmatpush1.bf16.msra.mxu1 %v7578_v7  ;;  %1202 = vmatprep.subr.bf16.mxu0 %v7579_v8  ;;  %v7587_v13 = vld [vmem:[#allocation12 + $0x684] ss:$16 sps:$4 sm:$0xff]   ;;  %v7590_v15 = vld [vmem:[#allocation12 + $0x680] ss:$16 sps:$4 sm:$0xff]   ;;  %s118_s13 = sshra.s32 %s8882_s3, 3  ;;  %s7511_s14 = sshll.u32 %s93_s10, 5 }
  0x30   :  { %1243 = vmatprep.subr.bf16.mxu1 %v7581_v9  ;;  %v7591_v16 = vld [vmem:[#allocation12 + $0x464] ss:$16 sps:$4 sm:$0xff]   ;;  %v7595_v18 = vld [vmem:[#allocation12 + $0x460] ss:$16 sps:$4 sm:$0xff]   ;;  %s121_s16 = sand.u32 7, %s8882_s3  ;;  %s7513_s17 = sshll.u32 %s118_s13, 5 }
  0x31   :  { %v7593_v17 = vld [vmem:[#allocation12 + $0x664] ss:$16 sps:$4 sm:$0xff]   ;;  %v7596_v19 = vld [vmem:[#allocation12 + $0x660] ss:$16 sps:$4 sm:$0xff]   ;;  %s8894_s18 = sadd.s32 %s7511_s14, %s96_s12  ;;  %s8898_s20 = sld [smem:[#allocation9 + $0x6]] }
  0x32   :  { %1203 = vmatpush1.bf16.msra.mxu0 %v7583_v10  ;;  %v7597_v20 = vld [vmem:[#allocation12 + $0x444] ss:$16 sps:$4 sm:$0xff]   ;;  %v7601_v22 = vld [vmem:[#allocation12 + $0x440] ss:$16 sps:$4 sm:$0xff]   ;;  %s8900_s21 = sadd.s32 %s7513_s17, %s121_s16  ;;  %s8902_s22 = sld [smem:[#allocation9 + $0x7]] }
  0x33   :  { %1244 = vmatpush1.bf16.msra.mxu1 %v7584_v11  ;;  %1204 = vmatprep.subr.bf16.mxu0 %v7585_v12  ;;  %v7599_v21 = vld [vmem:[#allocation12 + $0x644] ss:$16 sps:$4 sm:$0xff]   ;;  %v7602_v23 = vld [vmem:[#allocation12 + $0x640] ss:$16 sps:$4 sm:$0xff]   ;;  %s144_s23 = sshra.s32 %s8884_s9, 3  ;;  %s147_s24 = sand.u32 7, %s8884_s9 }
  0x34   :  { %1245 = vmatprep.subr.bf16.mxu1 %v7587_v13  ;;  %v7603_v24 = vld [vmem:[#allocation12 + $0x424] ss:$16 sps:$4 sm:$0xff]   ;;  %v7607_v26 = vld [vmem:[#allocation12 + $0x420] ss:$16 sps:$4 sm:$0xff]   ;;  %s170_s25 = sshra.s32 %s8887_s11, 3  ;;  %s8907_s26 = sshll.u32 %s144_s23, 5 }
  0x35   :  { %v7605_v25 = vld [vmem:[#allocation12 + $0x624] ss:$16 sps:$4 sm:$0xff]   ;;  %v7608_v27 = vld [vmem:[#allocation12 + $0x620] ss:$16 sps:$4 sm:$0xff]   ;;  %s196_s27 = sshra.s32 %s8891_s15, 3  ;;  %s173_s28 = sand.u32 7, %s8887_s11 }
  0x36   :  { %1205 = vmatpush1.bf16.msra.mxu0 %v7589_v14  ;;  %v7609_v28 = vld [vmem:[#allocation12 + $0x404] ss:$16 sps:$4 sm:$0xff]   ;;  %v7613_v30 = vld [vmem:[#allocation12 + $0x400] ss:$16 sps:$4 sm:$0xff]   ;;  %s8911_s29 = sshll.u32 %s170_s25, 5  ;;  %s199_s0 = sand.u32 7, %s8891_s15 }
  0x37   :  { %1246 = vmatpush1.bf16.msra.mxu1 %v7590_v15  ;;  %1206 = vmatprep.subr.bf16.mxu0 %v7591_v16  ;;  %v7611_v29 = vld [vmem:[#allocation12 + $0x604] ss:$16 sps:$4 sm:$0xff]   ;;  %v7614_v31 = vld [vmem:[#allocation12 + $0x600] ss:$16 sps:$4 sm:$0xff]   ;;  %s222_s30 = sshra.s32 %s8896_s19, 3  ;;  %s8915_s1 = sshll.u32 %s196_s27, 5 }
  0x38   :  { %1247 = vmatprep.subr.bf16.mxu1 %v7593_v17  ;;  %v7615_v32 = vld [vmem:[#allocation12 + $0x5e4] ss:$16 sps:$4 sm:$0xff]   ;;  %v7619_v34 = vld [vmem:[#allocation12 + $0x5e0] ss:$16 sps:$4 sm:$0xff]   ;;  %s248_s6 = sshra.s32 %s8898_s20, 3  ;;  %s225_s7 = sand.u32 7, %s8896_s19 }
  0x39   :  { %v7617_v33 = vld [vmem:[#allocation12 + $0x7e4] ss:$16 sps:$4 sm:$0xff]   ;;  %v7620_v35 = vld [vmem:[#allocation12 + $0x7e0] ss:$16 sps:$4 sm:$0xff]   ;;  %s274_s8 = sshra.s32 %s8902_s22, 3  ;;  %s7521_s2 = sshll.u32 %s222_s30, 5 }
  0x3a   :  { %1207 = vmatpush1.bf16.msra.mxu0 %v7595_v18  ;;  %v7621_v36 = vld [vmem:[#allocation12 + $0x5c4] ss:$16 sps:$4 sm:$0xff]   ;;  %v7625_v38 = vld [vmem:[#allocation12 + $0x5c0] ss:$16 sps:$4 sm:$0xff]   ;;  %s251_s3 = sand.u32 7, %s8898_s20  ;;  %s7523_s10 = sshll.u32 %s248_s6, 5 }
  0x3b   :  { %1248 = vmatpush1.bf16.msra.mxu1 %v7596_v19  ;;  %1208 = vmatprep.subr.bf16.mxu0 %v7597_v20  ;;  %v7623_v37 = vld [vmem:[#allocation12 + $0x7c4] ss:$16 sps:$4 sm:$0xff]   ;;  %v7626_v39 = vld [vmem:[#allocation12 + $0x7c0] ss:$16 sps:$4 sm:$0xff]   ;;  %s277_s12 = sand.u32 7, %s8902_s22  ;;  %s7525_s13 = sshll.u32 %s274_s8, 5 }
  0x3c   :  { %1249 = vmatprep.subr.bf16.mxu1 %v7599_v21  ;;  %v7627_v40 = vld [vmem:[#allocation12 + $0x5a4] ss:$16 sps:$4 sm:$0xff]   ;;  %v7631_v42 = vld [vmem:[#allocation12 + $0x5a0] ss:$16 sps:$4 sm:$0xff]   ;;  %s150_s14 = sadd.s32 %s8907_s26, %s147_s24  ;;  %s8928_s16 = sadd.s32 %s8911_s29, %s173_s28  ;;  %v7665_v14 = vld [vmem:[#allocation12 + $0x4ec] ss:$16 sps:$4 sm:$0xff]  }
  0x3d   :  { %v7629_v41 = vld [vmem:[#allocation12 + $0x7a4] ss:$16 sps:$4 sm:$0xff]   ;;  %v7632_v43 = vld [vmem:[#allocation12 + $0x7a0] ss:$16 sps:$4 sm:$0xff]   ;;  %s8933_s17 = sadd.s32 %s8915_s1, %s199_s0  ;;  %s8935_s19 = sadd.s32 %s7521_s2, %s225_s7  ;;  %v7668_v15 = vld [vmem:[#allocation12 + $0x6ec] ss:$16 sps:$4 sm:$0xff]  }
  0x3e   :  { %1209 = vmatpush1.bf16.msra.mxu0 %v7601_v22  ;;  %v7633_v44 = vld [vmem:[#allocation12 + $0x584] ss:$16 sps:$4 sm:$0xff]   ;;  %v7637_v46 = vld [vmem:[#allocation12 + $0x580] ss:$16 sps:$4 sm:$0xff]   ;;  %s8942_s20 = sadd.s32 %s7523_s10, %s251_s3  ;;  %s8944_s9 = sadd.s32 %s7525_s13, %s277_s12  ;;  %v7702_v49 = vld [vmem:[#allocation12 + $0x628] ss:$16 sps:$4 sm:$0xff]  }
  0x3f   :  { %1250 = vmatpush1.bf16.msra.mxu1 %v7602_v23  ;;  %1210 = vmatprep.subr.bf16.mxu0 %v7603_v24  ;;  %v7635_v45 = vld [vmem:[#allocation12 + $0x784] ss:$16 sps:$4 sm:$0xff]   ;;  %v7638_v47 = vld [vmem:[#allocation12 + $0x780] ss:$16 sps:$4 sm:$0xff]   ;;  %s100_s11 = scalar_lea.vmem [#allocation2], %s8894_s18  ;;  %s125_s15 = scalar_lea.vmem [#allocation2], %s8900_s21 }
  0x40   :  { %1251 = vmatprep.subr.bf16.mxu1 %v7605_v25  ;;  %v68_v48 = vld [vmem:[#allocation11] sm:$0xff]  ;;  %v70_v50 = vld [vmem:[#allocation11 + $0x10] sm:$0xff]  ;;  %s151_s22 = scalar_lea.vmem [#allocation2], %s150_s14  ;;  %s177_s23 = scalar_lea.vmem [#allocation2], %s8928_s16  ;;  %v7663_v23 = vld [vmem:[#allocation12 + $0x4e8] ss:$16 sps:$4 sm:$0xff]  }
  0x41   :  { %72 = vst [vmem:[#allocation2] sm:$0xff] %v68_v48  ;;  %v7639_v53 = vld [vmem:[#allocation12 + $0x564] ss:$16 sps:$4 sm:$0xff]   ;;  %74 = vst [vmem:[#allocation2 + $0x10] sm:$0xff] %v70_v50  ;;  %v7643_v55 = vld [vmem:[#allocation12 + $0x560] ss:$16 sps:$4 sm:$0xff]  }
  0x42   :  { %1211 = vmatpush1.bf16.msra.mxu0 %v7607_v26  ;;  %v7641_v54 = vld [vmem:[#allocation12 + $0x764] ss:$16 sps:$4 sm:$0xff]   ;;  %v7644_v56 = vld [vmem:[#allocation12 + $0x760] ss:$16 sps:$4 sm:$0xff]   ;;  %s203_s18 = scalar_lea.vmem [#allocation2], %s8933_s17  ;;  %s229_s21 = scalar_lea.vmem [#allocation2], %s8935_s19 }
  0x43   :  { %1252 = vmatpush1.bf16.msra.mxu1 %v7608_v27  ;;  %1212 = vmatprep.subr.bf16.mxu0 %v7609_v28  ;;  %v7645_v58 = vld [vmem:[#allocation12 + $0x544] ss:$16 sps:$4 sm:$0xff]   ;;  %v7649_v60 = vld [vmem:[#allocation12 + $0x540] ss:$16 sps:$4 sm:$0xff]   ;;  %s255_s24 = scalar_lea.vmem [#allocation2], %s8942_s20  ;;  %s281_s25 = scalar_lea.vmem [#allocation2], %s8944_s9 }
  0x44   :  { %1253 = vmatprep.subr.bf16.mxu1 %v7611_v29  ;;  %v7647_v59 = vld [vmem:[#allocation12 + $0x744] ss:$16 sps:$4 sm:$0xff]   ;;  %v7650_v61 = vld [vmem:[#allocation12 + $0x740] ss:$16 sps:$4 sm:$0xff]   ;;  %v7666_v24 = vld [vmem:[#allocation12 + $0x6e8] ss:$16 sps:$4 sm:$0xff]  }
  0x45   :  { %v7651_v62 = vld [vmem:[#allocation12 + $0x524] ss:$16 sps:$4 sm:$0xff]   ;;  %v7655_v8 = vld [vmem:[#allocation12 + $0x520] ss:$16 sps:$4 sm:$0xff]   ;;  %v7671_v26 = vld [vmem:[#allocation12 + $0x4cc] ss:$16 sps:$4 sm:$0xff]  }
  0x46   :  { %1213 = vmatpush1.bf16.msra.mxu0 %v7613_v30  ;;  %v7653_v63 = vld [vmem:[#allocation12 + $0x724] ss:$16 sps:$4 sm:$0xff]   ;;  %v7656_v9 = vld [vmem:[#allocation12 + $0x720] ss:$16 sps:$4 sm:$0xff]   ;;  %v7674_v27 = vld [vmem:[#allocation12 + $0x6cc] ss:$16 sps:$4 sm:$0xff]  }
  0x47   :  { %1254 = vmatpush1.bf16.msra.mxu1 %v7614_v31  ;;  %1214 = vmatprep.subr.bf16.mxu0 %v7615_v32  ;;  %v7657_v10 = vld [vmem:[#allocation12 + $0x504] ss:$16 sps:$4 sm:$0xff]   ;;  %v7661_v12 = vld [vmem:[#allocation12 + $0x500] ss:$16 sps:$4 sm:$0xff]   ;;  %v7669_v28 = vld [vmem:[#allocation12 + $0x4c8] ss:$16 sps:$4 sm:$0xff]  }
  0x48   :  { %1255 = vmatprep.subr.bf16.mxu1 %v7617_v33  ;;  %v101_v0 = vld [vmem:[%s100_s11] ss:$8 sm:$0xf]  ;;  %v7659_v11 = vld [vmem:[#allocation12 + $0x704] ss:$16 sps:$4 sm:$0xff]   ;;  %s8975_s26 = sld [smem:[#allocation5]] }
  0x49   :  { %v126_v1 = vld [vmem:[%s125_s15] ss:$8 sm:$0xf]  ;;  %102 = vst.msk [vmem:[#allocation4] ss:$8 sm:$0xf] %vm8938_vm0, %v101_v0 }
  0x4a   :  { %1215 = vmatpush2.bf16.msra.mxu0 %v7619_v34  ;;  %128 = vst.msk [vmem:[#allocation4 + $0x1] ss:$8 sm:$0xf] %vm8938_vm0, %v126_v1  ;;  %v152_v2 = vld [vmem:[%s151_s22] ss:$8 sm:$0xf] }
  0x4b   :  { %1256 = vmatpush2.bf16.msra.mxu1 %v7620_v35  ;;  %1216 = vmatprep.subr.bf16.mxu0 %v7621_v36  ;;  %v178_v3 = vld [vmem:[%s177_s23] ss:$8 sm:$0xf]  ;;  %154 = vst.msk [vmem:[#allocation4 + $0x2] ss:$8 sm:$0xf] %vm8938_vm0, %v152_v2 }
  0x4c   :  { %1257 = vmatprep.subr.bf16.mxu1 %v7623_v37  ;;  %180 = vst.msk [vmem:[#allocation4 + $0x3] ss:$8 sm:$0xf] %vm8938_vm0, %v178_v3  ;;  %v204_v4 = vld [vmem:[%s203_s18] ss:$8 sm:$0xf] }
  0x4d   :  { %v230_v5 = vld [vmem:[%s229_s21] ss:$8 sm:$0xf]  ;;  %206 = vst.msk [vmem:[#allocation4 + $0x4] ss:$8 sm:$0xf] %vm8938_vm0, %v204_v4 }
  0x4e   :  { %1217 = vmatpush2.bf16.msra.mxu0 %v7625_v38  ;;  %232 = vst.msk [vmem:[#allocation4 + $0x5] ss:$8 sm:$0xf] %vm8938_vm0, %v230_v5  ;;  %v256_v6 = vld [vmem:[%s255_s24] ss:$8 sm:$0xf] }
  0x4f   :  { %1258 = vmatpush2.bf16.msra.mxu1 %v7626_v39  ;;  %1218 = vmatprep.subr.bf16.mxu0 %v7627_v40  ;;  %v282_v7 = vld [vmem:[%s281_s25] ss:$8 sm:$0xf]  ;;  %258 = vst.msk [vmem:[#allocation4 + $0x6] ss:$8 sm:$0xf] %vm8938_vm0, %v256_v6 }
  0x50   :  { %1259 = vmatprep.subr.bf16.mxu1 %v7629_v41  ;;  %284 = vst.msk [vmem:[#allocation4 + $0x7] ss:$8 sm:$0xf] %vm8938_vm0, %v282_v7  ;;  %v7662_v13 = vld [vmem:[#allocation12 + $0x700] ss:$16 sps:$4 sm:$0xff]   ;;  %s8977_s27 = sld [smem:[#allocation5 + $0x1]] }
  0x51   :  { %v7672_v29 = vld [vmem:[#allocation12 + $0x6c8] ss:$16 sps:$4 sm:$0xff]   ;;  %v7677_v30 = vld [vmem:[#allocation12 + $0x4ac] ss:$16 sps:$4 sm:$0xff]   ;;  %s8979_s28 = sld [smem:[#allocation5 + $0x2]]  ;;  %s78_s29 = sshra.s32 %s8975_s26, 3 }
  0x52   :  { %1219 = vmatpush2.bf16.msra.mxu0 %v7631_v42  ;;  %v7680_v31 = vld [vmem:[#allocation12 + $0x6ac] ss:$16 sps:$4 sm:$0xff]   ;;  %v7675_v32 = vld [vmem:[#allocation12 + $0x4a8] ss:$16 sps:$4 sm:$0xff]   ;;  %s81_s0 = sand.u32 7, %s8975_s26  ;;  %s8983_s30 = sld [smem:[#allocation5 + $0x3]] }
  0x53   :  { %1260 = vmatpush2.bf16.msra.mxu1 %v7632_v43  ;;  %1220 = vmatprep.subr.bf16.mxu0 %v7633_v44  ;;  %v7678_v33 = vld [vmem:[#allocation12 + $0x6a8] ss:$16 sps:$4 sm:$0xff]   ;;  %v7683_v34 = vld [vmem:[#allocation12 + $0x48c] ss:$16 sps:$4 sm:$0xff]   ;;  %s7510_s6 = sshll.u32 %s78_s29, 5  ;;  %s8987_s8 = sld [smem:[#allocation5 + $0x4]] }
  0x54   :  { %1261 = vmatprep.subr.bf16.mxu1 %v7635_v45  ;;  %v7686_v35 = vld [vmem:[#allocation12 + $0x68c] ss:$16 sps:$4 sm:$0xff]   ;;  %v7681_v36 = vld [vmem:[#allocation12 + $0x488] ss:$16 sps:$4 sm:$0xff]   ;;  %s8989_s3 = sld [smem:[#allocation5 + $0x5]]  ;;  %s8991_s10 = sadd.s32 %s7510_s6, %s81_s0 }
  0x55   :  { %v7684_v37 = vld [vmem:[#allocation12 + $0x688] ss:$16 sps:$4 sm:$0xff]   ;;  %v7689_v38 = vld [vmem:[#allocation12 + $0x46c] ss:$16 sps:$4 sm:$0xff]   ;;  %s8994_s13 = sld [smem:[#allocation5 + $0x6]] }
  0x56   :  { %1221 = vmatpush2.bf16.msra.mxu0 %v7637_v46  ;;  %v7692_v39 = vld [vmem:[#allocation12 + $0x66c] ss:$16 sps:$4 sm:$0xff]   ;;  %v7687_v40 = vld [vmem:[#allocation12 + $0x468] ss:$16 sps:$4 sm:$0xff]   ;;  %s106_s1 = sshra.s32 %s8977_s27, 3  ;;  %s109_s7 = sand.u32 7, %s8977_s27 }
  0x57   :  { %1262 = vmatpush2.bf16.msra.mxu1 %v7638_v47  ;;  %1222 = vmatprep.subr.bf16.mxu0 %v7639_v53  ;;  %v295_v16 = vld [vmem:[#allocation4 + $0x8] sm:$0xff]  ;;  %v297_v17 = vld [vmem:[#allocation4 + $0x18] sm:$0xff]  ;;  %v294_v18 = vld [vmem:[#allocation4] sm:$0xff]  ;;  %s7512_s2 = sshll.u32 %s106_s1, 5  ;;  %s132_s12 = sshra.s32 %s8979_s28, 3 }
  0x58   :  { %1263 = vmatprep.subr.bf16.mxu1 %v7641_v54  ;;  %v299_v19 = vpack.c.bf16 %v295_v16, %v295_v16  ;;  %v301_v20 = vpack.c.bf16 %v297_v17, %v297_v17  ;;  %v8969_v21 = vpack.c.bf16 %v294_v18, %v294_v18  ;;  %v296_v22 = vld [vmem:[#allocation4 + $0x10] sm:$0xff]  ;;  %v7690_v41 = vld [vmem:[#allocation12 + $0x668] ss:$16 sps:$4 sm:$0xff]   ;;  %v7695_v42 = vld [vmem:[#allocation12 + $0x44c] ss:$16 sps:$4 sm:$0xff]   ;;  %s8996_s14 = sadd.s32 %s7512_s2, %s109_s7  ;;  %s8998_s16 = sld [smem:[#allocation5 + $0x7]] }
  0x59   :  { %v8971_v25 = vpack.c.bf16 %v296_v22, %v296_v22  ;;  %v7698_v43 = vld [vmem:[#allocation12 + $0x64c] ss:$16 sps:$4 sm:$0xff]   ;;  %v7693_v44 = vld [vmem:[#allocation12 + $0x448] ss:$16 sps:$4 sm:$0xff]   ;;  %s135_s17 = sand.u32 7, %s8979_s28  ;;  %s158_s19 = sshra.s32 %s8983_s30, 3 }
  0x5a   :  { %1223 = vmatpush2.bf16.msra.mxu0 %v7643_v55  ;;  %1230 = vmatprep.mubr.bf16.mxu0 %v299_v19  ;;  %v7696_v45 = vld [vmem:[#allocation12 + $0x648] ss:$16 sps:$4 sm:$0xff]   ;;  %v7701_v46 = vld [vmem:[#allocation12 + $0x42c] ss:$16 sps:$4 sm:$0xff]   ;;  %s7514_s20 = sshll.u32 %s132_s12, 5  ;;  %s161_s9 = sand.u32 7, %s8983_s30 }
  0x5b   :  { %1264 = vmatpush2.bf16.msra.mxu1 %v7644_v56  ;;  %1224 = vmatprep.subr.bf16.mxu0 %v7645_v58  ;;  %v7704_v47 = vld [vmem:[#allocation12 + $0x62c] ss:$16 sps:$4 sm:$0xff]   ;;  %v7699_v48 = vld [vmem:[#allocation12 + $0x428] ss:$16 sps:$4 sm:$0xff]   ;;  %s184_s11 = sshra.s32 %s8987_s8, 3  ;;  %s9004_s15 = sshll.u32 %s158_s19, 5 }
  0x5c   :  { %1265 = vmatprep.subr.bf16.mxu1 %v7647_v59  ;;  %1271 = vmatprep.mubr.bf16.mxu1 %v301_v20  ;;  %v7707_v50 = vld [vmem:[#allocation12 + $0x40c] ss:$16 sps:$4 sm:$0xff]   ;;  %v7705_v53 = vld [vmem:[#allocation12 + $0x408] ss:$16 sps:$4 sm:$0xff]   ;;  %s187_s22 = sand.u32 7, %s8987_s8  ;;  %s210_s23 = sshra.s32 %s8989_s3, 3 }
  0x5d   :  { %v7710_v51 = vld [vmem:[#allocation12 + $0x60c] ss:$16 sps:$4 sm:$0xff]   ;;  %v7708_v54 = vld [vmem:[#allocation12 + $0x608] ss:$16 sps:$4 sm:$0xff]   ;;  %s7518_s18 = sshll.u32 %s184_s11, 5  ;;  %s236_s21 = sshra.s32 %s8994_s13, 3 }
  0x5e   :  { %1225 = vmatpush2.bf16.msra.mxu0 %v7649_v60  ;;  %v7713_v55 = vld [vmem:[#allocation12 + $0x5ec] ss:$16 sps:$4 sm:$0xff]   ;;  %v7711_v58 = vld [vmem:[#allocation12 + $0x5e8] ss:$16 sps:$4 sm:$0xff]   ;;  %s213_s24 = sand.u32 7, %s8989_s3  ;;  %s262_s25 = sshra.s32 %s8998_s16, 3 }
  0x5f   :  { %1266 = vmatpush2.bf16.msra.mxu1 %v7650_v61  ;;  %1226 = vmatprep.subr.bf16.mxu0 %v7651_v62  ;;  %v7716_v56 = vld [vmem:[#allocation12 + $0x7ec] ss:$16 sps:$4 sm:$0xff]   ;;  %v7714_v59 = vld [vmem:[#allocation12 + $0x7e8] ss:$16 sps:$4 sm:$0xff]   ;;  %s7520_s26 = sshll.u32 %s210_s23, 5  ;;  %s239_s27 = sand.u32 7, %s8994_s13 }
  0x60   :  { %1267 = vmatprep.subr.bf16.mxu1 %v7653_v63  ;;  %v7719_v60 = vld [vmem:[#allocation12 + $0x5cc] ss:$16 sps:$4 sm:$0xff]   ;;  %v7717_v62 = vld [vmem:[#allocation12 + $0x5c8] ss:$16 sps:$4 sm:$0xff]   ;;  %s9014_s29 = sadd.s32 %s7514_s20, %s135_s17  ;;  %s7522_s0 = sshll.u32 %s236_s21, 5 }
  0x61   :  { %v7722_v61 = vld [vmem:[#allocation12 + $0x7cc] ss:$16 sps:$4 sm:$0xff]   ;;  %v7720_v63 = vld [vmem:[#allocation12 + $0x7c8] ss:$16 sps:$4 sm:$0xff]   ;;  %s265_s1 = sand.u32 7, %s8998_s16  ;;  %s7524_s6 = sshll.u32 %s262_s25, 5 }
  0x62   :  { %1227 = vmatpush2.bf16.msra.mxu0 %v7655_v8  ;;  %v7725_v0 = vld [vmem:[#allocation12 + $0x5ac] ss:$16 sps:$4 sm:$0xff]   ;;  %v7723_v2 = vld [vmem:[#allocation12 + $0x5a8] ss:$16 sps:$4 sm:$0xff]   ;;  %s9020_s7 = sadd.s32 %s9004_s15, %s161_s9  ;;  %s9024_s2 = sadd.s32 %s7518_s18, %s187_s22 }
  0x63   :  { %1268 = vmatpush2.bf16.msra.mxu1 %v7656_v9  ;;  %1228 = vmatprep.subr.bf16.mxu0 %v7657_v10  ;;  %v7728_v1 = vld [vmem:[#allocation12 + $0x7ac] ss:$16 sps:$4 sm:$0xff]   ;;  %v7726_v3 = vld [vmem:[#allocation12 + $0x7a8] ss:$16 sps:$4 sm:$0xff]   ;;  %s9026_s3 = sadd.s32 %s7520_s26, %s213_s24  ;;  %s9028_s28 = sadd.s32 %s7522_s0, %s239_s27 }
  0x64   :  { %1269 = vmatprep.subr.bf16.mxu1 %v7659_v11  ;;  %v7731_v4 = vld [vmem:[#allocation12 + $0x58c] ss:$16 sps:$4 sm:$0xff]   ;;  %v7729_v6 = vld [vmem:[#allocation12 + $0x588] ss:$16 sps:$4 sm:$0xff]   ;;  %s9032_s12 = sadd.s32 %s7524_s6, %s265_s1  ;;  %s85_s30 = scalar_lea.vmem [#allocation2], %s8991_s10 }
  0x65   :  { %v7734_v5 = vld [vmem:[#allocation12 + $0x78c] ss:$16 sps:$4 sm:$0xff]   ;;  %v7732_v7 = vld [vmem:[#allocation12 + $0x788] ss:$16 sps:$4 sm:$0xff]   ;;  %s113_s8 = scalar_lea.vmem [#allocation2], %s8996_s14  ;;  %s139_s13 = scalar_lea.vmem [#allocation2], %s9014_s29 }
  0x66   :  { %1229 = vmatpush2.bf16.msra.mxu0 %v7661_v12  ;;  %v7737_v8 = vld [vmem:[#allocation12 + $0x56c] ss:$16 sps:$4 sm:$0xff]   ;;  %v7735_v10 = vld [vmem:[#allocation12 + $0x568] ss:$16 sps:$4 sm:$0xff]   ;;  %s165_s16 = scalar_lea.vmem [#allocation2], %s9020_s7  ;;  %s191_s10 = scalar_lea.vmem [#allocation2], %s9024_s2 }
  0x67   :  { %1270 = vmatpush2.bf16.msra.mxu1 %v7662_v13  ;;  %1280 = vmatprep.subr.bf16.mxu0 %v7665_v14  ;;  %v7740_v9 = vld [vmem:[#allocation12 + $0x76c] ss:$16 sps:$4 sm:$0xff]   ;;  %v7738_v11 = vld [vmem:[#allocation12 + $0x768] ss:$16 sps:$4 sm:$0xff]   ;;  %s217_s14 = scalar_lea.vmem [#allocation2], %s9026_s3  ;;  %s243_s17 = scalar_lea.vmem [#allocation2], %s9028_s28 }
  0x68   :  { %1321 = vmatprep.subr.bf16.mxu1 %v7668_v15  ;;  %v7743_v12 = vld [vmem:[#allocation12 + $0x54c] ss:$16 sps:$4 sm:$0xff]   ;;  %v7741_v14 = vld [vmem:[#allocation12 + $0x548] ss:$16 sps:$4 sm:$0xff]   ;;  %s269_s19 = scalar_lea.vmem [#allocation2], %s9032_s12  ;;  %s6903_s11 = sld [smem:[#allocation9 + $0x80]] }
  0x69   :  { %1231 = vmatmul.mubr.bf16.vlgmr.msra.gmra.mxu0 %v8969_v21  ;;  %v7746_v13 = vld [vmem:[#allocation12 + $0x74c] ss:$16 sps:$4 sm:$0xff]   ;;  %v7744_v15 = vld [vmem:[#allocation12 + $0x748] ss:$16 sps:$4 sm:$0xff]   ;;  %s6909_s15 = sld [smem:[#allocation9 + $0x81]] }
  0x6a   :  { %1272 = vmatmul.mubr.bf16.vlgmr.msra.gmra.mxu1 %v8971_v25  ;;  %1281 = vmatpush1.bf16.msra.mxu0 %v7663_v23  ;;  %v7749_v16 = vld [vmem:[#allocation12 + $0x52c] ss:$16 sps:$4 sm:$0xff]   ;;  %v7747_v18 = vld [vmem:[#allocation12 + $0x528] ss:$16 sps:$4 sm:$0xff]   ;;  %s6915_s22 = sld [smem:[#allocation9 + $0x82]] }
  0x6b   :  { %1322 = vmatpush1.bf16.msra.mxu1 %v7666_v24  ;;  %1282 = vmatprep.subr.bf16.mxu0 %v7671_v26  ;;  %v7752_v17 = vld [vmem:[#allocation12 + $0x72c] ss:$16 sps:$4 sm:$0xff]   ;;  %v7753_v23 = vld [vmem:[#allocation12 + $0x508] ss:$16 sps:$4 sm:$0xff]   ;;  %v7761_v26 = vld [vmem:[#allocation12 + $0xe4] ss:$16 sps:$4 sm:$0xff]  }
  0x6c   :  { %1323 = vmatprep.subr.bf16.mxu1 %v7674_v27  ;;  %1312 = vmatprep.mubr.bf16.mxu0 %v299_v19  ;;  %v7750_v19 = vld [vmem:[#allocation12 + $0x728] ss:$16 sps:$4 sm:$0xff]   ;;  %v7758_v22 = vld [vmem:[#allocation12 + $0x70c] ss:$16 sps:$4 sm:$0xff]   ;;  %v7764_v27 = vld [vmem:[#allocation12 + $0x2e4] ss:$16 sps:$4 sm:$0xff]  }
  0x6d   :  { %1353 = vmatprep.mubr.bf16.mxu1 %v301_v20  ;;  %v7755_v20 = vld [vmem:[#allocation12 + $0x50c] ss:$16 sps:$4 sm:$0xff]   ;;  %v7756_v24 = vld [vmem:[#allocation12 + $0x708] ss:$16 sps:$4 sm:$0xff]   ;;  %s6921_s26 = sld [smem:[#allocation9 + $0x83]] }
  0x6e   :  { %1283 = vmatpush1.bf16.msra.mxu0 %v7669_v28  ;;  %v7759_v28 = vld [vmem:[#allocation12 + $0xe0] ss:$16 sps:$4 sm:$0xff]   ;;  %s2213_s23 = sshra.s32 %s6903_s11, 3  ;;  %s2216_s21 = sand.u32 7, %s6903_s11  ;;  %v8437_v57 = vld [vmem:[#allocation12 + $0x4c8] ss:$16 sps:$4 sm:$0xff]  }
  0x6f   :  { %1324 = vmatpush1.bf16.msra.mxu1 %v7672_v29  ;;  %1284 = vmatprep.subr.bf16.mxu0 %v7677_v30  ;;  %v7762_v29 = vld [vmem:[#allocation12 + $0x2e0] ss:$16 sps:$4 sm:$0xff]   ;;  %v7767_v30 = vld [vmem:[#allocation12 + $0xc4] ss:$16 sps:$4 sm:$0xff]   ;;  %s2237_s18 = sshra.s32 %s6909_s15, 3  ;;  %s7527_s24 = sshll.u32 %s2213_s23, 5 }
  0x70   :  { %1325 = vmatprep.subr.bf16.mxu1 %v7680_v31  ;;  %v7770_v31 = vld [vmem:[#allocation12 + $0x2c4] ss:$16 sps:$4 sm:$0xff]   ;;  %s2240_s25 = sand.u32 7, %s6909_s15  ;;  %s7529_s27 = sshll.u32 %s2237_s18, 5 }
  0x71   :  { %s6927_s29 = sld [smem:[#allocation9 + $0x84]]  ;;  %s2261_s0 = sshra.s32 %s6915_s22, 3 }
  0x72   :  { %1285 = vmatpush1.bf16.msra.mxu0 %v7675_v32  ;;  %v7765_v32 = vld [vmem:[#allocation12 + $0xc0] ss:$16 sps:$4 sm:$0xff]   ;;  %s6933_s1 = sld [smem:[#allocation9 + $0x85]]  ;;  %s9098_s6 = sadd.s32 %s7527_s24, %s2216_s21 }
  0x73   :  { %1326 = vmatpush1.bf16.msra.mxu1 %v7678_v33  ;;  %1286 = vmatprep.subr.bf16.mxu0 %v7683_v34  ;;  %v7768_v33 = vld [vmem:[#allocation12 + $0x2c0] ss:$16 sps:$4 sm:$0xff]   ;;  %v7773_v34 = vld [vmem:[#allocation12 + $0xa4] ss:$16 sps:$4 sm:$0xff]   ;;  %s9100_s7 = sadd.s32 %s7529_s27, %s2240_s25  ;;  %s2264_s2 = sand.u32 7, %s6915_s22 }
  0x74   :  { %1327 = vmatprep.subr.bf16.mxu1 %v7686_v35  ;;  %v7776_v35 = vld [vmem:[#allocation12 + $0x2a4] ss:$16 sps:$4 sm:$0xff]   ;;  %s7531_s3 = sshll.u32 %s2261_s0, 5  ;;  %s9102_s28 = sld [smem:[#allocation9 + $0x86]] }
  0x75   :  { %s9104_s12 = sadd.s32 %s7531_s3, %s2264_s2  ;;  %s9113_s22 = sld [smem:[#allocation5 + $0x81]] }
  0x76   :  { %1287 = vmatpush1.bf16.msra.mxu0 %v7681_v36  ;;  %v7771_v36 = vld [vmem:[#allocation12 + $0xa0] ss:$16 sps:$4 sm:$0xff]  }
  0x77   :  { %1328 = vmatpush1.bf16.msra.mxu1 %v7684_v37  ;;  %1288 = vmatprep.subr.bf16.mxu0 %v7689_v38  ;;  %v7774_v37 = vld [vmem:[#allocation12 + $0x2a0] ss:$16 sps:$4 sm:$0xff]   ;;  %v7779_v38 = vld [vmem:[#allocation12 + $0x84] ss:$16 sps:$4 sm:$0xff]  }
  0x78   :  { %1329 = vmatprep.subr.bf16.mxu1 %v7692_v39  ;;  %v7782_v39 = vld [vmem:[#allocation12 + $0x284] ss:$16 sps:$4 sm:$0xff]   ;;  %s2336_s9 = sand.u32 7, %s6933_s1 }
  0x7a   :  { %1289 = vmatpush1.bf16.msra.mxu0 %v7687_v40  ;;  %v140_v40 = vld [vmem:[%s139_s13] ss:$8 sm:$0xf]  ;;  %s9106_s13 = sld [smem:[#allocation9 + $0x87]]  ;;  %s2357_s15 = sshra.s32 %s9102_s28, 3 }
  0x7b   :  { %1330 = vmatpush1.bf16.msra.mxu1 %v7690_v41  ;;  %1290 = vmatprep.subr.bf16.mxu0 %v7695_v42  ;;  %v166_v41 = vld [vmem:[%s165_s16] ss:$8 sm:$0xf]  ;;  %142 = vst.msk [vmem:[#allocation3 + $0x2] ss:$8 sm:$0xf] %vm8938_vm0, %v140_v40 }
  0x7c   :  { %1331 = vmatprep.subr.bf16.mxu1 %v7698_v43  ;;  %168 = vst.msk [vmem:[#allocation3 + $0x3] ss:$8 sm:$0xf] %vm8938_vm0, %v166_v41  ;;  %v192_v42 = vld [vmem:[%s191_s10] ss:$8 sm:$0xf] }
  0x7d   :  { %v218_v43 = vld [vmem:[%s217_s14] ss:$8 sm:$0xf]  ;;  %194 = vst.msk [vmem:[#allocation3 + $0x4] ss:$8 sm:$0xf] %vm8938_vm0, %v192_v42 }
  0x7e   :  { %1291 = vmatpush1.bf16.msra.mxu0 %v7693_v44  ;;  %220 = vst.msk [vmem:[#allocation3 + $0x5] ss:$8 sm:$0xf] %vm8938_vm0, %v218_v43  ;;  %v244_v44 = vld [vmem:[%s243_s17] ss:$8 sm:$0xf] }
  0x7f   :  { %1332 = vmatpush1.bf16.msra.mxu1 %v7696_v45  ;;  %1292 = vmatprep.subr.bf16.mxu0 %v7701_v46  ;;  %v270_v45 = vld [vmem:[%s269_s19] ss:$8 sm:$0xf]  ;;  %246 = vst.msk [vmem:[#allocation3 + $0x6] ss:$8 sm:$0xf] %vm8938_vm0, %v244_v44 }
  0x80   :  { %1333 = vmatprep.subr.bf16.mxu1 %v7704_v47  ;;  %v7777_v46 = vld [vmem:[#allocation12 + $0x80] ss:$16 sps:$4 sm:$0xff]   ;;  %272 = vst.msk [vmem:[#allocation3 + $0x7] ss:$8 sm:$0xf] %vm8938_vm0, %v270_v45  ;;  %s2333_s16 = sshra.s32 %s6933_s1, 3 }
  0x81   :  { %v7780_v47 = vld [vmem:[#allocation12 + $0x280] ss:$16 sps:$4 sm:$0xff]   ;;  %v7857_v40 = vld [vmem:[#allocation12 + $0xec] ss:$16 sps:$4 sm:$0xff]   ;;  %v7855_v42 = vld [vmem:[#allocation12 + $0xe8] ss:$16 sps:$4 sm:$0xff]  }
  0x82   :  { %1293 = vmatpush1.bf16.msra.mxu0 %v7699_v48  ;;  %v7785_v48 = vld [vmem:[#allocation12 + $0x64] ss:$16 sps:$4 sm:$0xff]   ;;  %v7860_v41 = vld [vmem:[#allocation12 + $0x2ec] ss:$16 sps:$4 sm:$0xff]   ;;  %v7858_v43 = vld [vmem:[#allocation12 + $0x2e8] ss:$16 sps:$4 sm:$0xff]  }
  0x83   :  { %1334 = vmatpush1.bf16.msra.mxu1 %v7702_v49  ;;  %1294 = vmatprep.subr.bf16.mxu0 %v7707_v50  ;;  %v7788_v49 = vld [vmem:[#allocation12 + $0x264] ss:$16 sps:$4 sm:$0xff]   ;;  %v7783_v50 = vld [vmem:[#allocation12 + $0x60] ss:$16 sps:$4 sm:$0xff]   ;;  %s9108_s10 = sld [smem:[#allocation5 + $0x80]]  ;;  %s2288_s14 = sand.u32 7, %s6921_s26 }
  0x84   :  { %1335 = vmatprep.subr.bf16.mxu1 %v7710_v51  ;;  %v7786_v51 = vld [vmem:[#allocation12 + $0x260] ss:$16 sps:$4 sm:$0xff]   ;;  %s2312_s19 = sand.u32 7, %s6927_s29  ;;  %s7537_s11 = sshll.u32 %s2333_s16, 5 }
  0x85   :  { %s9121_s21 = sadd.s32 %s7537_s11, %s2336_s9  ;;  %s2360_s24 = sand.u32 7, %s9102_s28 }
  0x86   :  { %1295 = vmatpush1.bf16.msra.mxu0 %v7705_v53  ;;  %v7791_v53 = vld [vmem:[#allocation12 + $0x44] ss:$16 sps:$4 sm:$0xff]   ;;  %s7539_s25 = sshll.u32 %s2357_s15, 5  ;;  %s9135_s1 = sld [smem:[#allocation5 + $0x82]] }
  0x87   :  { %1336 = vmatpush1.bf16.msra.mxu1 %v7708_v54  ;;  %1296 = vmatprep.subr.bf16.mxu0 %v7713_v55  ;;  %v7794_v54 = vld [vmem:[#allocation12 + $0x244] ss:$16 sps:$4 sm:$0xff]   ;;  %s9131_s27 = sadd.s32 %s7539_s25, %s2360_s24  ;;  %s2226_s3 = sshra.s32 %s9113_s22, 3 }
  0x88   :  { %1337 = vmatprep.subr.bf16.mxu1 %v7716_v56  ;;  %s2229_s16 = sand.u32 7, %s9113_s22  ;;  %s9154_s11 = sld [smem:[#allocation5 + $0x87]] }
  0x89   :  { %s2202_s0 = sshra.s32 %s9108_s10, 3  ;;  %s2205_s28 = sand.u32 7, %s9108_s10 }
  0x8a   :  { %1297 = vmatpush2.bf16.msra.mxu0 %v7711_v58  ;;  %v7789_v58 = vld [vmem:[#allocation12 + $0x40] ss:$16 sps:$4 sm:$0xff]   ;;  %s9150_s10 = sld [smem:[#allocation5 + $0x86]] }
  0x8b   :  { %1338 = vmatpush2.bf16.msra.mxu1 %v7714_v59  ;;  %1298 = vmatprep.subr.bf16.mxu0 %v7719_v60  ;;  %v7792_v59 = vld [vmem:[#allocation12 + $0x240] ss:$16 sps:$4 sm:$0xff]  }
  0x8c   :  { %1339 = vmatprep.subr.bf16.mxu1 %v7722_v61  ;;  %s2250_s15 = sshra.s32 %s9135_s1, 3  ;;  %s2253_s24 = sand.u32 7, %s9135_s1 }
  0x8d   :  { %s7530_s25 = sshll.u32 %s2250_s15, 5 }
  0x8e   :  { %1299 = vmatpush2.bf16.msra.mxu0 %v7717_v62  ;;  %v7797_v62 = vld [vmem:[#allocation12 + $0x24] ss:$16 sps:$4 sm:$0xff]   ;;  %s2373_s1 = sand.u32 7, %s9154_s11  ;;  %s9168_s15 = sadd.s32 %s7530_s25, %s2253_s24 }
  0x8f   :  { %1340 = vmatpush2.bf16.msra.mxu1 %v7720_v63  ;;  %1300 = vmatprep.subr.bf16.mxu0 %v7725_v0  ;;  %v7800_v63 = vld [vmem:[#allocation12 + $0x224] ss:$16 sps:$4 sm:$0xff]   ;;  %v7795_v0 = vld [vmem:[#allocation12 + $0x20] ss:$16 sps:$4 sm:$0xff]  }
  0x90   :  { %1341 = vmatprep.subr.bf16.mxu1 %v7728_v1  ;;  %v7798_v1 = vld [vmem:[#allocation12 + $0x220] ss:$16 sps:$4 sm:$0xff]  }
  0x92   :  { %1301 = vmatpush2.bf16.msra.mxu0 %v7723_v2  ;;  %v7803_v2 = vld [vmem:[#allocation12 + $0x4] ss:$16 sps:$4 sm:$0xff]  }
  0x93   :  { %1342 = vmatpush2.bf16.msra.mxu1 %v7726_v3  ;;  %1302 = vmatprep.subr.bf16.mxu0 %v7731_v4  ;;  %v7806_v3 = vld [vmem:[#allocation12 + $0x204] ss:$16 sps:$4 sm:$0xff]   ;;  %v7801_v4 = vld [vmem:[#allocation12] ss:$16 sps:$4 sm:$0xff]  }
  0x94   :  { %1343 = vmatprep.subr.bf16.mxu1 %v7734_v5  ;;  %v7804_v5 = vld [vmem:[#allocation12 + $0x200] ss:$16 sps:$4 sm:$0xff]  }
  0x96   :  { %1303 = vmatpush2.bf16.msra.mxu0 %v7729_v6  ;;  %v7809_v6 = vld [vmem:[#allocation12 + $0x1e4] ss:$16 sps:$4 sm:$0xff]  }
  0x97   :  { %1344 = vmatpush2.bf16.msra.mxu1 %v7732_v7  ;;  %1304 = vmatprep.subr.bf16.mxu0 %v7737_v8  ;;  %v7812_v7 = vld [vmem:[#allocation12 + $0x3e4] ss:$16 sps:$4 sm:$0xff]   ;;  %v7807_v8 = vld [vmem:[#allocation12 + $0x1e0] ss:$16 sps:$4 sm:$0xff]  }
  0x98   :  { %1345 = vmatprep.subr.bf16.mxu1 %v7740_v9  ;;  %v7810_v9 = vld [vmem:[#allocation12 + $0x3e0] ss:$16 sps:$4 sm:$0xff]  }
  0x9a   :  { %1305 = vmatpush2.bf16.msra.mxu0 %v7735_v10  ;;  %v7815_v10 = vld [vmem:[#allocation12 + $0x1c4] ss:$16 sps:$4 sm:$0xff]  }
  0x9b   :  { %1346 = vmatpush2.bf16.msra.mxu1 %v7738_v11  ;;  %1306 = vmatprep.subr.bf16.mxu0 %v7743_v12  ;;  %v7818_v11 = vld [vmem:[#allocation12 + $0x3c4] ss:$16 sps:$4 sm:$0xff]   ;;  %v7813_v12 = vld [vmem:[#allocation12 + $0x1c0] ss:$16 sps:$4 sm:$0xff]  }
  0x9c   :  { %1347 = vmatprep.subr.bf16.mxu1 %v7746_v13  ;;  %v7816_v13 = vld [vmem:[#allocation12 + $0x3c0] ss:$16 sps:$4 sm:$0xff]  }
  0x9e   :  { %1307 = vmatpush2.bf16.msra.mxu0 %v7741_v14  ;;  %v7821_v14 = vld [vmem:[#allocation12 + $0x1a4] ss:$16 sps:$4 sm:$0xff]  }
  0x9f   :  { %1348 = vmatpush2.bf16.msra.mxu1 %v7744_v15  ;;  %1308 = vmatprep.subr.bf16.mxu0 %v7749_v16  ;;  %v7824_v15 = vld [vmem:[#allocation12 + $0x3a4] ss:$16 sps:$4 sm:$0xff]   ;;  %v7819_v16 = vld [vmem:[#allocation12 + $0x1a0] ss:$16 sps:$4 sm:$0xff]  }
  0xa0   :  { %1349 = vmatprep.subr.bf16.mxu1 %v7752_v17  ;;  %v7822_v17 = vld [vmem:[#allocation12 + $0x3a0] ss:$16 sps:$4 sm:$0xff]  }
  0xa2   :  { %1309 = vmatpush2.bf16.msra.mxu0 %v7747_v18  ;;  %v7827_v18 = vld [vmem:[#allocation12 + $0x184] ss:$16 sps:$4 sm:$0xff]  }
  0xa3   :  { %1350 = vmatpush2.bf16.msra.mxu1 %v7750_v19  ;;  %1310 = vmatprep.subr.bf16.mxu0 %v7755_v20  ;;  %v7830_v19 = vld [vmem:[#allocation12 + $0x384] ss:$16 sps:$4 sm:$0xff]   ;;  %v7825_v20 = vld [vmem:[#allocation12 + $0x180] ss:$16 sps:$4 sm:$0xff]  }
  0xa4   :  { %1351 = vmatprep.subr.bf16.mxu1 %v7758_v22  ;;  %v7828_v22 = vld [vmem:[#allocation12 + $0x380] ss:$16 sps:$4 sm:$0xff]  }
  0xa6   :  { %1311 = vmatpush2.bf16.msra.mxu0 %v7753_v23  ;;  %v7833_v23 = vld [vmem:[#allocation12 + $0x164] ss:$16 sps:$4 sm:$0xff]  }
  0xa7   :  { %1352 = vmatpush2.bf16.msra.mxu1 %v7756_v24  ;;  %2002 = vmatprep.subr.bf16.mxu0 %v7761_v26  ;;  %v7836_v24 = vld [vmem:[#allocation12 + $0x364] ss:$16 sps:$4 sm:$0xff]   ;;  %v7831_v26 = vld [vmem:[#allocation12 + $0x160] ss:$16 sps:$4 sm:$0xff]  }
  0xa8   :  { %2043 = vmatprep.subr.bf16.mxu1 %v7764_v27  ;;  %v7834_v27 = vld [vmem:[#allocation12 + $0x360] ss:$16 sps:$4 sm:$0xff]  }
  0xa9   :  { %1313 = vmatmul.mubr.bf16.vlgmr.msra.gmra.mxu0 %v8969_v21  ;;  %v86_v21 = vld [vmem:[%s85_s30] ss:$8 sm:$0xf]  ;;  %s2285_s30 = sshra.s32 %s6921_s26, 3  ;;  %s2381_s26 = sshra.s32 %s9106_s13, 3 }
  0xaa   :  { %1354 = vmatmul.mubr.bf16.vlgmr.msra.gmra.mxu1 %v8971_v25  ;;  %2003 = vmatpush1.bf16.msra.mxu0 %v7759_v28  ;;  %v114_v25 = vld [vmem:[%s113_s8] ss:$8 sm:$0xf]  ;;  %91 = vst.msk [vmem:[#allocation3] ss:$8 sm:$0xf] %vm8938_vm0, %v86_v21 }
  0xab   :  { %2044 = vmatpush1.bf16.msra.mxu1 %v7762_v29  ;;  %2004 = vmatprep.subr.bf16.mxu0 %v7767_v30  ;;  %116 = vst.msk [vmem:[#allocation3 + $0x1] ss:$8 sm:$0xf] %vm8938_vm0, %v114_v25  ;;  %v7839_v28 = vld [vmem:[#allocation12 + $0x144] ss:$16 sps:$4 sm:$0xff]   ;;  %s2309_s8 = sshra.s32 %s6927_s29, 3 }
  0xac   :  { %2045 = vmatprep.subr.bf16.mxu1 %v7770_v31  ;;  %v7842_v29 = vld [vmem:[#allocation12 + $0x344] ss:$16 sps:$4 sm:$0xff]   ;;  %v7837_v30 = vld [vmem:[#allocation12 + $0x140] ss:$16 sps:$4 sm:$0xff]   ;;  %s7533_s17 = sshll.u32 %s2285_s30, 5  ;;  %s7535_s20 = sshll.u32 %s2309_s8, 5 }
  0xad   :  { %v7840_v31 = vld [vmem:[#allocation12 + $0x340] ss:$16 sps:$4 sm:$0xff]   ;;  %s9117_s23 = sadd.s32 %s7533_s17, %s2288_s14  ;;  %s9119_s18 = sadd.s32 %s7535_s20, %s2312_s19 }
  0xae   :  { %2005 = vmatpush1.bf16.msra.mxu0 %v7765_v32  ;;  %v7845_v32 = vld [vmem:[#allocation12 + $0x124] ss:$16 sps:$4 sm:$0xff]   ;;  %s2384_s29 = sand.u32 7, %s9106_s13  ;;  %s7541_s2 = sshll.u32 %s2381_s26, 5 }
  0xaf   :  { %2046 = vmatpush1.bf16.msra.mxu1 %v7768_v33  ;;  %2006 = vmatprep.subr.bf16.mxu0 %v7773_v34  ;;  %v7848_v33 = vld [vmem:[#allocation12 + $0x324] ss:$16 sps:$4 sm:$0xff]   ;;  %v7843_v34 = vld [vmem:[#allocation12 + $0x120] ss:$16 sps:$4 sm:$0xff]   ;;  %s9139_s30 = sld [smem:[#allocation5 + $0x83]]  ;;  %s7526_s8 = sshll.u32 %s2202_s0, 5 }
  0xb0   :  { %2047 = vmatprep.subr.bf16.mxu1 %v7776_v35  ;;  %v7846_v35 = vld [vmem:[#allocation12 + $0x320] ss:$16 sps:$4 sm:$0xff]   ;;  %s9141_s13 = sld [smem:[#allocation5 + $0x84]]  ;;  %s7528_s14 = sshll.u32 %s2226_s3, 5 }
  0xb1   :  { %s9144_s17 = sadd.s32 %s7541_s2, %s2384_s29  ;;  %s9146_s19 = sld [smem:[#allocation5 + $0x85]] }
  0xb2   :  { %2007 = vmatpush1.bf16.msra.mxu0 %v7771_v36  ;;  %v287_v55 = vld [vmem:[#allocation3 + $0x8] sm:$0xff]  ;;  %v289_v56 = vld [vmem:[#allocation3 + $0x18] sm:$0xff]  ;;  %v7851_v36 = vld [vmem:[#allocation12 + $0x104] ss:$16 sps:$4 sm:$0xff]   ;;  %s9148_s20 = sadd.s32 %s7526_s8, %s2205_s28  ;;  %s9152_s9 = sadd.s32 %s7528_s14, %s2229_s16 }
  0xb3   :  { %2048 = vmatpush1.bf16.msra.mxu1 %v7774_v37  ;;  %2008 = vmatprep.subr.bf16.mxu0 %v7779_v38  ;;  %v9058_v60 = vpack.c.bf16 %v287_v55, %v287_v55  ;;  %v9060_v61 = vpack.c.bf16 %v289_v56, %v289_v56  ;;  %v7854_v37 = vld [vmem:[#allocation12 + $0x304] ss:$16 sps:$4 sm:$0xff]   ;;  %v7849_v38 = vld [vmem:[#allocation12 + $0x100] ss:$16 sps:$4 sm:$0xff]   ;;  %v7875_v55 = vld [vmem:[#allocation12 + $0x8c] ss:$16 sps:$4 sm:$0xff]  }
  0xb4   :  { %2049 = vmatprep.subr.bf16.mxu1 %v7782_v39  ;;  %v7852_v39 = vld [vmem:[#allocation12 + $0x300] ss:$16 sps:$4 sm:$0xff]   ;;  %v7878_v56 = vld [vmem:[#allocation12 + $0x28c] ss:$16 sps:$4 sm:$0xff]   ;;  %9443 = sst [smem:[#allocation20_spill]] %s9152_s9  ;;  %s2346_s28 = sshra.s32 %s9150_s10, 3 }
  0xb5   :  { %2034 = vmatprep.mubr.bf16.mxu0 %v9058_v60  ;;  %2075 = vmatprep.mubr.bf16.mxu1 %v9060_v61  ;;  %v286_v21 = vld [vmem:[#allocation3] sm:$0xff]  ;;  %v288_v25 = vld [vmem:[#allocation3 + $0x10] sm:$0xff]  ;;  %s2274_s22 = sshra.s32 %s9139_s30, 3  ;;  %s2277_s26 = sand.u32 7, %s9139_s30 }
  0xb6   :  { %2009 = vmatpush1.bf16.msra.mxu0 %v7777_v46  ;;  %v9064_v44 = vpack.c.bf16 %v286_v21, %v286_v21  ;;  %v9066_v45 = vpack.c.bf16 %v288_v25, %v288_v25  ;;  %v7863_v46 = vld [vmem:[#allocation12 + $0xcc] ss:$16 sps:$4 sm:$0xff]   ;;  %v7939_v21 = vld [vmem:[#allocation12 + $0x128] ss:$16 sps:$4 sm:$0xff]   ;;  %s2298_s29 = sshra.s32 %s9141_s13, 3  ;;  %s7532_s0 = sshll.u32 %s2274_s22, 5 }
  0xb7   :  { %2050 = vmatpush1.bf16.msra.mxu1 %v7780_v47  ;;  %2010 = vmatprep.subr.bf16.mxu0 %v7785_v48  ;;  %v7866_v47 = vld [vmem:[#allocation12 + $0x2cc] ss:$16 sps:$4 sm:$0xff]   ;;  %v7861_v48 = vld [vmem:[#allocation12 + $0xc8] ss:$16 sps:$4 sm:$0xff]   ;;  %s2322_s2 = sshra.s32 %s9146_s19, 3  ;;  %s2301_s3 = sand.u32 7, %s9141_s13 }
  0xb8   :  { %2051 = vmatprep.subr.bf16.mxu1 %v7788_v49  ;;  %v7864_v49 = vld [vmem:[#allocation12 + $0x2c8] ss:$16 sps:$4 sm:$0xff]   ;;  %s7534_s8 = sshll.u32 %s2298_s29, 5  ;;  %s2370_s16 = sshra.s32 %s9154_s11, 3 }
  0xb9   :  { %v7942_v25 = vld [vmem:[#allocation12 + $0x328] ss:$16 sps:$4 sm:$0xff]   ;;  %s2325_s14 = sand.u32 7, %s9146_s19  ;;  %s7536_s5 = sshll.u32 %s2322_s2, 5 }
  0xba   :  { %2011 = vmatpush1.bf16.msra.mxu0 %v7783_v50  ;;  %v7869_v50 = vld [vmem:[#allocation12 + $0xac] ss:$16 sps:$4 sm:$0xff]   ;;  %s7538_s9 = sshll.u32 %s2346_s28, 5  ;;  %s7540_s30 = sshll.u32 %s2370_s16, 5 }
  0xbb   :  { %2052 = vmatpush1.bf16.msra.mxu1 %v7786_v51  ;;  %2012 = vmatprep.subr.bf16.mxu0 %v7791_v53  ;;  %v7872_v51 = vld [vmem:[#allocation12 + $0x2ac] ss:$16 sps:$4 sm:$0xff]   ;;  %v7867_v53 = vld [vmem:[#allocation12 + $0xa8] ss:$16 sps:$4 sm:$0xff]   ;;  %s9170_s13 = sadd.s32 %s7532_s0, %s2277_s26  ;;  %s9172_s22 = sadd.s32 %s7534_s8, %s2301_s3 }
  0xbc   :  { %2053 = vmatprep.subr.bf16.mxu1 %v7794_v54  ;;  %v7870_v54 = vld [vmem:[#allocation12 + $0x2a8] ss:$16 sps:$4 sm:$0xff]   ;;  %s9174_s29 = sadd.s32 %s7536_s5, %s2325_s14  ;;  %s9178_s2 = sadd.s32 %s7540_s30, %s2373_s1 }
  0xbd   :  { %s2244_s11 = scalar_lea.vmem [#allocation2], %s9100_s7  ;;  %s2292_s5 = scalar_lea.vmem [#allocation2], %s9117_s23 }
  0xbe   :  { %2013 = vmatpush1.bf16.msra.mxu0 %v7789_v58  ;;  %v7873_v58 = vld [vmem:[#allocation12 + $0x88] ss:$16 sps:$4 sm:$0xff]   ;;  %s2316_s7 = scalar_lea.vmem [#allocation2], %s9119_s18  ;;  %s2388_s23 = scalar_lea.vmem [#allocation2], %s9144_s17 }
  0xbf   :  { %2054 = vmatpush1.bf16.msra.mxu1 %v7792_v59  ;;  %2014 = vmatprep.subr.bf16.mxu0 %v7797_v62  ;;  %v7876_v59 = vld [vmem:[#allocation12 + $0x288] ss:$16 sps:$4 sm:$0xff]   ;;  %v7881_v62 = vld [vmem:[#allocation12 + $0x6c] ss:$16 sps:$4 sm:$0xff]   ;;  %s2209_s18 = scalar_lea.vmem [#allocation2], %s9148_s20  ;;  %s2281_s17 = scalar_lea.vmem [#allocation2], %s9170_s13 }
  0xc0   :  { %2055 = vmatprep.subr.bf16.mxu1 %v7800_v63  ;;  %v7884_v63 = vld [vmem:[#allocation12 + $0x26c] ss:$16 sps:$4 sm:$0xff]   ;;  %s2305_s20 = scalar_lea.vmem [#allocation2], %s9172_s22  ;;  %s2329_s24 = scalar_lea.vmem [#allocation2], %s9174_s29 }
  0xc1   :  { %s2377_s26 = scalar_lea.vmem [#allocation2], %s9178_s2  ;;  %s9445_s28 = sld [smem:[#allocation21_spill]] }
  0xc2   :  { %2015 = vmatpush1.bf16.msra.mxu0 %v7795_v0  ;;  %v7879_v0 = vld [vmem:[#allocation12 + $0x68] ss:$16 sps:$4 sm:$0xff]   ;;  %s7207_s8 = sld [smem:[#allocation9 + $0x100]] }
  0xc3   :  { %2056 = vmatpush1.bf16.msra.mxu1 %v7798_v1  ;;  %2016 = vmatprep.subr.bf16.mxu0 %v7803_v2  ;;  %v7882_v1 = vld [vmem:[#allocation12 + $0x268] ss:$16 sps:$4 sm:$0xff]   ;;  %v7887_v2 = vld [vmem:[#allocation12 + $0x4c] ss:$16 sps:$4 sm:$0xff]   ;;  %s7213_s16 = sld [smem:[#allocation9 + $0x101]] }
  0xc4   :  { %2057 = vmatprep.subr.bf16.mxu1 %v7806_v3  ;;  %v7888_v3 = vld [vmem:[#allocation12 + $0x248] ss:$16 sps:$4 sm:$0xff]   ;;  %s7219_s14 = sld [smem:[#allocation9 + $0x102]] }
  0xc5   :  { %s7231_s13 = sld [smem:[#allocation9 + $0x104]] }
  0xc6   :  { %2017 = vmatpush1.bf16.msra.mxu0 %v7801_v4  ;;  %v7893_v4 = vld [vmem:[#allocation12 + $0x2c] ss:$16 sps:$4 sm:$0xff]   ;;  %s9281_s3 = sld [smem:[#allocation5 + $0x100]] }
  0xc7   :  { %2058 = vmatpush1.bf16.msra.mxu1 %v7804_v5  ;;  %2018 = vmatprep.subr.bf16.mxu0 %v7809_v6  ;;  %v7896_v5 = vld [vmem:[#allocation12 + $0x22c] ss:$16 sps:$4 sm:$0xff]   ;;  %v7891_v6 = vld [vmem:[#allocation12 + $0x28] ss:$16 sps:$4 sm:$0xff]  }
  0xc8   :  { %2059 = vmatprep.subr.bf16.mxu1 %v7812_v7  ;;  %v7894_v7 = vld [vmem:[#allocation12 + $0x228] ss:$16 sps:$4 sm:$0xff]   ;;  %s4319_s1 = sshra.s32 %s7207_s8, 3  ;;  %s4322_s22 = sand.u32 7, %s7207_s8 }
  0xc9   :  { %s4343_s30 = sshra.s32 %s7213_s16, 3  ;;  %s7543_s29 = sshll.u32 %s4319_s1, 5 }
  0xca   :  { %2019 = vmatpush2.bf16.msra.mxu0 %v7807_v8  ;;  %v7899_v8 = vld [vmem:[#allocation12 + $0xc] ss:$16 sps:$4 sm:$0xff]   ;;  %s7545_s2 = sshll.u32 %s4343_s30, 5 }
  0xcb   :  { %2060 = vmatpush2.bf16.msra.mxu1 %v7810_v9  ;;  %2020 = vmatprep.subr.bf16.mxu0 %v7815_v10  ;;  %v7902_v9 = vld [vmem:[#allocation12 + $0x20c] ss:$16 sps:$4 sm:$0xff]   ;;  %v7897_v10 = vld [vmem:[#allocation12 + $0x8] ss:$16 sps:$4 sm:$0xff]  }
  0xcc   :  { %2061 = vmatprep.subr.bf16.mxu1 %v7818_v11  ;;  %v7900_v11 = vld [vmem:[#allocation12 + $0x208] ss:$16 sps:$4 sm:$0xff]  }
  0xce   :  { %2021 = vmatpush2.bf16.msra.mxu0 %v7813_v12  ;;  %v7905_v12 = vld [vmem:[#allocation12 + $0x1ec] ss:$16 sps:$4 sm:$0xff]  }
  0xcf   :  { %2062 = vmatpush2.bf16.msra.mxu1 %v7816_v13  ;;  %2022 = vmatprep.subr.bf16.mxu0 %v7821_v14  ;;  %v7908_v13 = vld [vmem:[#allocation12 + $0x3ec] ss:$16 sps:$4 sm:$0xff]   ;;  %v7903_v14 = vld [vmem:[#allocation12 + $0x1e8] ss:$16 sps:$4 sm:$0xff]  }
  0xd0   :  { %2063 = vmatprep.subr.bf16.mxu1 %v7824_v15  ;;  %v7906_v15 = vld [vmem:[#allocation12 + $0x3e8] ss:$16 sps:$4 sm:$0xff]  }
  0xd2   :  { %2023 = vmatpush2.bf16.msra.mxu0 %v7819_v16  ;;  %v7911_v16 = vld [vmem:[#allocation12 + $0x1cc] ss:$16 sps:$4 sm:$0xff]  }
  0xd3   :  { %2064 = vmatpush2.bf16.msra.mxu1 %v7822_v17  ;;  %2024 = vmatprep.subr.bf16.mxu0 %v7827_v18  ;;  %v7914_v17 = vld [vmem:[#allocation12 + $0x3cc] ss:$16 sps:$4 sm:$0xff]   ;;  %v7909_v18 = vld [vmem:[#allocation12 + $0x1c8] ss:$16 sps:$4 sm:$0xff]  }
  0xd4   :  { %2065 = vmatprep.subr.bf16.mxu1 %v7830_v19  ;;  %v7912_v19 = vld [vmem:[#allocation12 + $0x3c8] ss:$16 sps:$4 sm:$0xff]  }
  0xd6   :  { %2025 = vmatpush2.bf16.msra.mxu0 %v7825_v20  ;;  %v7917_v20 = vld [vmem:[#allocation12 + $0x1ac] ss:$16 sps:$4 sm:$0xff]  }
  0xd7   :  { %2066 = vmatpush2.bf16.msra.mxu1 %v7828_v22  ;;  %2026 = vmatprep.subr.bf16.mxu0 %v7833_v23  ;;  %v7920_v22 = vld [vmem:[#allocation12 + $0x3ac] ss:$16 sps:$4 sm:$0xff]   ;;  %v7915_v23 = vld [vmem:[#allocation12 + $0x1a8] ss:$16 sps:$4 sm:$0xff]  }
  0xd8   :  { %2067 = vmatprep.subr.bf16.mxu1 %v7836_v24  ;;  %v7918_v24 = vld [vmem:[#allocation12 + $0x3a8] ss:$16 sps:$4 sm:$0xff]  }
  0xda   :  { %2027 = vmatpush2.bf16.msra.mxu0 %v7831_v26  ;;  %v7923_v26 = vld [vmem:[#allocation12 + $0x18c] ss:$16 sps:$4 sm:$0xff]  }
  0xdb   :  { %2068 = vmatpush2.bf16.msra.mxu1 %v7834_v27  ;;  %2028 = vmatprep.subr.bf16.mxu0 %v7839_v28  ;;  %v7926_v27 = vld [vmem:[#allocation12 + $0x38c] ss:$16 sps:$4 sm:$0xff]   ;;  %v7921_v28 = vld [vmem:[#allocation12 + $0x188] ss:$16 sps:$4 sm:$0xff]  }
  0xdc   :  { %2069 = vmatprep.subr.bf16.mxu1 %v7842_v29  ;;  %v7924_v29 = vld [vmem:[#allocation12 + $0x388] ss:$16 sps:$4 sm:$0xff]  }
  0xde   :  { %2029 = vmatpush2.bf16.msra.mxu0 %v7837_v30  ;;  %v7929_v30 = vld [vmem:[#allocation12 + $0x16c] ss:$16 sps:$4 sm:$0xff]  }
  0xdf   :  { %2070 = vmatpush2.bf16.msra.mxu1 %v7840_v31  ;;  %2030 = vmatprep.subr.bf16.mxu0 %v7845_v32  ;;  %v7932_v31 = vld [vmem:[#allocation12 + $0x36c] ss:$16 sps:$4 sm:$0xff]   ;;  %v7927_v32 = vld [vmem:[#allocation12 + $0x168] ss:$16 sps:$4 sm:$0xff]  }
  0xe0   :  { %2071 = vmatprep.subr.bf16.mxu1 %v7848_v33  ;;  %v7930_v33 = vld [vmem:[#allocation12 + $0x368] ss:$16 sps:$4 sm:$0xff]  }
  0xe2   :  { %2031 = vmatpush2.bf16.msra.mxu0 %v7843_v34  ;;  %v7935_v34 = vld [vmem:[#allocation12 + $0x14c] ss:$16 sps:$4 sm:$0xff]  }
  0xe3   :  { %2072 = vmatpush2.bf16.msra.mxu1 %v7846_v35  ;;  %2032 = vmatprep.subr.bf16.mxu0 %v7851_v36  ;;  %v7938_v35 = vld [vmem:[#allocation12 + $0x34c] ss:$16 sps:$4 sm:$0xff]   ;;  %v7933_v36 = vld [vmem:[#allocation12 + $0x148] ss:$16 sps:$4 sm:$0xff]  }
  0xe4   :  { %2073 = vmatprep.subr.bf16.mxu1 %v7854_v37  ;;  %v7936_v37 = vld [vmem:[#allocation12 + $0x348] ss:$16 sps:$4 sm:$0xff]  }
  0xe6   :  { %2033 = vmatpush2.bf16.msra.mxu0 %v7849_v38  ;;  %v7941_v38 = vld [vmem:[#allocation12 + $0x12c] ss:$16 sps:$4 sm:$0xff]  }
  0xe7   :  { %2074 = vmatpush2.bf16.msra.mxu1 %v7852_v39  ;;  %2084 = vmatprep.subr.bf16.mxu0 %v7857_v40  ;;  %v7944_v39 = vld [vmem:[#allocation12 + $0x32c] ss:$16 sps:$4 sm:$0xff]  }
  0xe8   :  { %2125 = vmatprep.subr.bf16.mxu1 %v7860_v41  ;;  %v7947_v40 = vld [vmem:[#allocation12 + $0x10c] ss:$16 sps:$4 sm:$0xff]  }
  0xe9   :  { %2035 = vmatmul.mubr.bf16.vlgmr.msra.gmra.mxu0 %v9064_v44  ;;  %v7950_v41 = vld [vmem:[#allocation12 + $0x30c] ss:$16 sps:$4 sm:$0xff]  }
  0xea   :  { %2076 = vmatmul.mubr.bf16.vlgmr.msra.gmra.mxu1 %v9066_v45  ;;  %2085 = vmatpush1.bf16.msra.mxu0 %v7855_v42  ;;  %v7945_v42 = vld [vmem:[#allocation12 + $0x108] ss:$16 sps:$4 sm:$0xff]  }
  0xeb   :  { %2126 = vmatpush1.bf16.msra.mxu1 %v7858_v43  ;;  %2086 = vmatprep.subr.bf16.mxu0 %v7863_v46  ;;  %v7948_v43 = vld [vmem:[#allocation12 + $0x308] ss:$16 sps:$4 sm:$0xff]  }
  0xec   :  { %2127 = vmatprep.subr.bf16.mxu1 %v7866_v47  ;;  %2116 = vmatprep.mubr.bf16.mxu0 %v9058_v60  ;;  %v7890_v60 = vld [vmem:[#allocation12 + $0x24c] ss:$16 sps:$4 sm:$0xff]  }
  0xed   :  { %2157 = vmatprep.mubr.bf16.mxu1 %v9060_v61  ;;  %v7885_v61 = vld [vmem:[#allocation12 + $0x48] ss:$16 sps:$4 sm:$0xff]  }
  0xee   :  { %2087 = vmatpush1.bf16.msra.mxu0 %v7861_v48 }
  0xef   :  { %2128 = vmatpush1.bf16.msra.mxu1 %v7864_v49  ;;  %2088 = vmatprep.subr.bf16.mxu0 %v7869_v50 }
  0xf0   :  { %2129 = vmatprep.subr.bf16.mxu1 %v7872_v51 }
  0xf2   :  { %2089 = vmatpush1.bf16.msra.mxu0 %v7867_v53 }
  0xf3   :  { %2130 = vmatpush1.bf16.msra.mxu1 %v7870_v54  ;;  %2090 = vmatprep.subr.bf16.mxu0 %v7875_v55 }
  0xf4   :  { %2131 = vmatprep.subr.bf16.mxu1 %v7878_v56 }
  0xf6   :  { %2091 = vmatpush1.bf16.msra.mxu0 %v7873_v58  ;;  %v7951_v58 = vld [vmem:[#allocation12 + $0x4e0] ss:$16 sps:$4 sm:$0xff]  }
  0xf7   :  { %2132 = vmatpush1.bf16.msra.mxu1 %v7876_v59  ;;  %2092 = vmatprep.subr.bf16.mxu0 %v7881_v62  ;;  %v7953_v59 = vld [vmem:[#allocation12 + $0x4e4] ss:$16 sps:$4 sm:$0xff]   ;;  %v7954_v62 = vld [vmem:[#allocation12 + $0x6e0] ss:$16 sps:$4 sm:$0xff]  }
  0xf8   :  { %2133 = vmatprep.subr.bf16.mxu1 %v7884_v63  ;;  %v7956_v63 = vld [vmem:[#allocation12 + $0x6e4] ss:$16 sps:$4 sm:$0xff]  }
  0xfa   :  { %2093 = vmatpush1.bf16.msra.mxu0 %v7879_v0  ;;  %v7959_v0 = vld [vmem:[#allocation12 + $0x4c4] ss:$16 sps:$4 sm:$0xff]  }
  0xfb   :  { %2134 = vmatpush1.bf16.msra.mxu1 %v7882_v1  ;;  %2094 = vmatprep.subr.bf16.mxu0 %v7887_v2  ;;  %v7962_v1 = vld [vmem:[#allocation12 + $0x6c4] ss:$16 sps:$4 sm:$0xff]  }
  0xfc   :  { %2135 = vmatprep.subr.bf16.mxu1 %v7890_v60  ;;  %v7965_v2 = vld [vmem:[#allocation12 + $0x4a4] ss:$16 sps:$4 sm:$0xff]  }
  0xfd   :  { %v7968_v60 = vld [vmem:[#allocation12 + $0x6a4] ss:$16 sps:$4 sm:$0xff]  }
  0xfe   :  { %2095 = vmatpush1.bf16.msra.mxu0 %v7885_v61  ;;  %v7963_v61 = vld [vmem:[#allocation12 + $0x4a0] ss:$16 sps:$4 sm:$0xff]  }
  0xff   :  { %2136 = vmatpush1.bf16.msra.mxu1 %v7888_v3  ;;  %2096 = vmatprep.subr.bf16.mxu0 %v7893_v4  ;;  %v7966_v3 = vld [vmem:[#allocation12 + $0x6a0] ss:$16 sps:$4 sm:$0xff]   ;;  %v7971_v4 = vld [vmem:[#allocation12 + $0x484] ss:$16 sps:$4 sm:$0xff]  }
 0x100   :  { %2137 = vmatprep.subr.bf16.mxu1 %v7896_v5  ;;  %v7974_v5 = vld [vmem:[#allocation12 + $0x684] ss:$16 sps:$4 sm:$0xff]  }
 0x102   :  { %2097 = vmatpush1.bf16.msra.mxu0 %v7891_v6  ;;  %v7969_v6 = vld [vmem:[#allocation12 + $0x480] ss:$16 sps:$4 sm:$0xff]  }
 0x103   :  { %2138 = vmatpush1.bf16.msra.mxu1 %v7894_v7  ;;  %2098 = vmatprep.subr.bf16.mxu0 %v7899_v8  ;;  %v7972_v7 = vld [vmem:[#allocation12 + $0x680] ss:$16 sps:$4 sm:$0xff]   ;;  %v7977_v8 = vld [vmem:[#allocation12 + $0x464] ss:$16 sps:$4 sm:$0xff]  }
 0x104   :  { %2139 = vmatprep.subr.bf16.mxu1 %v7902_v9  ;;  %v7980_v9 = vld [vmem:[#allocation12 + $0x664] ss:$16 sps:$4 sm:$0xff]  }
 0x106   :  { %2099 = vmatpush1.bf16.msra.mxu0 %v7897_v10  ;;  %v7975_v10 = vld [vmem:[#allocation12 + $0x460] ss:$16 sps:$4 sm:$0xff]  }
 0x107   :  { %2140 = vmatpush1.bf16.msra.mxu1 %v7900_v11  ;;  %2100 = vmatprep.subr.bf16.mxu0 %v7905_v12  ;;  %v7978_v11 = vld [vmem:[#allocation12 + $0x660] ss:$16 sps:$4 sm:$0xff]   ;;  %v7983_v12 = vld [vmem:[#allocation12 + $0x444] ss:$16 sps:$4 sm:$0xff]  }
 0x108   :  { %2141 = vmatprep.subr.bf16.mxu1 %v7908_v13  ;;  %v7986_v13 = vld [vmem:[#allocation12 + $0x644] ss:$16 sps:$4 sm:$0xff]  }
 0x10a   :  { %2101 = vmatpush2.bf16.msra.mxu0 %v7903_v14  ;;  %v7981_v14 = vld [vmem:[#allocation12 + $0x440] ss:$16 sps:$4 sm:$0xff]  }
 0x10b   :  { %2142 = vmatpush2.bf16.msra.mxu1 %v7906_v15  ;;  %2102 = vmatprep.subr.bf16.mxu0 %v7911_v16  ;;  %v7984_v15 = vld [vmem:[#allocation12 + $0x640] ss:$16 sps:$4 sm:$0xff]   ;;  %v7989_v16 = vld [vmem:[#allocation12 + $0x424] ss:$16 sps:$4 sm:$0xff]  }
 0x10c   :  { %2143 = vmatprep.subr.bf16.mxu1 %v7914_v17  ;;  %v7992_v17 = vld [vmem:[#allocation12 + $0x624] ss:$16 sps:$4 sm:$0xff]  }
 0x10e   :  { %2103 = vmatpush2.bf16.msra.mxu0 %v7909_v18 }
 0x10f   :  { %2144 = vmatpush2.bf16.msra.mxu1 %v7912_v19  ;;  %2104 = vmatprep.subr.bf16.mxu0 %v7917_v20  ;;  %v7987_v20 = vld [vmem:[#allocation12 + $0x420] ss:$16 sps:$4 sm:$0xff]  }
 0x110   :  { %2145 = vmatprep.subr.bf16.mxu1 %v7920_v22  ;;  %v7990_v22 = vld [vmem:[#allocation12 + $0x620] ss:$16 sps:$4 sm:$0xff]  }
 0x112   :  { %2105 = vmatpush2.bf16.msra.mxu0 %v7915_v23 }
 0x113   :  { %2146 = vmatpush2.bf16.msra.mxu1 %v7918_v24  ;;  %2106 = vmatprep.subr.bf16.mxu0 %v7923_v26 }
 0x114   :  { %2147 = vmatprep.subr.bf16.mxu1 %v7926_v27 }
 0x116   :  { %2107 = vmatpush2.bf16.msra.mxu0 %v7921_v28  ;;  %v7995_v28 = vld [vmem:[#allocation12 + $0x404] ss:$16 sps:$4 sm:$0xff]  }
 0x117   :  { %2148 = vmatpush2.bf16.msra.mxu1 %v7924_v29  ;;  %2108 = vmatprep.subr.bf16.mxu0 %v7929_v30  ;;  %v7998_v29 = vld [vmem:[#allocation12 + $0x604] ss:$16 sps:$4 sm:$0xff]  }
 0x118   :  { %2149 = vmatprep.subr.bf16.mxu1 %v7932_v31 }
 0x11a   :  { %2109 = vmatpush2.bf16.msra.mxu0 %v7927_v32  ;;  %v7993_v32 = vld [vmem:[#allocation12 + $0x400] ss:$16 sps:$4 sm:$0xff]  }
 0x11b   :  { %2150 = vmatpush2.bf16.msra.mxu1 %v7930_v33  ;;  %2110 = vmatprep.subr.bf16.mxu0 %v7935_v34  ;;  %v7996_v33 = vld [vmem:[#allocation12 + $0x600] ss:$16 sps:$4 sm:$0xff]  }
 0x11c   :  { %2151 = vmatprep.subr.bf16.mxu1 %v7938_v35 }
 0x11e   :  { %2111 = vmatpush2.bf16.msra.mxu0 %v7933_v36  ;;  %v8001_v36 = vld [vmem:[#allocation12 + $0x5e4] ss:$16 sps:$4 sm:$0xff]  }
 0x11f   :  { %2152 = vmatpush2.bf16.msra.mxu1 %v7936_v37  ;;  %2112 = vmatprep.subr.bf16.mxu0 %v7941_v38  ;;  %v8004_v37 = vld [vmem:[#allocation12 + $0x7e4] ss:$16 sps:$4 sm:$0xff]   ;;  %v7999_v38 = vld [vmem:[#allocation12 + $0x5e0] ss:$16 sps:$4 sm:$0xff]  }
 0x120   :  { %2153 = vmatprep.subr.bf16.mxu1 %v7944_v39  ;;  %v8002_v39 = vld [vmem:[#allocation12 + $0x7e0] ss:$16 sps:$4 sm:$0xff]  }
 0x122   :  { %2113 = vmatpush2.bf16.msra.mxu0 %v7939_v21  ;;  %v8007_v21 = vld [vmem:[#allocation12 + $0x5c4] ss:$16 sps:$4 sm:$0xff]  }
 0x123   :  { %2154 = vmatpush2.bf16.msra.mxu1 %v7942_v25  ;;  %2114 = vmatprep.subr.bf16.mxu0 %v7947_v40  ;;  %v8010_v25 = vld [vmem:[#allocation12 + $0x7c4] ss:$16 sps:$4 sm:$0xff]   ;;  %v8005_v40 = vld [vmem:[#allocation12 + $0x5c0] ss:$16 sps:$4 sm:$0xff]  }
 0x124   :  { %2155 = vmatprep.subr.bf16.mxu1 %v7950_v41  ;;  %v8008_v41 = vld [vmem:[#allocation12 + $0x7c0] ss:$16 sps:$4 sm:$0xff]  }
 0x126   :  { %2115 = vmatpush2.bf16.msra.mxu0 %v7945_v42  ;;  %v8013_v42 = vld [vmem:[#allocation12 + $0x5a4] ss:$16 sps:$4 sm:$0xff]  }
 0x127   :  { %2156 = vmatpush2.bf16.msra.mxu1 %v7948_v43  ;;  %3304 = vmatprep.subr.bf16.mxu0 %v7953_v59  ;;  %v8016_v43 = vld [vmem:[#allocation12 + $0x7a4] ss:$16 sps:$4 sm:$0xff]  }
 0x128   :  { %3345 = vmatprep.subr.bf16.mxu1 %v7956_v63  ;;  %v8028_v59 = vld [vmem:[#allocation12 + $0x764] ss:$16 sps:$4 sm:$0xff]  }
 0x129   :  { %v1232_v46 = vpop.f32.mrf.mxu0  ;;  %2117 = vmatmul.mubr.bf16.vlgmr.msra.gmra.mxu0 %v9064_v44  ;;  %v7957_v44 = vld [vmem:[#allocation12 + $0x4c0] ss:$16 sps:$4 sm:$0xff]   ;;  %v8034_v63 = vld [vmem:[#allocation12 + $0x744] ss:$16 sps:$4 sm:$0xff]  }
 0x12a   :  { %v1273_v47 = vpop.f32.mrf.mxu1  ;;  %2158 = vmatmul.mubr.bf16.vlgmr.msra.gmra.mxu1 %v9066_v45  ;;  %3305 = vmatpush1.bf16.msra.mxu0 %v7951_v58  ;;  %v7960_v45 = vld [vmem:[#allocation12 + $0x6c0] ss:$16 sps:$4 sm:$0xff]  }
 0x12b   :  { %v9074_v48 = vadd.f32 %v1273_v47, %v1232_v46  ;;  %v1234_v49 = vpop.f32.mrf.mxu0  ;;  %3346 = vmatpush1.bf16.msra.mxu1 %v7954_v62  ;;  %3306 = vmatprep.subr.bf16.mxu0 %v7959_v0  ;;  %v8011_v46 = vld [vmem:[#allocation12 + $0x5a0] ss:$16 sps:$4 sm:$0xff]   ;;  %v8031_v62 = vld [vmem:[#allocation12 + $0x544] ss:$16 sps:$4 sm:$0xff]  }
 0x12c   :  { %v1275_v50 = vpop.f32.mrf.mxu1  ;;  %3347 = vmatprep.subr.bf16.mxu1 %v7962_v1  ;;  %v8014_v47 = vld [vmem:[#allocation12 + $0x7a0] ss:$16 sps:$4 sm:$0xff]  }
 0x12d   :  { %v9076_v51 = vadd.f32 %v1275_v50, %v1234_v49  ;;  %v1236_v53 = vpop.f32.mrf.mxu0  ;;  %v8019_v49 = vld [vmem:[#allocation12 + $0x584] ss:$16 sps:$4 sm:$0xff]   ;;  %v8026_v58 = vld [vmem:[#allocation12 + $0x760] ss:$16 sps:$4 sm:$0xff]  }
 0x12e   :  { %v1277_v54 = vpop.f32.mrf.mxu1  ;;  %3307 = vmatpush1.bf16.msra.mxu0 %v7957_v44  ;;  %v8022_v50 = vld [vmem:[#allocation12 + $0x784] ss:$16 sps:$4 sm:$0xff]   ;;  %v8017_v53 = vld [vmem:[#allocation12 + $0x580] ss:$16 sps:$4 sm:$0xff]  }
 0x12f   :  { %v1237_v55 = vpop.f32.mrf.mxu0  ;;  %3348 = vmatpush1.bf16.msra.mxu1 %v7960_v45  ;;  %3308 = vmatprep.subr.bf16.mxu0 %v7965_v2  ;;  %v8020_v54 = vld [vmem:[#allocation12 + $0x780] ss:$16 sps:$4 sm:$0xff]   ;;  %v8037_v44 = vld [vmem:[#allocation12 + $0x524] ss:$16 sps:$4 sm:$0xff]  }
 0x130   :  { %v1278_v56 = vpop.f32.mrf.mxu1  ;;  %3349 = vmatprep.subr.bf16.mxu1 %v7968_v60  ;;  %v8023_v55 = vld [vmem:[#allocation12 + $0x560] ss:$16 sps:$4 sm:$0xff]   ;;  %v8040_v2 = vld [vmem:[#allocation12 + $0x724] ss:$16 sps:$4 sm:$0xff]  }
 0x131   :  { %v8025_v56 = vld [vmem:[#allocation12 + $0x564] ss:$16 sps:$4 sm:$0xff]   ;;  %v8029_v0 = vld [vmem:[#allocation12 + $0x540] ss:$16 sps:$4 sm:$0xff]  }
 0x132   :  { %3309 = vmatpush1.bf16.msra.mxu0 %v7963_v61  ;;  %v8032_v1 = vld [vmem:[#allocation12 + $0x740] ss:$16 sps:$4 sm:$0xff]   ;;  %v8043_v61 = vld [vmem:[#allocation12 + $0x504] ss:$16 sps:$4 sm:$0xff]  }
 0x133   :  { %3350 = vmatpush1.bf16.msra.mxu1 %v7966_v3  ;;  %3310 = vmatprep.subr.bf16.mxu0 %v7971_v4  ;;  %v8035_v45 = vld [vmem:[#allocation12 + $0x520] ss:$16 sps:$4 sm:$0xff]   ;;  %v8046_v3 = vld [vmem:[#allocation12 + $0x704] ss:$16 sps:$4 sm:$0xff]  }
 0x134   :  { %3351 = vmatprep.subr.bf16.mxu1 %v7974_v5  ;;  %v8038_v60 = vld [vmem:[#allocation12 + $0x720] ss:$16 sps:$4 sm:$0xff]  }
 0x135   :  { %v8041_v4 = vld [vmem:[#allocation12 + $0x500] ss:$16 sps:$4 sm:$0xff]  }
 0x136   :  { %3311 = vmatpush1.bf16.msra.mxu0 %v7969_v6  ;;  %v8044_v5 = vld [vmem:[#allocation12 + $0x700] ss:$16 sps:$4 sm:$0xff]   ;;  %v8049_v6 = vld [vmem:[#allocation12 + $0x4ec] ss:$16 sps:$4 sm:$0xff]  }
 0x137   :  { %3352 = vmatpush1.bf16.msra.mxu1 %v7972_v7  ;;  %3312 = vmatprep.subr.bf16.mxu0 %v7977_v8  ;;  %v8052_v7 = vld [vmem:[#allocation12 + $0x6ec] ss:$16 sps:$4 sm:$0xff]   ;;  %v2169_v8 = vshrl.u32 %v87_v52, 7 }
 0x138   :  { %3353 = vmatprep.subr.bf16.mxu1 %v7980_v9 }
 0x139   :  { %v9083_v9 = vsub.s32 0, %v2169_v8 }
 0x13a   :  { %3313 = vmatpush1.bf16.msra.mxu0 %v7975_v10  ;;  %v9088_v10 = vld [vmem:[%s9435_s4] sm:$0xf]  ;;  %s2349_s4 = sand.u32 7, %s9150_s10  ;;  %s2220_s10 = scalar_lea.vmem [#allocation2], %s9098_s6 }
 0x13b   :  { %3354 = vmatpush1.bf16.msra.mxu1 %v7978_v11  ;;  %3314 = vmatprep.subr.bf16.mxu0 %v7983_v12  ;;  %v9090_v11 = vsub.s32 1, %v2169_v8  ;;  %s9176_s19 = sadd.s32 %s7538_s9, %s2349_s4  ;;  %s2268_s4 = scalar_lea.vmem [#allocation2], %s9104_s12 }
 0x13c   :  { %3355 = vmatprep.subr.bf16.mxu1 %v7986_v13  ;;  %s9444_s6 = sld [smem:[#allocation20_spill]]  ;;  %s2340_s9 = scalar_lea.vmem [#allocation2], %s9121_s21 }
 0x13d   :  { %s2364_s12 = scalar_lea.vmem [#allocation2], %s9131_s27  ;;  %s2257_s27 = scalar_lea.vmem [#allocation2], %s9168_s15 }
 0x13e   :  { %3315 = vmatpush1.bf16.msra.mxu0 %v7981_v14  ;;  %s2353_s25 = scalar_lea.vmem [#allocation2], %s9176_s19  ;;  %s7225_s15 = sld [smem:[#allocation9 + $0x103]] }
 0x13f   :  { %3356 = vmatpush1.bf16.msra.mxu1 %v7984_v15  ;;  %3316 = vmatprep.subr.bf16.mxu0 %v7989_v16  ;;  %v2171_v15 = vrot.slane %v9088_v10, %v9083_v9  ;;  %s4346_s19 = sand.u32 7, %s7213_s16  ;;  %s9284_s16 = sld [smem:[#allocation5 + $0x101]] }
 0x140   :  { %3357 = vmatprep.subr.bf16.mxu1 %v7992_v17 }
 0x142   :  { %3317 = vmatpush1.bf16.msra.mxu0 %v7987_v20  ;;  %s2233_s21 = scalar_lea.vmem [#allocation2], %s9444_s6  ;;  %s4370_s6 = sand.u32 7, %s7219_s14 }
 0x143   :  { %3358 = vmatpush1.bf16.msra.mxu1 %v7990_v22  ;;  %3318 = vmatprep.subr.bf16.mxu0 %v7995_v28 }
 0x144   :  { %3359 = vmatprep.subr.bf16.mxu1 %v7998_v29 }
 0x146   :  { %3319 = vmatpush1.bf16.msra.mxu0 %v7993_v32 }
 0x147   :  { %3360 = vmatpush1.bf16.msra.mxu1 %v7996_v33  ;;  %3320 = vmatprep.subr.bf16.mxu0 %v8001_v36 }
 0x148   :  { %3361 = vmatprep.subr.bf16.mxu1 %v8004_v37 }
 0x14a   :  { %3321 = vmatpush2.bf16.msra.mxu0 %v7999_v38 }
 0x14b   :  { %3362 = vmatpush2.bf16.msra.mxu1 %v8002_v39  ;;  %3322 = vmatprep.subr.bf16.mxu0 %v8007_v21 }
 0x14c   :  { %3363 = vmatprep.subr.bf16.mxu1 %v8010_v25 }
 0x14e   :  { %3323 = vmatpush2.bf16.msra.mxu0 %v8005_v40 }
 0x14f   :  { %3364 = vmatpush2.bf16.msra.mxu1 %v8008_v41  ;;  %3324 = vmatprep.subr.bf16.mxu0 %v8013_v42 }
 0x150   :  { %3365 = vmatprep.subr.bf16.mxu1 %v8016_v43 }
 0x152   :  { %3325 = vmatpush2.bf16.msra.mxu0 %v8011_v46 }
 0x153   :  { %3366 = vmatpush2.bf16.msra.mxu1 %v8014_v47  ;;  %3326 = vmatprep.subr.bf16.mxu0 %v8019_v49 }
 0x154   :  { %3367 = vmatprep.subr.bf16.mxu1 %v8022_v50 }
 0x156   :  { %3327 = vmatpush2.bf16.msra.mxu0 %v8017_v53 }
 0x157   :  { %3368 = vmatpush2.bf16.msra.mxu1 %v8020_v54  ;;  %3328 = vmatprep.subr.bf16.mxu0 %v8025_v56 }
 0x158   :  { %3369 = vmatprep.subr.bf16.mxu1 %v8028_v59 }
 0x15a   :  { %3329 = vmatpush2.bf16.msra.mxu0 %v8023_v55 }
 0x15b   :  { %3370 = vmatpush2.bf16.msra.mxu1 %v8026_v58  ;;  %3330 = vmatprep.subr.bf16.mxu0 %v8031_v62 }
 0x15c   :  { %3371 = vmatprep.subr.bf16.mxu1 %v8034_v63 }
 0x15e   :  { %3331 = vmatpush2.bf16.msra.mxu0 %v8029_v0 }
 0x15f   :  { %3372 = vmatpush2.bf16.msra.mxu1 %v8032_v1  ;;  %3332 = vmatprep.subr.bf16.mxu0 %v8037_v44 }
 0x160   :  { %3373 = vmatprep.subr.bf16.mxu1 %v8040_v2 }
 0x162   :  { %3333 = vmatpush2.bf16.msra.mxu0 %v8035_v45 }
 0x163   :  { %3374 = vmatpush2.bf16.msra.mxu1 %v8038_v60  ;;  %3334 = vmatprep.subr.bf16.mxu0 %v8043_v61 }
 0x164   :  { %3375 = vmatprep.subr.bf16.mxu1 %v8046_v3 }
 0x166   :  { %3335 = vmatpush2.bf16.msra.mxu0 %v8041_v4 }
 0x167   :  { %3376 = vmatpush2.bf16.msra.mxu1 %v8044_v5  ;;  %3386 = vmatprep.subr.bf16.mxu0 %v8049_v6 }
 0x168   :  { %3427 = vmatprep.subr.bf16.mxu1 %v8052_v7 }
 0x169   :  { %v1314_v18 = vpop.f32.mrf.mxu0 }
 0x16a   :  { %v1355_v19 = vpop.f32.mrf.mxu1 }
 0x16b   :  { %v9078_v23 = vadd.f32 %v1355_v19, %v1314_v18  ;;  %v1316_v24 = vpop.f32.mrf.mxu0  ;;  %v2175_v19 = vrot.slane %v9088_v10, %v9090_v11 }
 0x16c   :  { %v1357_v26 = vpop.f32.mrf.mxu1 }
 0x16d   :  { %v9080_v27 = vadd.f32 %v1357_v26, %v1316_v24  ;;  %v1318_v30 = vpop.f32.mrf.mxu0 }
 0x16e   :  { %v1359_v31 = vpop.f32.mrf.mxu1 }
 0x16f   :  { %v1319_v34 = vpop.f32.mrf.mxu0 }
 0x170   :  { %v1360_v35 = vpop.f32.mrf.mxu1  ;;  %v9115_v34 = vsub.s32 3, %v2169_v8 }
 0x172   :  { %v2183_v41 = vrot.slane %v9088_v10, %v9115_v34 }
 0x1a9   :  { %v2036_v12 = vpop.f32.mrf.mxu0 }
 0x1aa   :  { %v2077_v13 = vpop.f32.mrf.mxu1  ;;  %v2037_v14 = vadd.f32 %v2036_v12, %v9074_v48 }
 0x1ab   :  { %v2038_v16 = vpop.f32.mrf.mxu0 }
 0x1ac   :  { %v2079_v17 = vpop.f32.mrf.mxu1  ;;  %v2078_v18 = vadd.f32 %v2077_v13, %v2037_v14  ;;  %v2039_v52 = vadd.f32 %v2038_v16, %v9076_v51  ;;  %v9110_v51 = vsub.s32 2, %v2169_v8  ;;  %v8047_v13 = vld [vmem:[#allocation12 + $0x4e8] ss:$16 sps:$4 sm:$0xff]  }
 0x1ad   :  { %v2040_v20 = vpop.f32.mrf.mxu0  ;;  %v8050_v14 = vld [vmem:[#allocation12 + $0x6e8] ss:$16 sps:$4 sm:$0xff]  }
 0x1ae   :  { %v2081_v22 = vpop.f32.mrf.mxu1  ;;  %v2188_v24 = vadd.f32 %v2171_v15, %v2078_v18  ;;  %v2080_v26 = vadd.f32 %v2079_v17, %v2039_v52  ;;  %v2179_v38 = vrot.slane %v9088_v10, %v9110_v51  ;;  %v8055_v52 = vld [vmem:[#allocation12 + $0x4cc] ss:$16 sps:$4 sm:$0xff]   ;;  %v8053_v20 = vld [vmem:[#allocation12 + $0x4c8] ss:$16 sps:$4 sm:$0xff]  }
 0x1af   :  { %v2041_v28 = vpop.f32.mrf.mxu0  ;;  %v8056_v22 = vld [vmem:[#allocation12 + $0x6c8] ss:$16 sps:$4 sm:$0xff]  }
 0x1b0   :  { %v2082_v29 = vpop.f32.mrf.mxu1  ;;  %8719 = vtanh.f32 %v2188_v24  ;;  %v2189_v30 = vadd.f32 %v2175_v19, %v2080_v26  ;;  %v8058_v19 = vld [vmem:[#allocation12 + $0x6cc] ss:$16 sps:$4 sm:$0xff]   ;;  %v8059_v28 = vld [vmem:[#allocation12 + $0x4a8] ss:$16 sps:$4 sm:$0xff]  }
 0x1b1   :  { %v8061_v24 = vld [vmem:[#allocation12 + $0x4ac] ss:$16 sps:$4 sm:$0xff]   ;;  %v8062_v29 = vld [vmem:[#allocation12 + $0x6a8] ss:$16 sps:$4 sm:$0xff]  }
 0x1b2   :  { %8721 = vtanh.f32 %v2189_v30  ;;  %v8064_v26 = vld [vmem:[#allocation12 + $0x6ac] ss:$16 sps:$4 sm:$0xff]  }
 0x1b3   :  { %v8067_v30 = vld [vmem:[#allocation12 + $0x48c] ss:$16 sps:$4 sm:$0xff]  }
 0x1bd   :  { %v8720_v48 = vpop.eup %8719 }
 0x1be   :  { %2196 = vst [vmem:[#allocation2 + $0x20] sm:$0xff] %v8720_v48  ;;  %v8070_v48 = vld [vmem:[#allocation12 + $0x68c] ss:$16 sps:$4 sm:$0xff]  }
 0x1bf   :  { %v8722_v31 = vpop.eup %8721 }
 0x1c0   :  { %2197 = vst [vmem:[#allocation2 + $0x28] sm:$0xff] %v8722_v31  ;;  %v8065_v31 = vld [vmem:[#allocation12 + $0x488] ss:$16 sps:$4 sm:$0xff]  }
 0x1c5   :  { %v6412_v32 = vld [vmem:[#allocation2 + $0x20] sm:$0xff] }
 0x1c6   :  { %6424 = vst [vmem:[#allocation14] sm:$0xff] %v6412_v32  ;;  %v8068_v32 = vld [vmem:[#allocation12 + $0x688] ss:$16 sps:$4 sm:$0xff]  }
 0x1c7   :  { %v6413_v33 = vld [vmem:[#allocation2 + $0x28] sm:$0xff] }
 0x1c8   :  { %6425 = vst [vmem:[#allocation14 + $0x8] sm:$0xff] %v6413_v33  ;;  %v8073_v33 = vld [vmem:[#allocation12 + $0x46c] ss:$16 sps:$4 sm:$0xff]  }
 0x1e9   :  { %v2118_v35 = vpop.f32.mrf.mxu0 }
 0x1ea   :  { %v2159_v36 = vpop.f32.mrf.mxu1  ;;  %v2119_v37 = vadd.f32 %v2118_v35, %v9078_v23  ;;  %v8076_v35 = vld [vmem:[#allocation12 + $0x66c] ss:$16 sps:$4 sm:$0xff]  }
 0x1eb   :  { %v2120_v39 = vpop.f32.mrf.mxu0 }
 0x1ec   :  { %v2161_v21 = vpop.f32.mrf.mxu1  ;;  %v2160_v25 = vadd.f32 %v2159_v36, %v2119_v37  ;;  %v2121_v40 = vadd.f32 %v2120_v39, %v9080_v27  ;;  %v8071_v36 = vld [vmem:[#allocation12 + $0x468] ss:$16 sps:$4 sm:$0xff]   ;;  %v8082_v39 = vld [vmem:[#allocation12 + $0x64c] ss:$16 sps:$4 sm:$0xff]  }
 0x1ed   :  { %v2122_v42 = vpop.f32.mrf.mxu0  ;;  %v8074_v37 = vld [vmem:[#allocation12 + $0x668] ss:$16 sps:$4 sm:$0xff]  }
 0x1ee   :  { %v2163_v43 = vpop.f32.mrf.mxu1  ;;  %v2190_v23 = vadd.f32 %v2179_v38, %v2160_v25  ;;  %v2162_v46 = vadd.f32 %v2161_v21, %v2121_v40  ;;  %v8079_v38 = vld [vmem:[#allocation12 + $0x44c] ss:$16 sps:$4 sm:$0xff]   ;;  %v8077_v21 = vld [vmem:[#allocation12 + $0x448] ss:$16 sps:$4 sm:$0xff]  }
 0x1ef   :  { %v2123_v47 = vpop.f32.mrf.mxu0  ;;  %v8080_v25 = vld [vmem:[#allocation12 + $0x648] ss:$16 sps:$4 sm:$0xff]   ;;  %v8085_v40 = vld [vmem:[#allocation12 + $0x42c] ss:$16 sps:$4 sm:$0xff]  }
 0x1f0   :  { %v2164_v49 = vpop.f32.mrf.mxu1  ;;  %8723 = vtanh.f32 %v2190_v23  ;;  %v2191_v27 = vadd.f32 %v2183_v41, %v2162_v46  ;;  %v8088_v41 = vld [vmem:[#allocation12 + $0x62c] ss:$16 sps:$4 sm:$0xff]   ;;  %v8083_v42 = vld [vmem:[#allocation12 + $0x428] ss:$16 sps:$4 sm:$0xff]  }
 0x1f1   :  { %v8086_v43 = vld [vmem:[#allocation12 + $0x628] ss:$16 sps:$4 sm:$0xff]   ;;  %v8091_v23 = vld [vmem:[#allocation12 + $0x40c] ss:$16 sps:$4 sm:$0xff]  }
 0x1f2   :  { %8725 = vtanh.f32 %v2191_v27  ;;  %v8094_v46 = vld [vmem:[#allocation12 + $0x60c] ss:$16 sps:$4 sm:$0xff]   ;;  %v8089_v47 = vld [vmem:[#allocation12 + $0x408] ss:$16 sps:$4 sm:$0xff]  }
 0x1f3   :  { %v8092_v49 = vld [vmem:[#allocation12 + $0x608] ss:$16 sps:$4 sm:$0xff]   ;;  %v8097_v27 = vld [vmem:[#allocation12 + $0x5ec] ss:$16 sps:$4 sm:$0xff]  }
 0x1fd   :  { %v8724_v50 = vpop.eup %8723 }
 0x1fe   :  { %2198 = vst [vmem:[#allocation2 + $0x30] sm:$0xff] %v8724_v50  ;;  %v8100_v50 = vld [vmem:[#allocation12 + $0x7ec] ss:$16 sps:$4 sm:$0xff]  }
 0x1ff   :  { %v8726_v53 = vpop.eup %8725 }
 0x200   :  { %2199 = vst [vmem:[#allocation2 + $0x38] sm:$0xff] %v8726_v53  ;;  %v8095_v53 = vld [vmem:[#allocation12 + $0x5e8] ss:$16 sps:$4 sm:$0xff]  }
 0x205   :  { %v6414_v54 = vld [vmem:[#allocation2 + $0x30] sm:$0xff] }
 0x206   :  { %6426 = vst [vmem:[#allocation14 + $0x10] sm:$0xff] %v6414_v54  ;;  %v8098_v54 = vld [vmem:[#allocation12 + $0x7e8] ss:$16 sps:$4 sm:$0xff]  }
 0x207   :  { %v2221_v55 = vld [vmem:[%s2220_s10] ss:$8 sm:$0xf]  ;;  %s4367_s10 = sshra.s32 %s7219_s14, 3 }
 0x208   :  { %v2245_v56 = vld [vmem:[%s2244_s11] ss:$8 sm:$0xf]  ;;  %2222 = vst.msk [vmem:[#allocation4] ss:$8 sm:$0xf] %vm8938_vm0, %v2221_v55 }
 0x209   :  { %2246 = vst.msk [vmem:[#allocation4 + $0x1] ss:$8 sm:$0xf] %vm8938_vm0, %v2245_v56  ;;  %v2269_v58 = vld [vmem:[%s2268_s4] ss:$8 sm:$0xf]  ;;  %s9271_s4 = sadd.s32 %s7543_s29, %s4322_s22 }
 0x20a   :  { %v2293_v59 = vld [vmem:[%s2292_s5] ss:$8 sm:$0xf]  ;;  %2270 = vst.msk [vmem:[#allocation4 + $0x2] ss:$8 sm:$0xf] %vm8938_vm0, %v2269_v58  ;;  %s9273_s5 = sadd.s32 %s7545_s2, %s4346_s19 }
 0x20b   :  { %2294 = vst.msk [vmem:[#allocation4 + $0x3] ss:$8 sm:$0xf] %vm8938_vm0, %v2293_v59  ;;  %v2317_v62 = vld [vmem:[%s2316_s7] ss:$8 sm:$0xf] }
 0x20c   :  { %v2341_v63 = vld [vmem:[%s2340_s9] ss:$8 sm:$0xf]  ;;  %2318 = vst.msk [vmem:[#allocation4 + $0x4] ss:$8 sm:$0xf] %vm8938_vm0, %v2317_v62 }
 0x20d   :  { %2342 = vst.msk [vmem:[#allocation4 + $0x5] ss:$8 sm:$0xf] %vm8938_vm0, %v2341_v63  ;;  %v2365_v0 = vld [vmem:[%s2364_s12] ss:$8 sm:$0xf] }
 0x20e   :  { %v2389_v1 = vld [vmem:[%s2388_s23] ss:$8 sm:$0xf]  ;;  %2366 = vst.msk [vmem:[#allocation4 + $0x6] ss:$8 sm:$0xf] %vm8938_vm0, %v2365_v0 }
 0x20f   :  { %2390 = vst.msk [vmem:[#allocation4 + $0x7] ss:$8 sm:$0xf] %vm8938_vm0, %v2389_v1  ;;  %v2210_v44 = vld [vmem:[%s2209_s18] ss:$8 sm:$0xf] }
 0x210   :  { %v2234_v45 = vld [vmem:[%s2233_s21] ss:$8 sm:$0xf]  ;;  %2211 = vst.msk [vmem:[#allocation3] ss:$8 sm:$0xf] %vm8938_vm0, %v2210_v44 }
 0x211   :  { %2235 = vst.msk [vmem:[#allocation3 + $0x1] ss:$8 sm:$0xf] %vm8938_vm0, %v2234_v45  ;;  %v2258_v2 = vld [vmem:[%s2257_s27] ss:$8 sm:$0xf] }
 0x212   :  { %v2282_v60 = vld [vmem:[%s2281_s17] ss:$8 sm:$0xf]  ;;  %2259 = vst.msk [vmem:[#allocation3 + $0x2] ss:$8 sm:$0xf] %vm8938_vm0, %v2258_v2 }
 0x213   :  { %2283 = vst.msk [vmem:[#allocation3 + $0x3] ss:$8 sm:$0xf] %vm8938_vm0, %v2282_v60  ;;  %v2306_v61 = vld [vmem:[%s2305_s20] ss:$8 sm:$0xf] }
 0x214   :  { %v2330_v3 = vld [vmem:[%s2329_s24] ss:$8 sm:$0xf]  ;;  %2307 = vst.msk [vmem:[#allocation3 + $0x4] ss:$8 sm:$0xf] %vm8938_vm0, %v2306_v61 }
 0x215   :  { %2331 = vst.msk [vmem:[#allocation3 + $0x5] ss:$8 sm:$0xf] %vm8938_vm0, %v2330_v3  ;;  %v2354_v4 = vld [vmem:[%s2353_s25] ss:$8 sm:$0xf] }
 0x216   :  { %v2378_v5 = vld [vmem:[%s2377_s26] ss:$8 sm:$0xf]  ;;  %2355 = vst.msk [vmem:[#allocation3 + $0x6] ss:$8 sm:$0xf] %vm8938_vm0, %v2354_v4 }
 0x217   :  { %2379 = vst.msk [vmem:[#allocation3 + $0x7] ss:$8 sm:$0xf] %vm8938_vm0, %v2378_v5  ;;  %v2401_v6 = vld [vmem:[#allocation4 + $0x8] sm:$0xff]  ;;  %v2403_v7 = vld [vmem:[#allocation4 + $0x18] sm:$0xff]  ;;  %v2400_v8 = vld [vmem:[#allocation4] sm:$0xff] }
 0x218   :  { %v2405_v10 = vpack.c.bf16 %v2401_v6, %v2401_v6  ;;  %v2407_v12 = vpack.c.bf16 %v2403_v7, %v2403_v7  ;;  %v9228_v15 = vpack.c.bf16 %v2400_v8, %v2400_v8  ;;  %v2402_v16 = vld [vmem:[#allocation4 + $0x10] sm:$0xff]  ;;  %v6415_v18 = vld [vmem:[#allocation2 + $0x38] sm:$0xff]  ;;  %s7237_s11 = sld [smem:[#allocation9 + $0x105]]  ;;  %s7547_s7 = sshll.u32 %s4367_s10, 5 }
 0x219   :  { %v9230_v17 = vpack.c.bf16 %v2402_v16, %v2402_v16  ;;  %6427 = vst [vmem:[#allocation14 + $0x18] sm:$0xff] %v6415_v18  ;;  %v8103_v55 = vld [vmem:[#allocation12 + $0x5cc] ss:$16 sps:$4 sm:$0xff]   ;;  %v8101_v58 = vld [vmem:[#allocation12 + $0x5c8] ss:$16 sps:$4 sm:$0xff]   ;;  %s9275_s9 = sld [smem:[#allocation9 + $0x106]]  ;;  %s9277_s23 = sadd.s32 %s7547_s7, %s4370_s6 }
 0x21a   :  { %3336 = vmatprep.mubr.bf16.mxu0 %v2405_v10  ;;  %3377 = vmatprep.mubr.bf16.mxu1 %v2407_v12  ;;  %v8106_v56 = vld [vmem:[#allocation12 + $0x7cc] ss:$16 sps:$4 sm:$0xff]   ;;  %v8104_v59 = vld [vmem:[#allocation12 + $0x7c8] ss:$16 sps:$4 sm:$0xff]   ;;  %s4391_s12 = sshra.s32 %s7225_s15, 3  ;;  %s4394_s18 = sand.u32 7, %s7225_s15 }
 0x21b   :  { %3337 = vmatmul.mubr.bf16.vlgmr.msra.gmra.mxu0 %v9228_v15  ;;  %3378 = vmatmul.mubr.bf16.vlgmr.msra.gmra.mxu1 %v9230_v17  ;;  %v8109_v62 = vld [vmem:[#allocation12 + $0x5ac] ss:$16 sps:$4 sm:$0xff]   ;;  %v8107_v0 = vld [vmem:[#allocation12 + $0x5a8] ss:$16 sps:$4 sm:$0xff]   ;;  %s4415_s21 = sshra.s32 %s7231_s13, 3  ;;  %s7549_s27 = sshll.u32 %s4391_s12, 5 }
 0x21c   :  { %3387 = vmatpush1.bf16.msra.mxu0 %v8047_v13  ;;  %3428 = vmatpush1.bf16.msra.mxu1 %v8050_v14  ;;  %v8112_v63 = vld [vmem:[#allocation12 + $0x7ac] ss:$16 sps:$4 sm:$0xff]   ;;  %v8110_v1 = vld [vmem:[#allocation12 + $0x7a8] ss:$16 sps:$4 sm:$0xff]   ;;  %s4418_s20 = sand.u32 7, %s7231_s13  ;;  %s9279_s24 = sld [smem:[#allocation9 + $0x107]] }
 0x21d   :  { %3418 = vmatprep.mubr.bf16.mxu0 %v2405_v10  ;;  %3459 = vmatprep.mubr.bf16.mxu1 %v2407_v12  ;;  %v8115_v44 = vld [vmem:[#allocation12 + $0x58c] ss:$16 sps:$4 sm:$0xff]   ;;  %v8113_v2 = vld [vmem:[#allocation12 + $0x588] ss:$16 sps:$4 sm:$0xff]   ;;  %s7551_s25 = sshll.u32 %s4415_s21, 5  ;;  %s9286_s14 = sadd.s32 %s7549_s27, %s4394_s18 }
 0x21e   :  { %3388 = vmatprep.subr.bf16.mxu0 %v8055_v52  ;;  %3429 = vmatprep.subr.bf16.mxu1 %v8058_v19  ;;  %v8118_v45 = vld [vmem:[#allocation12 + $0x78c] ss:$16 sps:$4 sm:$0xff]   ;;  %v8116_v60 = vld [vmem:[#allocation12 + $0x788] ss:$16 sps:$4 sm:$0xff]   ;;  %s4439_s17 = sshra.s32 %s7237_s11, 3  ;;  %s4442_s26 = sand.u32 7, %s7237_s11 }
 0x21f   :  { %v8121_v61 = vld [vmem:[#allocation12 + $0x56c] ss:$16 sps:$4 sm:$0xff]   ;;  %v8119_v4 = vld [vmem:[#allocation12 + $0x568] ss:$16 sps:$4 sm:$0xff]   ;;  %s7553_s0 = sshll.u32 %s4439_s17, 5  ;;  %s4463_s8 = sshra.s32 %s9275_s9, 3 }
 0x220   :  { %3389 = vmatpush1.bf16.msra.mxu0 %v8053_v20  ;;  %3430 = vmatpush1.bf16.msra.mxu1 %v8056_v22  ;;  %v8124_v3 = vld [vmem:[#allocation12 + $0x76c] ss:$16 sps:$4 sm:$0xff]   ;;  %v8122_v5 = vld [vmem:[#allocation12 + $0x768] ss:$16 sps:$4 sm:$0xff]   ;;  %v8145_v22 = vld [vmem:[#allocation12 + $0xe4] ss:$16 sps:$4 sm:$0xff]   ;;  %s9288_s1 = sadd.s32 %s7551_s25, %s4418_s20  ;;  %s9290_s30 = sadd.s32 %s7553_s0, %s4442_s26 }
 0x221   :  { %3390 = vmatprep.subr.bf16.mxu0 %v8061_v24  ;;  %3431 = vmatprep.subr.bf16.mxu1 %v8064_v26  ;;  %v8127_v6 = vld [vmem:[#allocation12 + $0x54c] ss:$16 sps:$4 sm:$0xff]   ;;  %v8125_v8 = vld [vmem:[#allocation12 + $0x548] ss:$16 sps:$4 sm:$0xff]   ;;  %v8148_v24 = vld [vmem:[#allocation12 + $0x2e4] ss:$16 sps:$4 sm:$0xff]  }
 0x222   :  { %v8130_v7 = vld [vmem:[#allocation12 + $0x74c] ss:$16 sps:$4 sm:$0xff]   ;;  %v8128_v10 = vld [vmem:[#allocation12 + $0x748] ss:$16 sps:$4 sm:$0xff]   ;;  %s4466_s15 = sand.u32 7, %s9275_s9  ;;  %s7555_s13 = sshll.u32 %s4463_s8, 5 }
 0x223   :  { %v8133_v12 = vld [vmem:[#allocation12 + $0x52c] ss:$16 sps:$4 sm:$0xff]   ;;  %v8131_v14 = vld [vmem:[#allocation12 + $0x528] ss:$16 sps:$4 sm:$0xff]   ;;  %s4487_s22 = sshra.s32 %s9279_s24, 3  ;;  %s9300_s29 = sadd.s32 %s7555_s13, %s4466_s15 }
 0x224   :  { %3391 = vmatpush1.bf16.msra.mxu0 %v8059_v28  ;;  %3432 = vmatpush1.bf16.msra.mxu1 %v8062_v29  ;;  %v8136_v13 = vld [vmem:[#allocation12 + $0x72c] ss:$16 sps:$4 sm:$0xff]   ;;  %v8134_v16 = vld [vmem:[#allocation12 + $0x728] ss:$16 sps:$4 sm:$0xff]   ;;  %v8143_v28 = vld [vmem:[#allocation12 + $0xe0] ss:$16 sps:$4 sm:$0xff]  }
 0x225   :  { %3392 = vmatprep.subr.bf16.mxu0 %v8067_v30  ;;  %3433 = vmatprep.subr.bf16.mxu1 %v8070_v48  ;;  %v8139_v18 = vld [vmem:[#allocation12 + $0x50c] ss:$16 sps:$4 sm:$0xff]   ;;  %v8137_v19 = vld [vmem:[#allocation12 + $0x508] ss:$16 sps:$4 sm:$0xff]   ;;  %v8146_v30 = vld [vmem:[#allocation12 + $0x2e0] ss:$16 sps:$4 sm:$0xff]  }
 0x226   :  { %v8142_v52 = vld [vmem:[#allocation12 + $0x70c] ss:$16 sps:$4 sm:$0xff]   ;;  %v8140_v20 = vld [vmem:[#allocation12 + $0x708] ss:$16 sps:$4 sm:$0xff]   ;;  %s9302_s19 = sld [smem:[#allocation5 + $0x102]]  ;;  %s4490_s2 = sand.u32 7, %s9279_s24 }
 0x227   :  { %v2393_v26 = vld [vmem:[#allocation3 + $0x8] sm:$0xff]  ;;  %v2395_v29 = vld [vmem:[#allocation3 + $0x18] sm:$0xff]  ;;  %s4308_s10 = sshra.s32 %s9281_s3, 3  ;;  %s7557_s11 = sshll.u32 %s4487_s22, 5 }
 0x228   :  { %3393 = vmatpush1.bf16.msra.mxu0 %v8065_v31  ;;  %3434 = vmatpush1.bf16.msra.mxu1 %v8068_v32  ;;  %v9234_v48 = vpack.c.bf16 %v2393_v26, %v2393_v26  ;;  %v8151_v31 = vld [vmem:[#allocation12 + $0xc4] ss:$16 sps:$4 sm:$0xff]   ;;  %s4332_s6 = sshra.s32 %s9284_s16, 3  ;;  %s4311_s7 = sand.u32 7, %s9281_s3 }
 0x229   :  { %3394 = vmatprep.subr.bf16.mxu0 %v8073_v33  ;;  %3435 = vmatprep.subr.bf16.mxu1 %v8076_v35  ;;  %v8154_v32 = vld [vmem:[#allocation12 + $0x2c4] ss:$16 sps:$4 sm:$0xff]   ;;  %v9238_v33 = vpack.c.bf16 %v2395_v29, %v2395_v29  ;;  %v8149_v35 = vld [vmem:[#allocation12 + $0xc0] ss:$16 sps:$4 sm:$0xff]   ;;  %s9308_s9 = sld [smem:[#allocation5 + $0x103]]  ;;  %s7542_s12 = sshll.u32 %s4308_s10, 5 }
 0x22a   :  { %v8232_v26 = vld [vmem:[#allocation12 + $0x324] ss:$16 sps:$4 sm:$0xff]   ;;  %v8230_v29 = vld [vmem:[#allocation12 + $0x320] ss:$16 sps:$4 sm:$0xff]   ;;  %s4335_s18 = sand.u32 7, %s9284_s16  ;;  %s7544_s21 = sshll.u32 %s4332_s6, 5 }
 0x22b   :  { %s9311_s27 = sld [smem:[#allocation5 + $0x104]]  ;;  %s9313_s17 = sadd.s32 %s7557_s11, %s4490_s2 }
 0x22c   :  { %3395 = vmatpush1.bf16.msra.mxu0 %v8071_v36  ;;  %3436 = vmatpush1.bf16.msra.mxu1 %v8074_v37  ;;  %v8152_v36 = vld [vmem:[#allocation12 + $0x2c0] ss:$16 sps:$4 sm:$0xff]   ;;  %v8157_v37 = vld [vmem:[#allocation12 + $0xa4] ss:$16 sps:$4 sm:$0xff]   ;;  %s9315_s20 = sld [smem:[#allocation5 + $0x105]]  ;;  %s9317_s24 = sadd.s32 %s7542_s12, %s4311_s7 }
 0x22d   :  { %3396 = vmatprep.subr.bf16.mxu0 %v8079_v38  ;;  %3437 = vmatprep.subr.bf16.mxu1 %v8082_v39  ;;  %v8160_v38 = vld [vmem:[#allocation12 + $0x2a4] ss:$16 sps:$4 sm:$0xff]   ;;  %v8155_v39 = vld [vmem:[#allocation12 + $0xa0] ss:$16 sps:$4 sm:$0xff]   ;;  %s9319_s25 = sld [smem:[#allocation5 + $0x106]]  ;;  %s9321_s26 = sadd.s32 %s7544_s21, %s4335_s18 }
 0x22e   :  { %9446 = sst [smem:[#allocation20_spill]] %s9321_s26  ;;  %s4356_s3 = sshra.s32 %s9302_s19, 3 }
 0x22f   :  { %s9323_s0 = sld [smem:[#allocation5 + $0x107]]  ;;  %s4380_s8 = sshra.s32 %s9308_s9, 3 }
 0x230   :  { %3397 = vmatpush1.bf16.msra.mxu0 %v8077_v21  ;;  %3438 = vmatpush1.bf16.msra.mxu1 %v8080_v25  ;;  %v8166_v21 = vld [vmem:[#allocation12 + $0x284] ss:$16 sps:$4 sm:$0xff]   ;;  %v8161_v25 = vld [vmem:[#allocation12 + $0x80] ss:$16 sps:$4 sm:$0xff]   ;;  %s4359_s16 = sand.u32 7, %s9302_s19  ;;  %s7546_s15 = sshll.u32 %s4356_s3, 5 }
 0x231   :  { %3398 = vmatprep.subr.bf16.mxu0 %v8085_v40  ;;  %3439 = vmatprep.subr.bf16.mxu1 %v8088_v41  ;;  %v8164_v40 = vld [vmem:[#allocation12 + $0x280] ss:$16 sps:$4 sm:$0xff]   ;;  %v8169_v41 = vld [vmem:[#allocation12 + $0x64] ss:$16 sps:$4 sm:$0xff]   ;;  %s4383_s13 = sand.u32 7, %s9308_s9  ;;  %s4404_s22 = sshra.s32 %s9311_s27, 3 }
 0x232   :  { %s7548_s2 = sshll.u32 %s4380_s8, 5  ;;  %s4428_s10 = sshra.s32 %s9315_s20, 3 }
 0x233   :  { %s4407_s11 = sand.u32 7, %s9311_s27  ;;  %s4452_s6 = sshra.s32 %s9319_s25, 3 }
 0x234   :  { %3399 = vmatpush1.bf16.msra.mxu0 %v8083_v42  ;;  %3440 = vmatpush1.bf16.msra.mxu1 %v8086_v43  ;;  %v8172_v42 = vld [vmem:[#allocation12 + $0x264] ss:$16 sps:$4 sm:$0xff]   ;;  %v8167_v43 = vld [vmem:[#allocation12 + $0x60] ss:$16 sps:$4 sm:$0xff]   ;;  %s7550_s7 = sshll.u32 %s4404_s22, 5  ;;  %s4431_s18 = sand.u32 7, %s9315_s20 }
 0x235   :  { %3400 = vmatprep.subr.bf16.mxu0 %v8091_v23  ;;  %3441 = vmatprep.subr.bf16.mxu1 %v8094_v46  ;;  %v8170_v23 = vld [vmem:[#allocation12 + $0x260] ss:$16 sps:$4 sm:$0xff]   ;;  %v8175_v46 = vld [vmem:[#allocation12 + $0x44] ss:$16 sps:$4 sm:$0xff]   ;;  %s4476_s12 = sshra.s32 %s9323_s0, 3  ;;  %s7552_s21 = sshll.u32 %s4428_s10, 5 }
 0x236   :  { %s7554_s26 = sshll.u32 %s4452_s6, 5  ;;  %s4479_s19 = sand.u32 7, %s9323_s0 }
 0x237   :  { %s7556_s9 = sshll.u32 %s4476_s12, 5  ;;  %s9337_s3 = sadd.s32 %s7546_s15, %s4359_s16 }
 0x238   :  { %3401 = vmatpush1.bf16.msra.mxu0 %v8089_v47  ;;  %3442 = vmatpush1.bf16.msra.mxu1 %v8092_v49  ;;  %v8178_v47 = vld [vmem:[#allocation12 + $0x244] ss:$16 sps:$4 sm:$0xff]   ;;  %v8173_v49 = vld [vmem:[#allocation12 + $0x40] ss:$16 sps:$4 sm:$0xff]   ;;  %s9339_s27 = sadd.s32 %s7548_s2, %s4383_s13  ;;  %s9341_s8 = sadd.s32 %s7550_s7, %s4407_s11 }
 0x239   :  { %3402 = vmatprep.subr.bf16.mxu0 %v8097_v27  ;;  %3443 = vmatprep.subr.bf16.mxu1 %v8100_v50  ;;  %v8176_v27 = vld [vmem:[#allocation12 + $0x240] ss:$16 sps:$4 sm:$0xff]   ;;  %v8181_v50 = vld [vmem:[#allocation12 + $0x24] ss:$16 sps:$4 sm:$0xff]   ;;  %s9343_s22 = sadd.s32 %s7552_s21, %s4431_s18  ;;  %s9347_s10 = sadd.s32 %s7556_s9, %s4479_s19 }
 0x23a   :  { %s4350_s0 = scalar_lea.vmem [#allocation2], %s9273_s5  ;;  %s4422_s5 = scalar_lea.vmem [#allocation2], %s9288_s1 }
 0x23b   :  { %s4446_s16 = scalar_lea.vmem [#allocation2], %s9290_s30  ;;  %s4315_s1 = scalar_lea.vmem [#allocation2], %s9317_s24 }
 0x23c   :  { %3403 = vmatpush2.bf16.msra.mxu0 %v8095_v53  ;;  %3444 = vmatpush2.bf16.msra.mxu1 %v8098_v54  ;;  %v8184_v53 = vld [vmem:[#allocation12 + $0x224] ss:$16 sps:$4 sm:$0xff]   ;;  %v8179_v54 = vld [vmem:[#allocation12 + $0x20] ss:$16 sps:$4 sm:$0xff]   ;;  %s4411_s24 = scalar_lea.vmem [#allocation2], %s9341_s8  ;;  %s4435_s15 = scalar_lea.vmem [#allocation2], %s9343_s22 }
 0x23d   :  { %3404 = vmatprep.subr.bf16.mxu0 %v8103_v55  ;;  %3445 = vmatprep.subr.bf16.mxu1 %v8106_v56  ;;  %v8182_v55 = vld [vmem:[#allocation12 + $0x220] ss:$16 sps:$4 sm:$0xff]   ;;  %v8187_v56 = vld [vmem:[#allocation12 + $0x4] ss:$16 sps:$4 sm:$0xff]   ;;  %s4483_s2 = scalar_lea.vmem [#allocation2], %s9347_s10  ;;  %s9448_s7 = sld [smem:[#allocation21_spill]] }
 0x23e   :  { %s8835_s12 = smov [#allocation14]  }
 0x23f   :  { %s6441_s18 = sshll.u32 %s8835_s12, 4  ;;  %s6442_s18 = int_to_ptr.vmem [resolvable:$true] %s6441_s18 }
 0x240   :  { %3405 = vmatpush2.bf16.msra.mxu0 %v8101_v58  ;;  %3446 = vmatpush2.bf16.msra.mxu1 %v8104_v59  ;;  %v8190_v58 = vld [vmem:[#allocation12 + $0x204] ss:$16 sps:$4 sm:$0xff]   ;;  %v8185_v59 = vld [vmem:[#allocation12] ss:$16 sps:$4 sm:$0xff]   ;;  %s8799_s21 = scalar_lea.vmem %s6442_s18, 1536  ;;  %p8804_p11 = scmp.lt.s32.totalorder %s6442_s18, %s6442_s18 }
 0x241   :  { %3406 = vmatprep.subr.bf16.mxu0 %v8109_v62  ;;  %3447 = vmatprep.subr.bf16.mxu1 %v8112_v63  ;;  %v8188_v62 = vld [vmem:[#allocation12 + $0x200] ss:$16 sps:$4 sm:$0xff]   ;;  %v8193_v63 = vld [vmem:[#allocation12 + $0x1e4] ss:$16 sps:$4 sm:$0xff]   ;;  %p8800_p10 = scmp.ne.s32.totalorder %s6442_s18, %s8799_s21  ;;  %p8805_p12 = scmp.lt.s32.totalorder %s8799_s21, %s8799_s21 }
 0x243   :  { %p8806_p13 = por %p8805_p12, %p8804_p11 }
 0x244   :  { %3407 = vmatpush2.bf16.msra.mxu0 %v8107_v0  ;;  %3448 = vmatpush2.bf16.msra.mxu1 %v8110_v1  ;;  %v8196_v0 = vld [vmem:[#allocation12 + $0x3e4] ss:$16 sps:$4 sm:$0xff]   ;;  %v8191_v1 = vld [vmem:[#allocation12 + $0x1e0] ss:$16 sps:$4 sm:$0xff]  }
 0x245   :  { %3408 = vmatprep.subr.bf16.mxu0 %v8115_v44  ;;  %3449 = vmatprep.subr.bf16.mxu1 %v8118_v45  ;;  %v8194_v44 = vld [vmem:[#allocation12 + $0x3e0] ss:$16 sps:$4 sm:$0xff]   ;;  %v8199_v45 = vld [vmem:[#allocation12 + $0x1c4] ss:$16 sps:$4 sm:$0xff]   ;;  %p8807_p0 = pnand %p8806_p13, %p8800_p10 }
 0x248   :  { %3409 = vmatpush2.bf16.msra.mxu0 %v8113_v2  ;;  %3450 = vmatpush2.bf16.msra.mxu1 %v8116_v60  ;;  %v8202_v2 = vld [vmem:[#allocation12 + $0x3c4] ss:$16 sps:$4 sm:$0xff]   ;;  %v8197_v60 = vld [vmem:[#allocation12 + $0x1c0] ss:$16 sps:$4 sm:$0xff]  }
 0x249   :  { %3410 = vmatprep.subr.bf16.mxu0 %v8121_v61  ;;  %3451 = vmatprep.subr.bf16.mxu1 %v8124_v3  ;;  %v8200_v61 = vld [vmem:[#allocation12 + $0x3c0] ss:$16 sps:$4 sm:$0xff]   ;;  %v8205_v3 = vld [vmem:[#allocation12 + $0x1a4] ss:$16 sps:$4 sm:$0xff]  }
 0x24c   :  { %3411 = vmatpush2.bf16.msra.mxu0 %v8119_v4  ;;  %3452 = vmatpush2.bf16.msra.mxu1 %v8122_v5  ;;  %v8208_v4 = vld [vmem:[#allocation12 + $0x3a4] ss:$16 sps:$4 sm:$0xff]   ;;  %v8203_v5 = vld [vmem:[#allocation12 + $0x1a0] ss:$16 sps:$4 sm:$0xff]  }
 0x24d   :  { %3412 = vmatprep.subr.bf16.mxu0 %v8127_v6  ;;  %3453 = vmatprep.subr.bf16.mxu1 %v8130_v7  ;;  %v8206_v6 = vld [vmem:[#allocation12 + $0x3a0] ss:$16 sps:$4 sm:$0xff]   ;;  %v8211_v7 = vld [vmem:[#allocation12 + $0x184] ss:$16 sps:$4 sm:$0xff]  }
 0x250   :  { %3413 = vmatpush2.bf16.msra.mxu0 %v8125_v8  ;;  %3454 = vmatpush2.bf16.msra.mxu1 %v8128_v10  ;;  %v8214_v8 = vld [vmem:[#allocation12 + $0x384] ss:$16 sps:$4 sm:$0xff]   ;;  %v8209_v10 = vld [vmem:[#allocation12 + $0x180] ss:$16 sps:$4 sm:$0xff]  }
 0x251   :  { %3414 = vmatprep.subr.bf16.mxu0 %v8133_v12  ;;  %3455 = vmatprep.subr.bf16.mxu1 %v8136_v13  ;;  %v8212_v12 = vld [vmem:[#allocation12 + $0x380] ss:$16 sps:$4 sm:$0xff]   ;;  %v8217_v13 = vld [vmem:[#allocation12 + $0x164] ss:$16 sps:$4 sm:$0xff]  }
 0x254   :  { %3415 = vmatpush2.bf16.msra.mxu0 %v8131_v14  ;;  %3456 = vmatpush2.bf16.msra.mxu1 %v8134_v16  ;;  %v8220_v14 = vld [vmem:[#allocation12 + $0x364] ss:$16 sps:$4 sm:$0xff]   ;;  %v8215_v16 = vld [vmem:[#allocation12 + $0x160] ss:$16 sps:$4 sm:$0xff]  }
 0x255   :  { %3416 = vmatprep.subr.bf16.mxu0 %v8139_v18  ;;  %3457 = vmatprep.subr.bf16.mxu1 %v8142_v52  ;;  %v8218_v18 = vld [vmem:[#allocation12 + $0x360] ss:$16 sps:$4 sm:$0xff]   ;;  %v8223_v52 = vld [vmem:[#allocation12 + $0x144] ss:$16 sps:$4 sm:$0xff]  }
 0x258   :  { %3417 = vmatpush2.bf16.msra.mxu0 %v8137_v19  ;;  %3458 = vmatpush2.bf16.msra.mxu1 %v8140_v20  ;;  %v8226_v19 = vld [vmem:[#allocation12 + $0x344] ss:$16 sps:$4 sm:$0xff]   ;;  %v8221_v20 = vld [vmem:[#allocation12 + $0x140] ss:$16 sps:$4 sm:$0xff]  }
 0x259   :  { %4108 = vmatprep.subr.bf16.mxu0 %v8145_v22  ;;  %4149 = vmatprep.subr.bf16.mxu1 %v8148_v24  ;;  %v8224_v22 = vld [vmem:[#allocation12 + $0x340] ss:$16 sps:$4 sm:$0xff]   ;;  %v8229_v24 = vld [vmem:[#allocation12 + $0x124] ss:$16 sps:$4 sm:$0xff]  }
 0x25b   :  { %3419 = vmatmul.mubr.bf16.vlgmr.msra.gmra.mxu0 %v9228_v15  ;;  %3460 = vmatmul.mubr.bf16.vlgmr.msra.gmra.mxu1 %v9230_v17  ;;  %v8158_v15 = vld [vmem:[#allocation12 + $0x2a0] ss:$16 sps:$4 sm:$0xff]   ;;  %v8163_v17 = vld [vmem:[#allocation12 + $0x84] ss:$16 sps:$4 sm:$0xff]  }
 0x25c   :  { %4109 = vmatpush1.bf16.msra.mxu0 %v8143_v28  ;;  %4140 = vmatprep.mubr.bf16.mxu0 %v9234_v48  ;;  %v8227_v28 = vld [vmem:[#allocation12 + $0x120] ss:$16 sps:$4 sm:$0xff]  }
 0x25d   :  { %4150 = vmatpush1.bf16.msra.mxu1 %v8146_v30  ;;  %4181 = vmatprep.mubr.bf16.mxu1 %v9238_v33  ;;  %v8235_v30 = vld [vmem:[#allocation12 + $0x104] ss:$16 sps:$4 sm:$0xff]  }
 0x25e   :  { %4110 = vmatprep.subr.bf16.mxu0 %v8151_v31  ;;  %4151 = vmatprep.subr.bf16.mxu1 %v8154_v32  ;;  %v8238_v31 = vld [vmem:[#allocation12 + $0x304] ss:$16 sps:$4 sm:$0xff]   ;;  %v8233_v32 = vld [vmem:[#allocation12 + $0x100] ss:$16 sps:$4 sm:$0xff]  }
 0x260   :  { %4111 = vmatpush1.bf16.msra.mxu0 %v8149_v35  ;;  %v8236_v35 = vld [vmem:[#allocation12 + $0x300] ss:$16 sps:$4 sm:$0xff]  }
 0x261   :  { %4152 = vmatpush1.bf16.msra.mxu1 %v8152_v36  ;;  %4112 = vmatprep.subr.bf16.mxu0 %v8157_v37  ;;  %v8241_v36 = vld [vmem:[#allocation12 + $0xec] ss:$16 sps:$4 sm:$0xff]   ;;  %v2392_v37 = vld [vmem:[#allocation3] sm:$0xff] }
 0x262   :  { %4153 = vmatprep.subr.bf16.mxu1 %v8160_v38  ;;  %v8244_v38 = vld [vmem:[#allocation12 + $0x2ec] ss:$16 sps:$4 sm:$0xff]  }
 0x264   :  { %4113 = vmatpush1.bf16.msra.mxu0 %v8155_v39  ;;  %v2394_v39 = vld [vmem:[#allocation3 + $0x10] sm:$0xff] }
 0x265   :  { %4154 = vmatpush1.bf16.msra.mxu1 %v8158_v15  ;;  %4114 = vmatprep.subr.bf16.mxu0 %v8163_v17  ;;  %v8239_v15 = vld [vmem:[#allocation12 + $0xe8] ss:$16 sps:$4 sm:$0xff]   ;;  %v9242_v17 = vpack.c.bf16 %v2392_v37, %v2392_v37  ;;  %v8325_v37 = vld [vmem:[#allocation12 + $0x12c] ss:$16 sps:$4 sm:$0xff]  }
 0x266   :  { %4155 = vmatprep.subr.bf16.mxu1 %v8166_v21  ;;  %v8242_v21 = vld [vmem:[#allocation12 + $0x2e8] ss:$16 sps:$4 sm:$0xff]  }
 0x268   :  { %4115 = vmatpush1.bf16.msra.mxu0 %v8161_v25  ;;  %v9244_v25 = vpack.c.bf16 %v2394_v39, %v2394_v39  ;;  %v8323_v39 = vld [vmem:[#allocation12 + $0x128] ss:$16 sps:$4 sm:$0xff]  }
 0x269   :  { %4156 = vmatpush1.bf16.msra.mxu1 %v8164_v40  ;;  %4116 = vmatprep.subr.bf16.mxu0 %v8169_v41  ;;  %v8247_v40 = vld [vmem:[#allocation12 + $0xcc] ss:$16 sps:$4 sm:$0xff]  }
 0x26a   :  { %4157 = vmatprep.subr.bf16.mxu1 %v8172_v42  ;;  %v8250_v41 = vld [vmem:[#allocation12 + $0x2cc] ss:$16 sps:$4 sm:$0xff]   ;;  %v8245_v42 = vld [vmem:[#allocation12 + $0xc8] ss:$16 sps:$4 sm:$0xff]  }
 0x26c   :  { %4117 = vmatpush1.bf16.msra.mxu0 %v8167_v43  ;;  %v8248_v43 = vld [vmem:[#allocation12 + $0x2c8] ss:$16 sps:$4 sm:$0xff]  }
 0x26d   :  { %4158 = vmatpush1.bf16.msra.mxu1 %v8170_v23  ;;  %4118 = vmatprep.subr.bf16.mxu0 %v8175_v46  ;;  %v8253_v23 = vld [vmem:[#allocation12 + $0xac] ss:$16 sps:$4 sm:$0xff]  }
 0x26e   :  { %4159 = vmatprep.subr.bf16.mxu1 %v8178_v47  ;;  %v8256_v46 = vld [vmem:[#allocation12 + $0x2ac] ss:$16 sps:$4 sm:$0xff]   ;;  %v8251_v47 = vld [vmem:[#allocation12 + $0xa8] ss:$16 sps:$4 sm:$0xff]  }
 0x270   :  { %4119 = vmatpush1.bf16.msra.mxu0 %v8173_v49  ;;  %v8254_v49 = vld [vmem:[#allocation12 + $0x2a8] ss:$16 sps:$4 sm:$0xff]  }
 0x271   :  { %4160 = vmatpush1.bf16.msra.mxu1 %v8176_v27  ;;  %4120 = vmatprep.subr.bf16.mxu0 %v8181_v50  ;;  %v8259_v27 = vld [vmem:[#allocation12 + $0x8c] ss:$16 sps:$4 sm:$0xff]  }
 0x272   :  { %4161 = vmatprep.subr.bf16.mxu1 %v8184_v53  ;;  %v8262_v50 = vld [vmem:[#allocation12 + $0x28c] ss:$16 sps:$4 sm:$0xff]   ;;  %v8257_v53 = vld [vmem:[#allocation12 + $0x88] ss:$16 sps:$4 sm:$0xff]  }
 0x274   :  { %4121 = vmatpush1.bf16.msra.mxu0 %v8179_v54  ;;  %v8265_v54 = vld [vmem:[#allocation12 + $0x6c] ss:$16 sps:$4 sm:$0xff]  }
 0x275   :  { %4162 = vmatpush1.bf16.msra.mxu1 %v8182_v55  ;;  %4122 = vmatprep.subr.bf16.mxu0 %v8187_v56  ;;  %v8268_v55 = vld [vmem:[#allocation12 + $0x26c] ss:$16 sps:$4 sm:$0xff]   ;;  %v8266_v56 = vld [vmem:[#allocation12 + $0x268] ss:$16 sps:$4 sm:$0xff]  }
 0x276   :  { %4163 = vmatprep.subr.bf16.mxu1 %v8190_v58  ;;  %v8271_v58 = vld [vmem:[#allocation12 + $0x4c] ss:$16 sps:$4 sm:$0xff]  }
 0x278   :  { %4123 = vmatpush1.bf16.msra.mxu0 %v8185_v59  ;;  %v8274_v59 = vld [vmem:[#allocation12 + $0x24c] ss:$16 sps:$4 sm:$0xff]  }
 0x279   :  { %4164 = vmatpush1.bf16.msra.mxu1 %v8188_v62  ;;  %4124 = vmatprep.subr.bf16.mxu0 %v8193_v63  ;;  %v8269_v62 = vld [vmem:[#allocation12 + $0x48] ss:$16 sps:$4 sm:$0xff]  }
 0x27a   :  { %4165 = vmatprep.subr.bf16.mxu1 %v8196_v0  ;;  %v8272_v63 = vld [vmem:[#allocation12 + $0x248] ss:$16 sps:$4 sm:$0xff]   ;;  %v8277_v0 = vld [vmem:[#allocation12 + $0x2c] ss:$16 sps:$4 sm:$0xff]  }
 0x27c   :  { %4125 = vmatpush2.bf16.msra.mxu0 %v8191_v1  ;;  %v8280_v1 = vld [vmem:[#allocation12 + $0x22c] ss:$16 sps:$4 sm:$0xff]  }
 0x27d   :  { %4166 = vmatpush2.bf16.msra.mxu1 %v8194_v44  ;;  %4126 = vmatprep.subr.bf16.mxu0 %v8199_v45  ;;  %v8275_v44 = vld [vmem:[#allocation12 + $0x28] ss:$16 sps:$4 sm:$0xff]  }
 0x27e   :  { %4167 = vmatprep.subr.bf16.mxu1 %v8202_v2  ;;  %v8278_v45 = vld [vmem:[#allocation12 + $0x228] ss:$16 sps:$4 sm:$0xff]   ;;  %v8283_v2 = vld [vmem:[#allocation12 + $0xc] ss:$16 sps:$4 sm:$0xff]  }
 0x280   :  { %4127 = vmatpush2.bf16.msra.mxu0 %v8197_v60  ;;  %v8286_v60 = vld [vmem:[#allocation12 + $0x20c] ss:$16 sps:$4 sm:$0xff]  }
 0x281   :  { %4168 = vmatpush2.bf16.msra.mxu1 %v8200_v61  ;;  %4128 = vmatprep.subr.bf16.mxu0 %v8205_v3  ;;  %v8281_v61 = vld [vmem:[#allocation12 + $0x8] ss:$16 sps:$4 sm:$0xff]  }
 0x282   :  { %4169 = vmatprep.subr.bf16.mxu1 %v8208_v4  ;;  %v8284_v3 = vld [vmem:[#allocation12 + $0x208] ss:$16 sps:$4 sm:$0xff]   ;;  %v8289_v4 = vld [vmem:[#allocation12 + $0x1ec] ss:$16 sps:$4 sm:$0xff]  }
 0x284   :  { %4129 = vmatpush2.bf16.msra.mxu0 %v8203_v5  ;;  %v8292_v5 = vld [vmem:[#allocation12 + $0x3ec] ss:$16 sps:$4 sm:$0xff]  }
 0x285   :  { %4170 = vmatpush2.bf16.msra.mxu1 %v8206_v6  ;;  %4130 = vmatprep.subr.bf16.mxu0 %v8211_v7  ;;  %v8287_v6 = vld [vmem:[#allocation12 + $0x1e8] ss:$16 sps:$4 sm:$0xff]  }
 0x286   :  { %4171 = vmatprep.subr.bf16.mxu1 %v8214_v8  ;;  %v8290_v7 = vld [vmem:[#allocation12 + $0x3e8] ss:$16 sps:$4 sm:$0xff]   ;;  %v8295_v8 = vld [vmem:[#allocation12 + $0x1cc] ss:$16 sps:$4 sm:$0xff]  }
 0x288   :  { %4131 = vmatpush2.bf16.msra.mxu0 %v8209_v10  ;;  %v8298_v10 = vld [vmem:[#allocation12 + $0x3cc] ss:$16 sps:$4 sm:$0xff]  }
 0x289   :  { %4172 = vmatpush2.bf16.msra.mxu1 %v8212_v12  ;;  %4132 = vmatprep.subr.bf16.mxu0 %v8217_v13  ;;  %v8293_v12 = vld [vmem:[#allocation12 + $0x1c8] ss:$16 sps:$4 sm:$0xff]  }
 0x28a   :  { %4173 = vmatprep.subr.bf16.mxu1 %v8220_v14  ;;  %v8296_v13 = vld [vmem:[#allocation12 + $0x3c8] ss:$16 sps:$4 sm:$0xff]   ;;  %v8301_v14 = vld [vmem:[#allocation12 + $0x1ac] ss:$16 sps:$4 sm:$0xff]  }
 0x28c   :  { %4133 = vmatpush2.bf16.msra.mxu0 %v8215_v16  ;;  %v8304_v16 = vld [vmem:[#allocation12 + $0x3ac] ss:$16 sps:$4 sm:$0xff]  }
 0x28d   :  { %4174 = vmatpush2.bf16.msra.mxu1 %v8218_v18  ;;  %4134 = vmatprep.subr.bf16.mxu0 %v8223_v52  ;;  %v8299_v18 = vld [vmem:[#allocation12 + $0x1a8] ss:$16 sps:$4 sm:$0xff]  }
 0x28e   :  { %4175 = vmatprep.subr.bf16.mxu1 %v8226_v19  ;;  %v8302_v52 = vld [vmem:[#allocation12 + $0x3a8] ss:$16 sps:$4 sm:$0xff]   ;;  %v8307_v19 = vld [vmem:[#allocation12 + $0x18c] ss:$16 sps:$4 sm:$0xff]  }
 0x290   :  { %4135 = vmatpush2.bf16.msra.mxu0 %v8221_v20  ;;  %v8310_v20 = vld [vmem:[#allocation12 + $0x38c] ss:$16 sps:$4 sm:$0xff]  }
 0x291   :  { %4176 = vmatpush2.bf16.msra.mxu1 %v8224_v22  ;;  %4136 = vmatprep.subr.bf16.mxu0 %v8229_v24  ;;  %v8305_v22 = vld [vmem:[#allocation12 + $0x188] ss:$16 sps:$4 sm:$0xff]  }
 0x292   :  { %4177 = vmatprep.subr.bf16.mxu1 %v8232_v26  ;;  %v8308_v24 = vld [vmem:[#allocation12 + $0x388] ss:$16 sps:$4 sm:$0xff]   ;;  %v8313_v26 = vld [vmem:[#allocation12 + $0x16c] ss:$16 sps:$4 sm:$0xff]  }
 0x294   :  { %4137 = vmatpush2.bf16.msra.mxu0 %v8227_v28  ;;  %v8316_v28 = vld [vmem:[#allocation12 + $0x36c] ss:$16 sps:$4 sm:$0xff]  }
 0x295   :  { %4178 = vmatpush2.bf16.msra.mxu1 %v8230_v29  ;;  %4138 = vmatprep.subr.bf16.mxu0 %v8235_v30  ;;  %v8311_v29 = vld [vmem:[#allocation12 + $0x168] ss:$16 sps:$4 sm:$0xff]  }
 0x296   :  { %4179 = vmatprep.subr.bf16.mxu1 %v8238_v31  ;;  %v8314_v30 = vld [vmem:[#allocation12 + $0x368] ss:$16 sps:$4 sm:$0xff]   ;;  %v8319_v31 = vld [vmem:[#allocation12 + $0x14c] ss:$16 sps:$4 sm:$0xff]  }
 0x298   :  { %4139 = vmatpush2.bf16.msra.mxu0 %v8233_v32  ;;  %v8322_v32 = vld [vmem:[#allocation12 + $0x34c] ss:$16 sps:$4 sm:$0xff]  }
 0x299   :  { %4180 = vmatpush2.bf16.msra.mxu1 %v8236_v35  ;;  %4190 = vmatprep.subr.bf16.mxu0 %v8241_v36  ;;  %v8317_v35 = vld [vmem:[#allocation12 + $0x148] ss:$16 sps:$4 sm:$0xff]  }
 0x29a   :  { %4231 = vmatprep.subr.bf16.mxu1 %v8244_v38  ;;  %v8320_v36 = vld [vmem:[#allocation12 + $0x348] ss:$16 sps:$4 sm:$0xff]   ;;  %v8328_v38 = vld [vmem:[#allocation12 + $0x32c] ss:$16 sps:$4 sm:$0xff]  }
 0x29b   :  { %4141 = vmatmul.mubr.bf16.vlgmr.msra.gmra.mxu0 %v9242_v17 }
 0x29c   :  { %4182 = vmatmul.mubr.bf16.vlgmr.msra.gmra.mxu1 %v9244_v25  ;;  %4191 = vmatpush1.bf16.msra.mxu0 %v8239_v15  ;;  %v8326_v15 = vld [vmem:[#allocation12 + $0x328] ss:$16 sps:$4 sm:$0xff]  }
 0x29d   :  { %4222 = vmatprep.mubr.bf16.mxu0 %v9234_v48  ;;  %4232 = vmatpush1.bf16.msra.mxu1 %v8242_v21  ;;  %v8260_v48 = vld [vmem:[#allocation12 + $0x288] ss:$16 sps:$4 sm:$0xff]   ;;  %v8331_v21 = vld [vmem:[#allocation12 + $0x10c] ss:$16 sps:$4 sm:$0xff]  }
 0x29e   :  { %4263 = vmatprep.mubr.bf16.mxu1 %v9238_v33  ;;  %4192 = vmatprep.subr.bf16.mxu0 %v8247_v40  ;;  %v8263_v33 = vld [vmem:[#allocation12 + $0x68] ss:$16 sps:$4 sm:$0xff]   ;;  %v8334_v40 = vld [vmem:[#allocation12 + $0x30c] ss:$16 sps:$4 sm:$0xff]  }
 0x29f   :  { %4233 = vmatprep.subr.bf16.mxu1 %v8250_v41  ;;  %v8329_v41 = vld [vmem:[#allocation12 + $0x108] ss:$16 sps:$4 sm:$0xff]  }
 0x2a0   :  { %4193 = vmatpush1.bf16.msra.mxu0 %v8245_v42  ;;  %v8332_v42 = vld [vmem:[#allocation12 + $0x308] ss:$16 sps:$4 sm:$0xff]  }
 0x2a1   :  { %4234 = vmatpush1.bf16.msra.mxu1 %v8248_v43  ;;  %4194 = vmatprep.subr.bf16.mxu0 %v8253_v23 }
 0x2a2   :  { %4235 = vmatprep.subr.bf16.mxu1 %v8256_v46 }
 0x2a4   :  { %4195 = vmatpush1.bf16.msra.mxu0 %v8251_v47 }
 0x2a5   :  { %4236 = vmatpush1.bf16.msra.mxu1 %v8254_v49  ;;  %4196 = vmatprep.subr.bf16.mxu0 %v8259_v27 }
 0x2a6   :  { %4237 = vmatprep.subr.bf16.mxu1 %v8262_v50 }
 0x2a8   :  { %4197 = vmatpush1.bf16.msra.mxu0 %v8257_v53 }
 0x2a9   :  { %4238 = vmatpush1.bf16.msra.mxu1 %v8260_v48  ;;  %4198 = vmatprep.subr.bf16.mxu0 %v8265_v54 }
 0x2aa   :  { %4239 = vmatprep.subr.bf16.mxu1 %v8268_v55  ;;  %v8335_v55 = vld [vmem:[#allocation12 + $0x4e0] ss:$16 sps:$4 sm:$0xff]  }
 0x2ac   :  { %4199 = vmatpush1.bf16.msra.mxu0 %v8263_v33  ;;  %v8337_v33 = vld [vmem:[#allocation12 + $0x4e4] ss:$16 sps:$4 sm:$0xff]  }
 0x2ad   :  { %4240 = vmatpush1.bf16.msra.mxu1 %v8266_v56  ;;  %4200 = vmatprep.subr.bf16.mxu0 %v8271_v58  ;;  %v8338_v56 = vld [vmem:[#allocation12 + $0x6e0] ss:$16 sps:$4 sm:$0xff]   ;;  %v8340_v58 = vld [vmem:[#allocation12 + $0x6e4] ss:$16 sps:$4 sm:$0xff]  }
 0x2ae   :  { %4241 = vmatprep.subr.bf16.mxu1 %v8274_v59  ;;  %v8343_v59 = vld [vmem:[#allocation12 + $0x4c4] ss:$16 sps:$4 sm:$0xff]  }
 0x2b0   :  { %4201 = vmatpush1.bf16.msra.mxu0 %v8269_v62  ;;  %v8344_v62 = vld [vmem:[#allocation12 + $0x6c0] ss:$16 sps:$4 sm:$0xff]  }
 0x2b1   :  { %4242 = vmatpush1.bf16.msra.mxu1 %v8272_v63  ;;  %4202 = vmatprep.subr.bf16.mxu0 %v8277_v0  ;;  %v8349_v63 = vld [vmem:[#allocation12 + $0x4a4] ss:$16 sps:$4 sm:$0xff]  }
 0x2b2   :  { %4243 = vmatprep.subr.bf16.mxu1 %v8280_v1  ;;  %v8352_v0 = vld [vmem:[#allocation12 + $0x6a4] ss:$16 sps:$4 sm:$0xff]   ;;  %v8347_v1 = vld [vmem:[#allocation12 + $0x4a0] ss:$16 sps:$4 sm:$0xff]  }
 0x2b4   :  { %4203 = vmatpush1.bf16.msra.mxu0 %v8275_v44  ;;  %v8350_v44 = vld [vmem:[#allocation12 + $0x6a0] ss:$16 sps:$4 sm:$0xff]  }
 0x2b5   :  { %4244 = vmatpush1.bf16.msra.mxu1 %v8278_v45  ;;  %4204 = vmatprep.subr.bf16.mxu0 %v8283_v2  ;;  %v8355_v45 = vld [vmem:[#allocation12 + $0x484] ss:$16 sps:$4 sm:$0xff]  }
 0x2b6   :  { %4245 = vmatprep.subr.bf16.mxu1 %v8286_v60  ;;  %v8358_v2 = vld [vmem:[#allocation12 + $0x684] ss:$16 sps:$4 sm:$0xff]   ;;  %v8353_v60 = vld [vmem:[#allocation12 + $0x480] ss:$16 sps:$4 sm:$0xff]  }
 0x2b8   :  { %4205 = vmatpush1.bf16.msra.mxu0 %v8281_v61  ;;  %v8356_v61 = vld [vmem:[#allocation12 + $0x680] ss:$16 sps:$4 sm:$0xff]  }
 0x2b9   :  { %4246 = vmatpush1.bf16.msra.mxu1 %v8284_v3  ;;  %4206 = vmatprep.subr.bf16.mxu0 %v8289_v4  ;;  %v8361_v3 = vld [vmem:[#allocation12 + $0x464] ss:$16 sps:$4 sm:$0xff]  }
 0x2ba   :  { %4247 = vmatprep.subr.bf16.mxu1 %v8292_v5  ;;  %v8364_v4 = vld [vmem:[#allocation12 + $0x664] ss:$16 sps:$4 sm:$0xff]   ;;  %v8359_v5 = vld [vmem:[#allocation12 + $0x460] ss:$16 sps:$4 sm:$0xff]  }
 0x2bc   :  { %4207 = vmatpush2.bf16.msra.mxu0 %v8287_v6  ;;  %v8362_v6 = vld [vmem:[#allocation12 + $0x660] ss:$16 sps:$4 sm:$0xff]  }
 0x2bd   :  { %4248 = vmatpush2.bf16.msra.mxu1 %v8290_v7  ;;  %4208 = vmatprep.subr.bf16.mxu0 %v8295_v8  ;;  %v8367_v7 = vld [vmem:[#allocation12 + $0x444] ss:$16 sps:$4 sm:$0xff]  }
 0x2be   :  { %4249 = vmatprep.subr.bf16.mxu1 %v8298_v10  ;;  %v8370_v8 = vld [vmem:[#allocation12 + $0x644] ss:$16 sps:$4 sm:$0xff]   ;;  %v8365_v10 = vld [vmem:[#allocation12 + $0x440] ss:$16 sps:$4 sm:$0xff]  }
 0x2c0   :  { %4209 = vmatpush2.bf16.msra.mxu0 %v8293_v12  ;;  %v8368_v12 = vld [vmem:[#allocation12 + $0x640] ss:$16 sps:$4 sm:$0xff]  }
 0x2c1   :  { %4250 = vmatpush2.bf16.msra.mxu1 %v8296_v13  ;;  %4210 = vmatprep.subr.bf16.mxu0 %v8301_v14 }
 0x2c2   :  { %4251 = vmatprep.subr.bf16.mxu1 %v8304_v16 }
 0x2c4   :  { %4211 = vmatpush2.bf16.msra.mxu0 %v8299_v18 }
 0x2c5   :  { %4252 = vmatpush2.bf16.msra.mxu1 %v8302_v52  ;;  %4212 = vmatprep.subr.bf16.mxu0 %v8307_v19 }
 0x2c6   :  { %4253 = vmatprep.subr.bf16.mxu1 %v8310_v20  ;;  %v8373_v20 = vld [vmem:[#allocation12 + $0x424] ss:$16 sps:$4 sm:$0xff]  }
 0x2c8   :  { %4213 = vmatpush2.bf16.msra.mxu0 %v8305_v22  ;;  %v8376_v22 = vld [vmem:[#allocation12 + $0x624] ss:$16 sps:$4 sm:$0xff]  }
 0x2c9   :  { %4254 = vmatpush2.bf16.msra.mxu1 %v8308_v24  ;;  %4214 = vmatprep.subr.bf16.mxu0 %v8313_v26 }
 0x2ca   :  { %4255 = vmatprep.subr.bf16.mxu1 %v8316_v28  ;;  %v8371_v28 = vld [vmem:[#allocation12 + $0x420] ss:$16 sps:$4 sm:$0xff]  }
 0x2cc   :  { %4215 = vmatpush2.bf16.msra.mxu0 %v8311_v29  ;;  %v8374_v29 = vld [vmem:[#allocation12 + $0x620] ss:$16 sps:$4 sm:$0xff]  }
 0x2cd   :  { %4256 = vmatpush2.bf16.msra.mxu1 %v8314_v30  ;;  %4216 = vmatprep.subr.bf16.mxu0 %v8319_v31 }
 0x2ce   :  { %4257 = vmatprep.subr.bf16.mxu1 %v8322_v32  ;;  %v8379_v32 = vld [vmem:[#allocation12 + $0x404] ss:$16 sps:$4 sm:$0xff]  }
 0x2d0   :  { %4217 = vmatpush2.bf16.msra.mxu0 %v8317_v35  ;;  %v8382_v35 = vld [vmem:[#allocation12 + $0x604] ss:$16 sps:$4 sm:$0xff]  }
 0x2d1   :  { %4258 = vmatpush2.bf16.msra.mxu1 %v8320_v36  ;;  %4218 = vmatprep.subr.bf16.mxu0 %v8325_v37  ;;  %v8377_v36 = vld [vmem:[#allocation12 + $0x400] ss:$16 sps:$4 sm:$0xff]  }
 0x2d2   :  { %4259 = vmatprep.subr.bf16.mxu1 %v8328_v38  ;;  %v8380_v37 = vld [vmem:[#allocation12 + $0x600] ss:$16 sps:$4 sm:$0xff]   ;;  %v8385_v38 = vld [vmem:[#allocation12 + $0x5e4] ss:$16 sps:$4 sm:$0xff]  }
 0x2d4   :  { %4219 = vmatpush2.bf16.msra.mxu0 %v8323_v39  ;;  %v8388_v39 = vld [vmem:[#allocation12 + $0x7e4] ss:$16 sps:$4 sm:$0xff]  }
 0x2d5   :  { %4260 = vmatpush2.bf16.msra.mxu1 %v8326_v15  ;;  %4220 = vmatprep.subr.bf16.mxu0 %v8331_v21  ;;  %v8383_v15 = vld [vmem:[#allocation12 + $0x5e0] ss:$16 sps:$4 sm:$0xff]  }
 0x2d6   :  { %4261 = vmatprep.subr.bf16.mxu1 %v8334_v40  ;;  %v8386_v21 = vld [vmem:[#allocation12 + $0x7e0] ss:$16 sps:$4 sm:$0xff]   ;;  %v8391_v40 = vld [vmem:[#allocation12 + $0x5c4] ss:$16 sps:$4 sm:$0xff]  }
 0x2d8   :  { %4221 = vmatpush2.bf16.msra.mxu0 %v8329_v41  ;;  %v8394_v41 = vld [vmem:[#allocation12 + $0x7c4] ss:$16 sps:$4 sm:$0xff]  }
 0x2d9   :  { %4262 = vmatpush2.bf16.msra.mxu1 %v8332_v42  ;;  %5410 = vmatprep.subr.bf16.mxu0 %v8337_v33  ;;  %v8389_v42 = vld [vmem:[#allocation12 + $0x5c0] ss:$16 sps:$4 sm:$0xff]   ;;  %v8409_v33 = vld [vmem:[#allocation12 + $0x564] ss:$16 sps:$4 sm:$0xff]  }
 0x2da   :  { %5451 = vmatprep.subr.bf16.mxu1 %v8340_v58  ;;  %v8407_v58 = vld [vmem:[#allocation12 + $0x560] ss:$16 sps:$4 sm:$0xff]  }
 0x2db   :  { %4223 = vmatmul.mubr.bf16.vlgmr.msra.gmra.mxu0 %v9242_v17  ;;  %v3338_v43 = vpop.f32.mrf.mxu0  ;;  %v3379_v23 = vpop.f32.mrf.mxu1  ;;  %v8346_v17 = vld [vmem:[#allocation12 + $0x6c4] ss:$16 sps:$4 sm:$0xff]  }
 0x2dc   :  { %4264 = vmatmul.mubr.bf16.vlgmr.msra.gmra.mxu1 %v9244_v25  ;;  %v9252_v46 = vadd.f32 %v3379_v23, %v3338_v43  ;;  %5411 = vmatpush1.bf16.msra.mxu0 %v8335_v55  ;;  %v8341_v25 = vld [vmem:[#allocation12 + $0x4c0] ss:$16 sps:$4 sm:$0xff]   ;;  %v8397_v23 = vld [vmem:[#allocation12 + $0x5a4] ss:$16 sps:$4 sm:$0xff]  }
 0x2dd   :  { %v3340_v47 = vpop.f32.mrf.mxu0  ;;  %v3381_v49 = vpop.f32.mrf.mxu1  ;;  %5452 = vmatpush1.bf16.msra.mxu1 %v8338_v56  ;;  %5412 = vmatprep.subr.bf16.mxu0 %v8343_v59  ;;  %v8392_v43 = vld [vmem:[#allocation12 + $0x7c0] ss:$16 sps:$4 sm:$0xff]   ;;  %v8406_v55 = vld [vmem:[#allocation12 + $0x784] ss:$16 sps:$4 sm:$0xff]  }
 0x2de   :  { %v9254_v27 = vadd.f32 %v3381_v49, %v3340_v47  ;;  %5453 = vmatprep.subr.bf16.mxu1 %v8346_v17  ;;  %v8400_v47 = vld [vmem:[#allocation12 + $0x7a4] ss:$16 sps:$4 sm:$0xff]   ;;  %v8395_v49 = vld [vmem:[#allocation12 + $0x5a0] ss:$16 sps:$4 sm:$0xff]  }
 0x2df   :  { %v3342_v50 = vpop.f32.mrf.mxu0  ;;  %v3383_v53 = vpop.f32.mrf.mxu1  ;;  %v8412_v56 = vld [vmem:[#allocation12 + $0x764] ss:$16 sps:$4 sm:$0xff]   ;;  %v8410_v59 = vld [vmem:[#allocation12 + $0x760] ss:$16 sps:$4 sm:$0xff]  }
 0x2e0   :  { %5413 = vmatpush1.bf16.msra.mxu0 %v8341_v25  ;;  %v8398_v50 = vld [vmem:[#allocation12 + $0x7a0] ss:$16 sps:$4 sm:$0xff]   ;;  %v8415_v17 = vld [vmem:[#allocation12 + $0x544] ss:$16 sps:$4 sm:$0xff]  }
 0x2e1   :  { %v3343_v48 = vpop.f32.mrf.mxu0  ;;  %v3384_v54 = vpop.f32.mrf.mxu1  ;;  %5454 = vmatpush1.bf16.msra.mxu1 %v8344_v62  ;;  %5414 = vmatprep.subr.bf16.mxu0 %v8349_v63  ;;  %v8401_v53 = vld [vmem:[#allocation12 + $0x580] ss:$16 sps:$4 sm:$0xff]   ;;  %v8418_v25 = vld [vmem:[#allocation12 + $0x744] ss:$16 sps:$4 sm:$0xff]  }
 0x2e2   :  { %5455 = vmatprep.subr.bf16.mxu1 %v8352_v0  ;;  %v8403_v48 = vld [vmem:[#allocation12 + $0x584] ss:$16 sps:$4 sm:$0xff]   ;;  %v8404_v54 = vld [vmem:[#allocation12 + $0x780] ss:$16 sps:$4 sm:$0xff]  }
 0x2e3   :  { %v8413_v62 = vld [vmem:[#allocation12 + $0x540] ss:$16 sps:$4 sm:$0xff]   ;;  %v8421_v0 = vld [vmem:[#allocation12 + $0x524] ss:$16 sps:$4 sm:$0xff]  }
 0x2e4   :  { %5415 = vmatpush1.bf16.msra.mxu0 %v8347_v1  ;;  %v8416_v63 = vld [vmem:[#allocation12 + $0x740] ss:$16 sps:$4 sm:$0xff]   ;;  %v8424_v1 = vld [vmem:[#allocation12 + $0x724] ss:$16 sps:$4 sm:$0xff]  }
 0x2e5   :  { %5456 = vmatpush1.bf16.msra.mxu1 %v8350_v44  ;;  %5416 = vmatprep.subr.bf16.mxu0 %v8355_v45  ;;  %v8419_v44 = vld [vmem:[#allocation12 + $0x520] ss:$16 sps:$4 sm:$0xff]  }
 0x2e6   :  { %5457 = vmatprep.subr.bf16.mxu1 %v8358_v2  ;;  %v8422_v45 = vld [vmem:[#allocation12 + $0x720] ss:$16 sps:$4 sm:$0xff]   ;;  %v8427_v2 = vld [vmem:[#allocation12 + $0x504] ss:$16 sps:$4 sm:$0xff]  }
 0x2e8   :  { %5417 = vmatpush1.bf16.msra.mxu0 %v8353_v60  ;;  %v8430_v60 = vld [vmem:[#allocation12 + $0x704] ss:$16 sps:$4 sm:$0xff]  }
 0x2e9   :  { %5458 = vmatpush1.bf16.msra.mxu1 %v8356_v61  ;;  %5418 = vmatprep.subr.bf16.mxu0 %v8361_v3  ;;  %v8425_v61 = vld [vmem:[#allocation12 + $0x500] ss:$16 sps:$4 sm:$0xff]  }
 0x2ea   :  { %5459 = vmatprep.subr.bf16.mxu1 %v8364_v4  ;;  %v8428_v3 = vld [vmem:[#allocation12 + $0x700] ss:$16 sps:$4 sm:$0xff]   ;;  %v8433_v4 = vld [vmem:[#allocation12 + $0x4ec] ss:$16 sps:$4 sm:$0xff]  }
 0x2ec   :  { %5419 = vmatpush1.bf16.msra.mxu0 %v8359_v5  ;;  %v8436_v5 = vld [vmem:[#allocation12 + $0x6ec] ss:$16 sps:$4 sm:$0xff]  }
 0x2ed   :  { %5460 = vmatpush1.bf16.msra.mxu1 %v8362_v6  ;;  %5420 = vmatprep.subr.bf16.mxu0 %v8367_v7  ;;  %v9263_v6 = vld [vmem:[%s9445_s28] sm:$0xf]  ;;  %s4455_s28 = sand.u32 7, %s9319_s25  ;;  %s4326_s25 = scalar_lea.vmem [#allocation2], %s9271_s4 }
 0x2ee   :  { %5461 = vmatprep.subr.bf16.mxu1 %v8370_v8  ;;  %s9345_s20 = sadd.s32 %s7554_s26, %s4455_s28  ;;  %s4374_s28 = scalar_lea.vmem [#allocation2], %s9277_s23 }
 0x2ef   :  { %s4398_s26 = scalar_lea.vmem [#allocation2], %s9286_s14  ;;  %s9447_s4 = sld [smem:[#allocation20_spill]] }
 0x2f0   :  { %5421 = vmatpush1.bf16.msra.mxu0 %v8365_v10  ;;  %s4470_s23 = scalar_lea.vmem [#allocation2], %s9300_s29  ;;  %s4494_s14 = scalar_lea.vmem [#allocation2], %s9313_s17 }
 0x2f1   :  { %5462 = vmatpush1.bf16.msra.mxu1 %v8368_v12  ;;  %5422 = vmatprep.subr.bf16.mxu0 %v8373_v20  ;;  %v4277_v12 = vrot.slane %v9263_v6, %v9083_v9  ;;  %v4281_v20 = vrot.slane %v9263_v6, %v9090_v11  ;;  %s4363_s29 = scalar_lea.vmem [#allocation2], %s9337_s3  ;;  %s4387_s17 = scalar_lea.vmem [#allocation2], %s9339_s27 }
 0x2f2   :  { %5463 = vmatprep.subr.bf16.mxu1 %v8376_v22  ;;  %s4459_s13 = scalar_lea.vmem [#allocation2], %s9345_s20 }
 0x2f4   :  { %5423 = vmatpush1.bf16.msra.mxu0 %v8371_v28 }
 0x2f5   :  { %5464 = vmatpush1.bf16.msra.mxu1 %v8374_v29  ;;  %5424 = vmatprep.subr.bf16.mxu0 %v8379_v32  ;;  %s4339_s30 = scalar_lea.vmem [#allocation2], %s9447_s4 }
 0x2f6   :  { %5465 = vmatprep.subr.bf16.mxu1 %v8382_v35 }
 0x2f8   :  { %5425 = vmatpush1.bf16.msra.mxu0 %v8377_v36 }
 0x2f9   :  { %5466 = vmatpush1.bf16.msra.mxu1 %v8380_v37  ;;  %5426 = vmatprep.subr.bf16.mxu0 %v8385_v38 }
 0x2fa   :  { %5467 = vmatprep.subr.bf16.mxu1 %v8388_v39  ;;  %v4285_v39 = vrot.slane %v9263_v6, %v9110_v51 }
 0x2fc   :  { %5427 = vmatpush2.bf16.msra.mxu0 %v8383_v15 }
 0x2fd   :  { %5468 = vmatpush2.bf16.msra.mxu1 %v8386_v21  ;;  %5428 = vmatprep.subr.bf16.mxu0 %v8391_v40 }
 0x2fe   :  { %5469 = vmatprep.subr.bf16.mxu1 %v8394_v41 }
 0x300   :  { %5429 = vmatpush2.bf16.msra.mxu0 %v8389_v42  ;;  %v4289_v42 = vrot.slane %v9263_v6, %v9115_v34 }
 0x301   :  { %5470 = vmatpush2.bf16.msra.mxu1 %v8392_v43  ;;  %5430 = vmatprep.subr.bf16.mxu0 %v8397_v23 }
 0x302   :  { %5471 = vmatprep.subr.bf16.mxu1 %v8400_v47 }
 0x304   :  { %5431 = vmatpush2.bf16.msra.mxu0 %v8395_v49 }
 0x305   :  { %5472 = vmatpush2.bf16.msra.mxu1 %v8398_v50  ;;  %5432 = vmatprep.subr.bf16.mxu0 %v8403_v48 }
 0x306   :  { %5473 = vmatprep.subr.bf16.mxu1 %v8406_v55 }
 0x308   :  { %5433 = vmatpush2.bf16.msra.mxu0 %v8401_v53 }
 0x309   :  { %5474 = vmatpush2.bf16.msra.mxu1 %v8404_v54  ;;  %5434 = vmatprep.subr.bf16.mxu0 %v8409_v33 }
 0x30a   :  { %5475 = vmatprep.subr.bf16.mxu1 %v8412_v56 }
 0x30c   :  { %5435 = vmatpush2.bf16.msra.mxu0 %v8407_v58 }
 0x30d   :  { %5476 = vmatpush2.bf16.msra.mxu1 %v8410_v59  ;;  %5436 = vmatprep.subr.bf16.mxu0 %v8415_v17 }
 0x30e   :  { %5477 = vmatprep.subr.bf16.mxu1 %v8418_v25 }
 0x310   :  { %5437 = vmatpush2.bf16.msra.mxu0 %v8413_v62 }
 0x311   :  { %5478 = vmatpush2.bf16.msra.mxu1 %v8416_v63  ;;  %5438 = vmatprep.subr.bf16.mxu0 %v8421_v0 }
 0x312   :  { %5479 = vmatprep.subr.bf16.mxu1 %v8424_v1 }
 0x314   :  { %5439 = vmatpush2.bf16.msra.mxu0 %v8419_v44 }
 0x315   :  { %5480 = vmatpush2.bf16.msra.mxu1 %v8422_v45  ;;  %5440 = vmatprep.subr.bf16.mxu0 %v8427_v2 }
 0x316   :  { %5481 = vmatprep.subr.bf16.mxu1 %v8430_v60 }
 0x318   :  { %5441 = vmatpush2.bf16.msra.mxu0 %v8425_v61 }
 0x319   :  { %5482 = vmatpush2.bf16.msra.mxu1 %v8428_v3  ;;  %5492 = vmatprep.subr.bf16.mxu0 %v8433_v4 }
 0x31a   :  { %5533 = vmatprep.subr.bf16.mxu1 %v8436_v5 }
 0x31b   :  { %v3420_v13 = vpop.f32.mrf.mxu0  ;;  %v3461_v14 = vpop.f32.mrf.mxu1 }
 0x31c   :  { %v9256_v16 = vadd.f32 %v3461_v14, %v3420_v13 }
 0x31d   :  { %v3422_v18 = vpop.f32.mrf.mxu0  ;;  %v3463_v52 = vpop.f32.mrf.mxu1 }
 0x31e   :  { %v9258_v19 = vadd.f32 %v3463_v52, %v3422_v18 }
 0x31f   :  { %v3424_v24 = vpop.f32.mrf.mxu0  ;;  %v3465_v26 = vpop.f32.mrf.mxu1 }
 0x321   :  { %v3425_v30 = vpop.f32.mrf.mxu0  ;;  %v3466_v31 = vpop.f32.mrf.mxu1 }
 0x35b   :  { %v4142_v7 = vpop.f32.mrf.mxu0 }
 0x35c   :  { %v4143_v8 = vadd.f32 %v4142_v7, %v9252_v46  ;;  %v4183_v10 = vpop.f32.mrf.mxu1 }
 0x35d   :  { %v4144_v13 = vpop.f32.mrf.mxu0 }
 0x35e   :  { %v4184_v14 = vadd.f32 %v4183_v10, %v4143_v8  ;;  %v4145_v18 = vadd.f32 %v4144_v13, %v9254_v27  ;;  %v4185_v52 = vpop.f32.mrf.mxu1  ;;  %v8431_v8 = vld [vmem:[#allocation12 + $0x4e8] ss:$16 sps:$4 sm:$0xff]  }
 0x35f   :  { %v4146_v22 = vpop.f32.mrf.mxu0  ;;  %v8434_v10 = vld [vmem:[#allocation12 + $0x6e8] ss:$16 sps:$4 sm:$0xff]  }
 0x360   :  { %v4294_v24 = vadd.f32 %v4277_v12, %v4184_v14  ;;  %v4186_v26 = vadd.f32 %v4185_v52, %v4145_v18  ;;  %v4187_v28 = vpop.f32.mrf.mxu1  ;;  %v8439_v52 = vld [vmem:[#allocation12 + $0x4cc] ss:$16 sps:$4 sm:$0xff]   ;;  %v8440_v22 = vld [vmem:[#allocation12 + $0x6c8] ss:$16 sps:$4 sm:$0xff]  }
 0x361   :  { %v4147_v29 = vpop.f32.mrf.mxu0  ;;  %v8443_v28 = vld [vmem:[#allocation12 + $0x4a8] ss:$16 sps:$4 sm:$0xff]  }
 0x362   :  { %8727 = vtanh.f32 %v4294_v24  ;;  %v4295_v30 = vadd.f32 %v4281_v20, %v4186_v26  ;;  %v4188_v46 = vpop.f32.mrf.mxu1  ;;  %v8442_v20 = vld [vmem:[#allocation12 + $0x6cc] ss:$16 sps:$4 sm:$0xff]   ;;  %v8446_v29 = vld [vmem:[#allocation12 + $0x6a8] ss:$16 sps:$4 sm:$0xff]  }
 0x363   :  { %v8445_v24 = vld [vmem:[#allocation12 + $0x4ac] ss:$16 sps:$4 sm:$0xff]  }
 0x364   :  { %8729 = vtanh.f32 %v4295_v30  ;;  %v8448_v26 = vld [vmem:[#allocation12 + $0x6ac] ss:$16 sps:$4 sm:$0xff]  }
 0x365   :  { %v8451_v30 = vld [vmem:[#allocation12 + $0x48c] ss:$16 sps:$4 sm:$0xff]  }
 0x366   :  { %v8454_v46 = vld [vmem:[#allocation12 + $0x68c] ss:$16 sps:$4 sm:$0xff]  }
 0x36f   :  { %v8728_v31 = vpop.eup %8727 }
 0x370   :  { %4302 = vst [vmem:[#allocation2 + $0x40] sm:$0xff] %v8728_v31  ;;  %v8449_v31 = vld [vmem:[#allocation12 + $0x488] ss:$16 sps:$4 sm:$0xff]  }
 0x371   :  { %v8730_v32 = vpop.eup %8729 }
 0x372   :  { %4303 = vst [vmem:[#allocation2 + $0x48] sm:$0xff] %v8730_v32  ;;  %v8452_v32 = vld [vmem:[#allocation12 + $0x688] ss:$16 sps:$4 sm:$0xff]  }
 0x377   :  { %v6416_v35 = vld [vmem:[#allocation2 + $0x40] sm:$0xff] }
 0x378   :  { %6428 = vst [vmem:[#allocation14 + $0x20] sm:$0xff] %v6416_v35  ;;  %v8457_v35 = vld [vmem:[#allocation12 + $0x46c] ss:$16 sps:$4 sm:$0xff]  }
 0x379   :  { %v6417_v27 = vld [vmem:[#allocation2 + $0x48] sm:$0xff] }
 0x37a   :  { %6429 = vst [vmem:[#allocation14 + $0x28] sm:$0xff] %v6417_v27  ;;  %v8460_v27 = vld [vmem:[#allocation12 + $0x66c] ss:$16 sps:$4 sm:$0xff]  }
 0x39b   :  { %v4224_v36 = vpop.f32.mrf.mxu0 }
 0x39c   :  { %v4225_v37 = vadd.f32 %v4224_v36, %v9256_v16  ;;  %v4265_v38 = vpop.f32.mrf.mxu1  ;;  %v8455_v36 = vld [vmem:[#allocation12 + $0x468] ss:$16 sps:$4 sm:$0xff]  }
 0x39d   :  { %v4226_v15 = vpop.f32.mrf.mxu0 }
 0x39e   :  { %v4266_v21 = vadd.f32 %v4265_v38, %v4225_v37  ;;  %v4227_v40 = vadd.f32 %v4226_v15, %v9258_v19  ;;  %v4267_v41 = vpop.f32.mrf.mxu1  ;;  %v8458_v37 = vld [vmem:[#allocation12 + $0x668] ss:$16 sps:$4 sm:$0xff]   ;;  %v8463_v38 = vld [vmem:[#allocation12 + $0x44c] ss:$16 sps:$4 sm:$0xff]  }
 0x39f   :  { %v4228_v16 = vpop.f32.mrf.mxu0  ;;  %v8461_v15 = vld [vmem:[#allocation12 + $0x448] ss:$16 sps:$4 sm:$0xff]  }
 0x3a0   :  { %v4296_v43 = vadd.f32 %v4285_v39, %v4266_v21  ;;  %v4268_v23 = vadd.f32 %v4267_v41, %v4227_v40  ;;  %v4269_v47 = vpop.f32.mrf.mxu1  ;;  %v8466_v39 = vld [vmem:[#allocation12 + $0x64c] ss:$16 sps:$4 sm:$0xff]   ;;  %v8464_v21 = vld [vmem:[#allocation12 + $0x648] ss:$16 sps:$4 sm:$0xff]  }
 0x3a1   :  { %v4229_v49 = vpop.f32.mrf.mxu0  ;;  %v8469_v40 = vld [vmem:[#allocation12 + $0x42c] ss:$16 sps:$4 sm:$0xff]   ;;  %v8470_v16 = vld [vmem:[#allocation12 + $0x628] ss:$16 sps:$4 sm:$0xff]  }
 0x3a2   :  { %8731 = vtanh.f32 %v4296_v43  ;;  %v4297_v19 = vadd.f32 %v4289_v42, %v4268_v23  ;;  %v4270_v50 = vpop.f32.mrf.mxu1  ;;  %v8472_v41 = vld [vmem:[#allocation12 + $0x62c] ss:$16 sps:$4 sm:$0xff]   ;;  %v8467_v42 = vld [vmem:[#allocation12 + $0x428] ss:$16 sps:$4 sm:$0xff]  }
 0x3a3   :  { %v8475_v43 = vld [vmem:[#allocation12 + $0x40c] ss:$16 sps:$4 sm:$0xff]   ;;  %v8473_v47 = vld [vmem:[#allocation12 + $0x408] ss:$16 sps:$4 sm:$0xff]  }
 0x3a4   :  { %8733 = vtanh.f32 %v4297_v19  ;;  %v8478_v23 = vld [vmem:[#allocation12 + $0x60c] ss:$16 sps:$4 sm:$0xff]   ;;  %v8476_v49 = vld [vmem:[#allocation12 + $0x608] ss:$16 sps:$4 sm:$0xff]  }
 0x3a5   :  { %v8481_v19 = vld [vmem:[#allocation12 + $0x5ec] ss:$16 sps:$4 sm:$0xff]  }
 0x3a6   :  { %v8484_v50 = vld [vmem:[#allocation12 + $0x7ec] ss:$16 sps:$4 sm:$0xff]  }
 0x3af   :  { %v8732_v53 = vpop.eup %8731 }
 0x3b0   :  { %4304 = vst [vmem:[#allocation2 + $0x50] sm:$0xff] %v8732_v53  ;;  %v8479_v53 = vld [vmem:[#allocation12 + $0x5e8] ss:$16 sps:$4 sm:$0xff]  }
 0x3b1   :  { %v8734_v48 = vpop.eup %8733 }
 0x3b2   :  { %4305 = vst [vmem:[#allocation2 + $0x58] sm:$0xff] %v8734_v48  ;;  %v8482_v48 = vld [vmem:[#allocation12 + $0x7e8] ss:$16 sps:$4 sm:$0xff]  }
 0x3b7   :  { %v6418_v54 = vld [vmem:[#allocation2 + $0x50] sm:$0xff] }
 0x3b8   :  { %6430 = vst [vmem:[#allocation14 + $0x30] sm:$0xff] %v6418_v54  ;;  %v8487_v54 = vld [vmem:[#allocation12 + $0x5cc] ss:$16 sps:$4 sm:$0xff]  }
 0x3b9   :  { %v4327_v55 = vld [vmem:[%s4326_s25] ss:$8 sm:$0xf] }
 0x3ba   :  { %v4351_v33 = vld [vmem:[%s4350_s0] ss:$8 sm:$0xf]  ;;  %4328 = vst.msk [vmem:[#allocation4] ss:$8 sm:$0xf] %vm8938_vm0, %v4327_v55 }
 0x3bb   :  { %4352 = vst.msk [vmem:[#allocation4 + $0x1] ss:$8 sm:$0xf] %vm8938_vm0, %v4351_v33  ;;  %v4375_v56 = vld [vmem:[%s4374_s28] ss:$8 sm:$0xf] }
 0x3bc   :  { %v4399_v58 = vld [vmem:[%s4398_s26] ss:$8 sm:$0xf]  ;;  %4376 = vst.msk [vmem:[#allocation4 + $0x2] ss:$8 sm:$0xf] %vm8938_vm0, %v4375_v56 }
 0x3bd   :  { %4400 = vst.msk [vmem:[#allocation4 + $0x3] ss:$8 sm:$0xf] %vm8938_vm0, %v4399_v58  ;;  %v4423_v59 = vld [vmem:[%s4422_s5] ss:$8 sm:$0xf] }
 0x3be   :  { %v4447_v17 = vld [vmem:[%s4446_s16] ss:$8 sm:$0xf]  ;;  %4424 = vst.msk [vmem:[#allocation4 + $0x4] ss:$8 sm:$0xf] %vm8938_vm0, %v4423_v59 }
 0x3bf   :  { %4448 = vst.msk [vmem:[#allocation4 + $0x5] ss:$8 sm:$0xf] %vm8938_vm0, %v4447_v17  ;;  %v4471_v25 = vld [vmem:[%s4470_s23] ss:$8 sm:$0xf] }
 0x3c0   :  { %v4495_v62 = vld [vmem:[%s4494_s14] ss:$8 sm:$0xf]  ;;  %4472 = vst.msk [vmem:[#allocation4 + $0x6] ss:$8 sm:$0xf] %vm8938_vm0, %v4471_v25 }
 0x3c1   :  { %4496 = vst.msk [vmem:[#allocation4 + $0x7] ss:$8 sm:$0xf] %vm8938_vm0, %v4495_v62  ;;  %v4316_v63 = vld [vmem:[%s4315_s1] ss:$8 sm:$0xf] }
 0x3c2   :  { %v4340_v0 = vld [vmem:[%s4339_s30] ss:$8 sm:$0xf]  ;;  %4317 = vst.msk [vmem:[#allocation3] ss:$8 sm:$0xf] %vm8938_vm0, %v4316_v63 }
 0x3c3   :  { %4341 = vst.msk [vmem:[#allocation3 + $0x1] ss:$8 sm:$0xf] %vm8938_vm0, %v4340_v0  ;;  %v4364_v1 = vld [vmem:[%s4363_s29] ss:$8 sm:$0xf] }
 0x3c4   :  { %v4388_v44 = vld [vmem:[%s4387_s17] ss:$8 sm:$0xf]  ;;  %4365 = vst.msk [vmem:[#allocation3 + $0x2] ss:$8 sm:$0xf] %vm8938_vm0, %v4364_v1 }
 0x3c5   :  { %4389 = vst.msk [vmem:[#allocation3 + $0x3] ss:$8 sm:$0xf] %vm8938_vm0, %v4388_v44  ;;  %v4412_v45 = vld [vmem:[%s4411_s24] ss:$8 sm:$0xf] }
 0x3c6   :  { %v4436_v2 = vld [vmem:[%s4435_s15] ss:$8 sm:$0xf]  ;;  %4413 = vst.msk [vmem:[#allocation3 + $0x4] ss:$8 sm:$0xf] %vm8938_vm0, %v4412_v45 }
 0x3c7   :  { %4437 = vst.msk [vmem:[#allocation3 + $0x5] ss:$8 sm:$0xf] %vm8938_vm0, %v4436_v2  ;;  %v4460_v60 = vld [vmem:[%s4459_s13] ss:$8 sm:$0xf] }
 0x3c8   :  { %v4484_v61 = vld [vmem:[%s4483_s2] ss:$8 sm:$0xf]  ;;  %4461 = vst.msk [vmem:[#allocation3 + $0x6] ss:$8 sm:$0xf] %vm8938_vm0, %v4460_v60 }
 0x3c9   :  { %4485 = vst.msk [vmem:[#allocation3 + $0x7] ss:$8 sm:$0xf] %vm8938_vm0, %v4484_v61  ;;  %v4507_v3 = vld [vmem:[#allocation4 + $0x8] sm:$0xff]  ;;  %v4509_v4 = vld [vmem:[#allocation4 + $0x18] sm:$0xff]  ;;  %v4506_v5 = vld [vmem:[#allocation4] sm:$0xff] }
 0x3ca   :  { %v4511_v6 = vpack.c.bf16 %v4507_v3, %v4507_v3  ;;  %v4513_v7 = vpack.c.bf16 %v4509_v4, %v4509_v4  ;;  %v9397_v12 = vpack.c.bf16 %v4506_v5, %v4506_v5  ;;  %v4508_v13 = vld [vmem:[#allocation4 + $0x10] sm:$0xff]  ;;  %v6419_v18 = vld [vmem:[#allocation2 + $0x58] sm:$0xff] }
 0x3cb   :  { %v9399_v14 = vpack.c.bf16 %v4508_v13, %v4508_v13  ;;  %6431 = vst [vmem:[#allocation14 + $0x38] sm:$0xff] %v6419_v18  ;;  %v8490_v55 = vld [vmem:[#allocation12 + $0x7cc] ss:$16 sps:$4 sm:$0xff]   ;;  %v8485_v33 = vld [vmem:[#allocation12 + $0x5c8] ss:$16 sps:$4 sm:$0xff]  }
 0x3cc   :  { %5442 = vmatprep.mubr.bf16.mxu0 %v4511_v6  ;;  %5483 = vmatprep.mubr.bf16.mxu1 %v4513_v7  ;;  %v8488_v56 = vld [vmem:[#allocation12 + $0x7c8] ss:$16 sps:$4 sm:$0xff]   ;;  %v8493_v58 = vld [vmem:[#allocation12 + $0x5ac] ss:$16 sps:$4 sm:$0xff]  }
 0x3cd   :  { %5443 = vmatmul.mubr.bf16.vlgmr.msra.gmra.mxu0 %v9397_v12  ;;  %5484 = vmatmul.mubr.bf16.vlgmr.msra.gmra.mxu1 %v9399_v14  ;;  %v8496_v59 = vld [vmem:[#allocation12 + $0x7ac] ss:$16 sps:$4 sm:$0xff]   ;;  %v8491_v17 = vld [vmem:[#allocation12 + $0x5a8] ss:$16 sps:$4 sm:$0xff]  }
 0x3ce   :  { %5493 = vmatpush1.bf16.msra.mxu0 %v8431_v8  ;;  %5534 = vmatpush1.bf16.msra.mxu1 %v8434_v10  ;;  %v8494_v25 = vld [vmem:[#allocation12 + $0x7a8] ss:$16 sps:$4 sm:$0xff]   ;;  %v8499_v62 = vld [vmem:[#allocation12 + $0x58c] ss:$16 sps:$4 sm:$0xff]  }
 0x3cf   :  { %5524 = vmatprep.mubr.bf16.mxu0 %v4511_v6  ;;  %5565 = vmatprep.mubr.bf16.mxu1 %v4513_v7  ;;  %v8502_v63 = vld [vmem:[#allocation12 + $0x78c] ss:$16 sps:$4 sm:$0xff]   ;;  %v8497_v0 = vld [vmem:[#allocation12 + $0x588] ss:$16 sps:$4 sm:$0xff]  }
 0x3d0   :  { %5494 = vmatprep.subr.bf16.mxu0 %v8439_v52  ;;  %5535 = vmatprep.subr.bf16.mxu1 %v8442_v20  ;;  %v8500_v1 = vld [vmem:[#allocation12 + $0x788] ss:$16 sps:$4 sm:$0xff]   ;;  %v8505_v44 = vld [vmem:[#allocation12 + $0x56c] ss:$16 sps:$4 sm:$0xff]  }
 0x3d1   :  { %v8508_v45 = vld [vmem:[#allocation12 + $0x76c] ss:$16 sps:$4 sm:$0xff]   ;;  %v8503_v2 = vld [vmem:[#allocation12 + $0x568] ss:$16 sps:$4 sm:$0xff]  }
 0x3d2   :  { %5495 = vmatpush1.bf16.msra.mxu0 %v8437_v57  ;;  %5536 = vmatpush1.bf16.msra.mxu1 %v8440_v22  ;;  %v8506_v60 = vld [vmem:[#allocation12 + $0x768] ss:$16 sps:$4 sm:$0xff]   ;;  %v8511_v61 = vld [vmem:[#allocation12 + $0x54c] ss:$16 sps:$4 sm:$0xff]   ;;  %v8529_v57 = vld [vmem:[#allocation12 + $0xe4] ss:$16 sps:$4 sm:$0xff]  }
 0x3d3   :  { %5496 = vmatprep.subr.bf16.mxu0 %v8445_v24  ;;  %5537 = vmatprep.subr.bf16.mxu1 %v8448_v26  ;;  %v8514_v3 = vld [vmem:[#allocation12 + $0x74c] ss:$16 sps:$4 sm:$0xff]   ;;  %v8509_v4 = vld [vmem:[#allocation12 + $0x548] ss:$16 sps:$4 sm:$0xff]   ;;  %v8532_v22 = vld [vmem:[#allocation12 + $0x2e4] ss:$16 sps:$4 sm:$0xff]  }
 0x3d4   :  { %v8512_v5 = vld [vmem:[#allocation12 + $0x748] ss:$16 sps:$4 sm:$0xff]   ;;  %v8517_v6 = vld [vmem:[#allocation12 + $0x52c] ss:$16 sps:$4 sm:$0xff]   ;;  %v8527_v26 = vld [vmem:[#allocation12 + $0xe0] ss:$16 sps:$4 sm:$0xff]  }
 0x3d5   :  { %v8520_v7 = vld [vmem:[#allocation12 + $0x72c] ss:$16 sps:$4 sm:$0xff]   ;;  %v8515_v8 = vld [vmem:[#allocation12 + $0x528] ss:$16 sps:$4 sm:$0xff]  }
 0x3d6   :  { %5497 = vmatpush1.bf16.msra.mxu0 %v8443_v28  ;;  %5538 = vmatpush1.bf16.msra.mxu1 %v8446_v29  ;;  %v8518_v10 = vld [vmem:[#allocation12 + $0x728] ss:$16 sps:$4 sm:$0xff]   ;;  %v8523_v13 = vld [vmem:[#allocation12 + $0x50c] ss:$16 sps:$4 sm:$0xff]   ;;  %v8530_v29 = vld [vmem:[#allocation12 + $0x2e0] ss:$16 sps:$4 sm:$0xff]  }
 0x3d7   :  { %5498 = vmatprep.subr.bf16.mxu0 %v8451_v30  ;;  %5539 = vmatprep.subr.bf16.mxu1 %v8454_v46  ;;  %v8526_v18 = vld [vmem:[#allocation12 + $0x70c] ss:$16 sps:$4 sm:$0xff]   ;;  %v8521_v52 = vld [vmem:[#allocation12 + $0x508] ss:$16 sps:$4 sm:$0xff]   ;;  %v8535_v46 = vld [vmem:[#allocation12 + $0xc4] ss:$16 sps:$4 sm:$0xff]  }
 0x3d8   :  { %v8524_v20 = vld [vmem:[#allocation12 + $0x708] ss:$16 sps:$4 sm:$0xff]  }
 0x3d9   :  { %v4499_v24 = vld [vmem:[#allocation3 + $0x8] sm:$0xff]  ;;  %v4501_v28 = vld [vmem:[#allocation3 + $0x18] sm:$0xff] }
 0x3da   :  { %5499 = vmatpush1.bf16.msra.mxu0 %v8449_v31  ;;  %5540 = vmatpush1.bf16.msra.mxu1 %v8452_v32  ;;  %v9403_v30 = vpack.c.bf16 %v4499_v24, %v4499_v24  ;;  %v8538_v31 = vld [vmem:[#allocation12 + $0x2c4] ss:$16 sps:$4 sm:$0xff]   ;;  %v9407_v32 = vpack.c.bf16 %v4501_v28, %v4501_v28  ;;  %v8611_v24 = vld [vmem:[#allocation12 + $0x120] ss:$16 sps:$4 sm:$0xff]  }
 0x3db   :  { %5500 = vmatprep.subr.bf16.mxu0 %v8457_v35  ;;  %5541 = vmatprep.subr.bf16.mxu1 %v8460_v27  ;;  %v8533_v35 = vld [vmem:[#allocation12 + $0xc0] ss:$16 sps:$4 sm:$0xff]   ;;  %v8619_v28 = vld [vmem:[#allocation12 + $0x104] ss:$16 sps:$4 sm:$0xff]  }
 0x3dc   :  { %v8536_v27 = vld [vmem:[#allocation12 + $0x2c0] ss:$16 sps:$4 sm:$0xff]  }
 0x3de   :  { %5501 = vmatpush1.bf16.msra.mxu0 %v8455_v36  ;;  %5542 = vmatpush1.bf16.msra.mxu1 %v8458_v37  ;;  %v8541_v36 = vld [vmem:[#allocation12 + $0xa4] ss:$16 sps:$4 sm:$0xff]  }
 0x3df   :  { %5502 = vmatprep.subr.bf16.mxu0 %v8463_v38  ;;  %5543 = vmatprep.subr.bf16.mxu1 %v8466_v39  ;;  %v8544_v37 = vld [vmem:[#allocation12 + $0x2a4] ss:$16 sps:$4 sm:$0xff]   ;;  %v8539_v38 = vld [vmem:[#allocation12 + $0xa0] ss:$16 sps:$4 sm:$0xff]  }
 0x3e0   :  { %v8550_v39 = vld [vmem:[#allocation12 + $0x284] ss:$16 sps:$4 sm:$0xff]  }
 0x3e2   :  { %5503 = vmatpush1.bf16.msra.mxu0 %v8461_v15  ;;  %5544 = vmatpush1.bf16.msra.mxu1 %v8464_v21  ;;  %v8545_v15 = vld [vmem:[#allocation12 + $0x80] ss:$16 sps:$4 sm:$0xff]  }
 0x3e3   :  { %5504 = vmatprep.subr.bf16.mxu0 %v8469_v40  ;;  %5545 = vmatprep.subr.bf16.mxu1 %v8472_v41  ;;  %v8548_v21 = vld [vmem:[#allocation12 + $0x280] ss:$16 sps:$4 sm:$0xff]   ;;  %v8553_v40 = vld [vmem:[#allocation12 + $0x64] ss:$16 sps:$4 sm:$0xff]  }
 0x3e4   :  { %v8556_v41 = vld [vmem:[#allocation12 + $0x264] ss:$16 sps:$4 sm:$0xff]  }
 0x3e6   :  { %5505 = vmatpush1.bf16.msra.mxu0 %v8467_v42  ;;  %5546 = vmatpush1.bf16.msra.mxu1 %v8470_v16  ;;  %v8551_v42 = vld [vmem:[#allocation12 + $0x60] ss:$16 sps:$4 sm:$0xff]  }
 0x3e7   :  { %5506 = vmatprep.subr.bf16.mxu0 %v8475_v43  ;;  %5547 = vmatprep.subr.bf16.mxu1 %v8478_v23  ;;  %v8554_v16 = vld [vmem:[#allocation12 + $0x260] ss:$16 sps:$4 sm:$0xff]   ;;  %v8559_v43 = vld [vmem:[#allocation12 + $0x44] ss:$16 sps:$4 sm:$0xff]  }
 0x3e8   :  { %v8562_v23 = vld [vmem:[#allocation12 + $0x244] ss:$16 sps:$4 sm:$0xff]  }
 0x3ea   :  { %5507 = vmatpush1.bf16.msra.mxu0 %v8473_v47  ;;  %5548 = vmatpush1.bf16.msra.mxu1 %v8476_v49  ;;  %v8557_v47 = vld [vmem:[#allocation12 + $0x40] ss:$16 sps:$4 sm:$0xff]  }
 0x3eb   :  { %5508 = vmatprep.subr.bf16.mxu0 %v8481_v19  ;;  %5549 = vmatprep.subr.bf16.mxu1 %v8484_v50  ;;  %v8560_v49 = vld [vmem:[#allocation12 + $0x240] ss:$16 sps:$4 sm:$0xff]   ;;  %v8565_v19 = vld [vmem:[#allocation12 + $0x24] ss:$16 sps:$4 sm:$0xff]  }
 0x3ec   :  { %v8568_v50 = vld [vmem:[#allocation12 + $0x224] ss:$16 sps:$4 sm:$0xff]  }
 0x3ee   :  { %5509 = vmatpush2.bf16.msra.mxu0 %v8479_v53  ;;  %5550 = vmatpush2.bf16.msra.mxu1 %v8482_v48  ;;  %v8563_v53 = vld [vmem:[#allocation12 + $0x20] ss:$16 sps:$4 sm:$0xff]  }
 0x3ef   :  { %5510 = vmatprep.subr.bf16.mxu0 %v8487_v54  ;;  %5551 = vmatprep.subr.bf16.mxu1 %v8490_v55  ;;  %v8566_v48 = vld [vmem:[#allocation12 + $0x220] ss:$16 sps:$4 sm:$0xff]   ;;  %v8571_v54 = vld [vmem:[#allocation12 + $0x4] ss:$16 sps:$4 sm:$0xff]  }
 0x3f0   :  { %v8574_v55 = vld [vmem:[#allocation12 + $0x204] ss:$16 sps:$4 sm:$0xff]  }
 0x3f2   :  { %5511 = vmatpush2.bf16.msra.mxu0 %v8485_v33  ;;  %5552 = vmatpush2.bf16.msra.mxu1 %v8488_v56  ;;  %v8569_v33 = vld [vmem:[#allocation12] ss:$16 sps:$4 sm:$0xff]  }
 0x3f3   :  { %5512 = vmatprep.subr.bf16.mxu0 %v8493_v58  ;;  %5553 = vmatprep.subr.bf16.mxu1 %v8496_v59  ;;  %v8572_v56 = vld [vmem:[#allocation12 + $0x200] ss:$16 sps:$4 sm:$0xff]   ;;  %v8577_v58 = vld [vmem:[#allocation12 + $0x1e4] ss:$16 sps:$4 sm:$0xff]  }
 0x3f4   :  { %v8580_v59 = vld [vmem:[#allocation12 + $0x3e4] ss:$16 sps:$4 sm:$0xff]  }
 0x3f6   :  { %5513 = vmatpush2.bf16.msra.mxu0 %v8491_v17  ;;  %5554 = vmatpush2.bf16.msra.mxu1 %v8494_v25  ;;  %v8575_v17 = vld [vmem:[#allocation12 + $0x1e0] ss:$16 sps:$4 sm:$0xff]  }
 0x3f7   :  { %5514 = vmatprep.subr.bf16.mxu0 %v8499_v62  ;;  %5555 = vmatprep.subr.bf16.mxu1 %v8502_v63  ;;  %v8578_v25 = vld [vmem:[#allocation12 + $0x3e0] ss:$16 sps:$4 sm:$0xff]   ;;  %v8583_v62 = vld [vmem:[#allocation12 + $0x1c4] ss:$16 sps:$4 sm:$0xff]  }
 0x3f8   :  { %v8586_v63 = vld [vmem:[#allocation12 + $0x3c4] ss:$16 sps:$4 sm:$0xff]  }
 0x3fa   :  { %5515 = vmatpush2.bf16.msra.mxu0 %v8497_v0  ;;  %5556 = vmatpush2.bf16.msra.mxu1 %v8500_v1  ;;  %v8581_v0 = vld [vmem:[#allocation12 + $0x1c0] ss:$16 sps:$4 sm:$0xff]  }
 0x3fb   :  { %5516 = vmatprep.subr.bf16.mxu0 %v8505_v44  ;;  %5557 = vmatprep.subr.bf16.mxu1 %v8508_v45  ;;  %v8584_v1 = vld [vmem:[#allocation12 + $0x3c0] ss:$16 sps:$4 sm:$0xff]   ;;  %v8589_v44 = vld [vmem:[#allocation12 + $0x1a4] ss:$16 sps:$4 sm:$0xff]  }
 0x3fc   :  { %v8592_v45 = vld [vmem:[#allocation12 + $0x3a4] ss:$16 sps:$4 sm:$0xff]  }
 0x3fe   :  { %5517 = vmatpush2.bf16.msra.mxu0 %v8503_v2  ;;  %5558 = vmatpush2.bf16.msra.mxu1 %v8506_v60  ;;  %v8587_v2 = vld [vmem:[#allocation12 + $0x1a0] ss:$16 sps:$4 sm:$0xff]  }
 0x3ff   :  { %5518 = vmatprep.subr.bf16.mxu0 %v8511_v61  ;;  %5559 = vmatprep.subr.bf16.mxu1 %v8514_v3  ;;  %v8590_v60 = vld [vmem:[#allocation12 + $0x3a0] ss:$16 sps:$4 sm:$0xff]   ;;  %v8595_v61 = vld [vmem:[#allocation12 + $0x184] ss:$16 sps:$4 sm:$0xff]  }
 0x400   :  { %v8598_v3 = vld [vmem:[#allocation12 + $0x384] ss:$16 sps:$4 sm:$0xff]  }
 0x402   :  { %5519 = vmatpush2.bf16.msra.mxu0 %v8509_v4  ;;  %5560 = vmatpush2.bf16.msra.mxu1 %v8512_v5  ;;  %v8593_v4 = vld [vmem:[#allocation12 + $0x180] ss:$16 sps:$4 sm:$0xff]  }
 0x403   :  { %5520 = vmatprep.subr.bf16.mxu0 %v8517_v6  ;;  %5561 = vmatprep.subr.bf16.mxu1 %v8520_v7  ;;  %v8596_v5 = vld [vmem:[#allocation12 + $0x380] ss:$16 sps:$4 sm:$0xff]   ;;  %v8601_v6 = vld [vmem:[#allocation12 + $0x164] ss:$16 sps:$4 sm:$0xff]  }
 0x404   :  { %v8604_v7 = vld [vmem:[#allocation12 + $0x364] ss:$16 sps:$4 sm:$0xff]  }
 0x406   :  { %5521 = vmatpush2.bf16.msra.mxu0 %v8515_v8  ;;  %5562 = vmatpush2.bf16.msra.mxu1 %v8518_v10  ;;  %v8599_v8 = vld [vmem:[#allocation12 + $0x160] ss:$16 sps:$4 sm:$0xff]  }
 0x407   :  { %5522 = vmatprep.subr.bf16.mxu0 %v8523_v13  ;;  %5563 = vmatprep.subr.bf16.mxu1 %v8526_v18  ;;  %v8602_v10 = vld [vmem:[#allocation12 + $0x360] ss:$16 sps:$4 sm:$0xff]   ;;  %v8607_v13 = vld [vmem:[#allocation12 + $0x144] ss:$16 sps:$4 sm:$0xff]  }
 0x408   :  { %v8610_v18 = vld [vmem:[#allocation12 + $0x344] ss:$16 sps:$4 sm:$0xff]  }
 0x40a   :  { %5523 = vmatpush2.bf16.msra.mxu0 %v8521_v52  ;;  %5564 = vmatpush2.bf16.msra.mxu1 %v8524_v20  ;;  %v8605_v52 = vld [vmem:[#allocation12 + $0x140] ss:$16 sps:$4 sm:$0xff]  }
 0x40b   :  { %6214 = vmatprep.subr.bf16.mxu0 %v8529_v57  ;;  %6255 = vmatprep.subr.bf16.mxu1 %v8532_v22  ;;  %v8608_v20 = vld [vmem:[#allocation12 + $0x340] ss:$16 sps:$4 sm:$0xff]   ;;  %v8613_v57 = vld [vmem:[#allocation12 + $0x124] ss:$16 sps:$4 sm:$0xff]  }
 0x40c   :  { %v8616_v22 = vld [vmem:[#allocation12 + $0x324] ss:$16 sps:$4 sm:$0xff]  }
 0x40d   :  { %5525 = vmatmul.mubr.bf16.vlgmr.msra.gmra.mxu0 %v9397_v12  ;;  %5566 = vmatmul.mubr.bf16.vlgmr.msra.gmra.mxu1 %v9399_v14  ;;  %v8542_v12 = vld [vmem:[#allocation12 + $0x2a0] ss:$16 sps:$4 sm:$0xff]   ;;  %v8547_v14 = vld [vmem:[#allocation12 + $0x84] ss:$16 sps:$4 sm:$0xff]  }
 0x40e   :  { %6215 = vmatpush1.bf16.msra.mxu0 %v8527_v26  ;;  %6246 = vmatprep.mubr.bf16.mxu0 %v9403_v30  ;;  %v8614_v26 = vld [vmem:[#allocation12 + $0x320] ss:$16 sps:$4 sm:$0xff]  }
 0x40f   :  { %6256 = vmatpush1.bf16.msra.mxu1 %v8530_v29  ;;  %6287 = vmatprep.mubr.bf16.mxu1 %v9407_v32  ;;  %v8622_v29 = vld [vmem:[#allocation12 + $0x304] ss:$16 sps:$4 sm:$0xff]  }
 0x410   :  { %6216 = vmatprep.subr.bf16.mxu0 %v8535_v46  ;;  %6257 = vmatprep.subr.bf16.mxu1 %v8538_v31  ;;  %v8617_v46 = vld [vmem:[#allocation12 + $0x100] ss:$16 sps:$4 sm:$0xff]  }
 0x411   :  { %v8620_v31 = vld [vmem:[#allocation12 + $0x300] ss:$16 sps:$4 sm:$0xff]  }
 0x412   :  { %6217 = vmatpush1.bf16.msra.mxu0 %v8533_v35  ;;  %v8625_v35 = vld [vmem:[#allocation12 + $0xec] ss:$16 sps:$4 sm:$0xff]  }
 0x413   :  { %6258 = vmatpush1.bf16.msra.mxu1 %v8536_v27  ;;  %6218 = vmatprep.subr.bf16.mxu0 %v8541_v36  ;;  %v4498_v27 = vld [vmem:[#allocation3] sm:$0xff]  ;;  %v8628_v36 = vld [vmem:[#allocation12 + $0x2ec] ss:$16 sps:$4 sm:$0xff]  }
 0x414   :  { %6259 = vmatprep.subr.bf16.mxu1 %v8544_v37  ;;  %v4500_v37 = vld [vmem:[#allocation3 + $0x10] sm:$0xff] }
 0x416   :  { %6219 = vmatpush1.bf16.msra.mxu0 %v8539_v38  ;;  %v8623_v38 = vld [vmem:[#allocation12 + $0xe8] ss:$16 sps:$4 sm:$0xff]  }
 0x417   :  { %6260 = vmatpush1.bf16.msra.mxu1 %v8542_v12  ;;  %6220 = vmatprep.subr.bf16.mxu0 %v8547_v14  ;;  %v9411_v12 = vpack.c.bf16 %v4498_v27, %v4498_v27  ;;  %v8626_v14 = vld [vmem:[#allocation12 + $0x2e8] ss:$16 sps:$4 sm:$0xff]   ;;  %v8712_v27 = vld [vmem:[#allocation12 + $0x32c] ss:$16 sps:$4 sm:$0xff]  }
 0x418   :  { %6261 = vmatprep.subr.bf16.mxu1 %v8550_v39  ;;  %v9413_v39 = vpack.c.bf16 %v4500_v37, %v4500_v37  ;;  %v8710_v37 = vld [vmem:[#allocation12 + $0x328] ss:$16 sps:$4 sm:$0xff]  }
 0x41a   :  { %6221 = vmatpush1.bf16.msra.mxu0 %v8545_v15  ;;  %v8631_v15 = vld [vmem:[#allocation12 + $0xcc] ss:$16 sps:$4 sm:$0xff]  }
 0x41b   :  { %6262 = vmatpush1.bf16.msra.mxu1 %v8548_v21  ;;  %6222 = vmatprep.subr.bf16.mxu0 %v8553_v40  ;;  %v8634_v21 = vld [vmem:[#allocation12 + $0x2cc] ss:$16 sps:$4 sm:$0xff]   ;;  %v8629_v40 = vld [vmem:[#allocation12 + $0xc8] ss:$16 sps:$4 sm:$0xff]  }
 0x41c   :  { %6263 = vmatprep.subr.bf16.mxu1 %v8556_v41  ;;  %v8632_v41 = vld [vmem:[#allocation12 + $0x2c8] ss:$16 sps:$4 sm:$0xff]  }
 0x41e   :  { %6223 = vmatpush1.bf16.msra.mxu0 %v8551_v42  ;;  %v8637_v42 = vld [vmem:[#allocation12 + $0xac] ss:$16 sps:$4 sm:$0xff]  }
 0x41f   :  { %6264 = vmatpush1.bf16.msra.mxu1 %v8554_v16  ;;  %6224 = vmatprep.subr.bf16.mxu0 %v8559_v43  ;;  %v8640_v16 = vld [vmem:[#allocation12 + $0x2ac] ss:$16 sps:$4 sm:$0xff]   ;;  %v8635_v43 = vld [vmem:[#allocation12 + $0xa8] ss:$16 sps:$4 sm:$0xff]  }
 0x420   :  { %6265 = vmatprep.subr.bf16.mxu1 %v8562_v23  ;;  %v8638_v23 = vld [vmem:[#allocation12 + $0x2a8] ss:$16 sps:$4 sm:$0xff]  }
 0x422   :  { %6225 = vmatpush1.bf16.msra.mxu0 %v8557_v47  ;;  %v8643_v47 = vld [vmem:[#allocation12 + $0x8c] ss:$16 sps:$4 sm:$0xff]  }
 0x423   :  { %6266 = vmatpush1.bf16.msra.mxu1 %v8560_v49  ;;  %6226 = vmatprep.subr.bf16.mxu0 %v8565_v19  ;;  %v8646_v49 = vld [vmem:[#allocation12 + $0x28c] ss:$16 sps:$4 sm:$0xff]   ;;  %v8641_v19 = vld [vmem:[#allocation12 + $0x88] ss:$16 sps:$4 sm:$0xff]  }
 0x424   :  { %6267 = vmatprep.subr.bf16.mxu1 %v8568_v50  ;;  %v8649_v50 = vld [vmem:[#allocation12 + $0x6c] ss:$16 sps:$4 sm:$0xff]  }
 0x426   :  { %6227 = vmatpush1.bf16.msra.mxu0 %v8563_v53  ;;  %v8652_v53 = vld [vmem:[#allocation12 + $0x26c] ss:$16 sps:$4 sm:$0xff]  }
 0x427   :  { %6268 = vmatpush1.bf16.msra.mxu1 %v8566_v48  ;;  %6228 = vmatprep.subr.bf16.mxu0 %v8571_v54  ;;  %v8650_v48 = vld [vmem:[#allocation12 + $0x268] ss:$16 sps:$4 sm:$0xff]   ;;  %v8655_v54 = vld [vmem:[#allocation12 + $0x4c] ss:$16 sps:$4 sm:$0xff]  }
 0x428   :  { %6269 = vmatprep.subr.bf16.mxu1 %v8574_v55  ;;  %v8658_v55 = vld [vmem:[#allocation12 + $0x24c] ss:$16 sps:$4 sm:$0xff]  }
 0x42a   :  { %6229 = vmatpush1.bf16.msra.mxu0 %v8569_v33  ;;  %v8653_v33 = vld [vmem:[#allocation12 + $0x48] ss:$16 sps:$4 sm:$0xff]  }
 0x42b   :  { %6270 = vmatpush1.bf16.msra.mxu1 %v8572_v56  ;;  %6230 = vmatprep.subr.bf16.mxu0 %v8577_v58  ;;  %v8656_v56 = vld [vmem:[#allocation12 + $0x248] ss:$16 sps:$4 sm:$0xff]   ;;  %v8661_v58 = vld [vmem:[#allocation12 + $0x2c] ss:$16 sps:$4 sm:$0xff]  }
 0x42c   :  { %6271 = vmatprep.subr.bf16.mxu1 %v8580_v59  ;;  %v8664_v59 = vld [vmem:[#allocation12 + $0x22c] ss:$16 sps:$4 sm:$0xff]  }
 0x42e   :  { %6231 = vmatpush2.bf16.msra.mxu0 %v8575_v17  ;;  %v8659_v17 = vld [vmem:[#allocation12 + $0x28] ss:$16 sps:$4 sm:$0xff]  }
 0x42f   :  { %6272 = vmatpush2.bf16.msra.mxu1 %v8578_v25  ;;  %6232 = vmatprep.subr.bf16.mxu0 %v8583_v62  ;;  %v8662_v25 = vld [vmem:[#allocation12 + $0x228] ss:$16 sps:$4 sm:$0xff]   ;;  %v8667_v62 = vld [vmem:[#allocation12 + $0xc] ss:$16 sps:$4 sm:$0xff]  }
 0x430   :  { %6273 = vmatprep.subr.bf16.mxu1 %v8586_v63  ;;  %v8670_v63 = vld [vmem:[#allocation12 + $0x20c] ss:$16 sps:$4 sm:$0xff]  }
 0x432   :  { %6233 = vmatpush2.bf16.msra.mxu0 %v8581_v0  ;;  %v8665_v0 = vld [vmem:[#allocation12 + $0x8] ss:$16 sps:$4 sm:$0xff]  }
 0x433   :  { %6274 = vmatpush2.bf16.msra.mxu1 %v8584_v1  ;;  %6234 = vmatprep.subr.bf16.mxu0 %v8589_v44  ;;  %v8668_v1 = vld [vmem:[#allocation12 + $0x208] ss:$16 sps:$4 sm:$0xff]   ;;  %v8673_v44 = vld [vmem:[#allocation12 + $0x1ec] ss:$16 sps:$4 sm:$0xff]  }
 0x434   :  { %6275 = vmatprep.subr.bf16.mxu1 %v8592_v45  ;;  %v8676_v45 = vld [vmem:[#allocation12 + $0x3ec] ss:$16 sps:$4 sm:$0xff]  }
 0x436   :  { %6235 = vmatpush2.bf16.msra.mxu0 %v8587_v2  ;;  %v8671_v2 = vld [vmem:[#allocation12 + $0x1e8] ss:$16 sps:$4 sm:$0xff]  }
 0x437   :  { %6276 = vmatpush2.bf16.msra.mxu1 %v8590_v60  ;;  %6236 = vmatprep.subr.bf16.mxu0 %v8595_v61  ;;  %v8674_v60 = vld [vmem:[#allocation12 + $0x3e8] ss:$16 sps:$4 sm:$0xff]   ;;  %v8679_v61 = vld [vmem:[#allocation12 + $0x1cc] ss:$16 sps:$4 sm:$0xff]  }
 0x438   :  { %6277 = vmatprep.subr.bf16.mxu1 %v8598_v3  ;;  %v8682_v3 = vld [vmem:[#allocation12 + $0x3cc] ss:$16 sps:$4 sm:$0xff]  }
 0x43a   :  { %6237 = vmatpush2.bf16.msra.mxu0 %v8593_v4  ;;  %v8677_v4 = vld [vmem:[#allocation12 + $0x1c8] ss:$16 sps:$4 sm:$0xff]  }
 0x43b   :  { %6278 = vmatpush2.bf16.msra.mxu1 %v8596_v5  ;;  %6238 = vmatprep.subr.bf16.mxu0 %v8601_v6  ;;  %v8680_v5 = vld [vmem:[#allocation12 + $0x3c8] ss:$16 sps:$4 sm:$0xff]   ;;  %v8685_v6 = vld [vmem:[#allocation12 + $0x1ac] ss:$16 sps:$4 sm:$0xff]  }
 0x43c   :  { %6279 = vmatprep.subr.bf16.mxu1 %v8604_v7  ;;  %v8688_v7 = vld [vmem:[#allocation12 + $0x3ac] ss:$16 sps:$4 sm:$0xff]  }
 0x43e   :  { %6239 = vmatpush2.bf16.msra.mxu0 %v8599_v8  ;;  %v8683_v8 = vld [vmem:[#allocation12 + $0x1a8] ss:$16 sps:$4 sm:$0xff]  }
 0x43f   :  { %6280 = vmatpush2.bf16.msra.mxu1 %v8602_v10  ;;  %6240 = vmatprep.subr.bf16.mxu0 %v8607_v13  ;;  %v8686_v10 = vld [vmem:[#allocation12 + $0x3a8] ss:$16 sps:$4 sm:$0xff]   ;;  %v8691_v13 = vld [vmem:[#allocation12 + $0x18c] ss:$16 sps:$4 sm:$0xff]  }
 0x440   :  { %6281 = vmatprep.subr.bf16.mxu1 %v8610_v18  ;;  %v8694_v18 = vld [vmem:[#allocation12 + $0x38c] ss:$16 sps:$4 sm:$0xff]  }
 0x442   :  { %6241 = vmatpush2.bf16.msra.mxu0 %v8605_v52  ;;  %v8689_v52 = vld [vmem:[#allocation12 + $0x188] ss:$16 sps:$4 sm:$0xff]  }
 0x443   :  { %6282 = vmatpush2.bf16.msra.mxu1 %v8608_v20  ;;  %6242 = vmatprep.subr.bf16.mxu0 %v8613_v57  ;;  %v8692_v20 = vld [vmem:[#allocation12 + $0x388] ss:$16 sps:$4 sm:$0xff]   ;;  %v8697_v57 = vld [vmem:[#allocation12 + $0x16c] ss:$16 sps:$4 sm:$0xff]  }
 0x444   :  { %6283 = vmatprep.subr.bf16.mxu1 %v8616_v22  ;;  %v8700_v22 = vld [vmem:[#allocation12 + $0x36c] ss:$16 sps:$4 sm:$0xff]  }
 0x446   :  { %6243 = vmatpush2.bf16.msra.mxu0 %v8611_v24  ;;  %v8695_v24 = vld [vmem:[#allocation12 + $0x168] ss:$16 sps:$4 sm:$0xff]  }
 0x447   :  { %6284 = vmatpush2.bf16.msra.mxu1 %v8614_v26  ;;  %6244 = vmatprep.subr.bf16.mxu0 %v8619_v28  ;;  %v8698_v26 = vld [vmem:[#allocation12 + $0x368] ss:$16 sps:$4 sm:$0xff]   ;;  %v8703_v28 = vld [vmem:[#allocation12 + $0x14c] ss:$16 sps:$4 sm:$0xff]  }
 0x448   :  { %6285 = vmatprep.subr.bf16.mxu1 %v8622_v29  ;;  %v8706_v29 = vld [vmem:[#allocation12 + $0x34c] ss:$16 sps:$4 sm:$0xff]  }
 0x44a   :  { %6245 = vmatpush2.bf16.msra.mxu0 %v8617_v46  ;;  %v8701_v46 = vld [vmem:[#allocation12 + $0x148] ss:$16 sps:$4 sm:$0xff]  }
 0x44b   :  { %6286 = vmatpush2.bf16.msra.mxu1 %v8620_v31  ;;  %6296 = vmatprep.subr.bf16.mxu0 %v8625_v35  ;;  %v8704_v31 = vld [vmem:[#allocation12 + $0x348] ss:$16 sps:$4 sm:$0xff]   ;;  %v8709_v35 = vld [vmem:[#allocation12 + $0x12c] ss:$16 sps:$4 sm:$0xff]  }
 0x44c   :  { %6337 = vmatprep.subr.bf16.mxu1 %v8628_v36  ;;  %v8707_v36 = vld [vmem:[#allocation12 + $0x128] ss:$16 sps:$4 sm:$0xff]  }
 0x44d   :  { %6247 = vmatmul.mubr.bf16.vlgmr.msra.gmra.mxu0 %v9411_v12 }
 0x44e   :  { %6288 = vmatmul.mubr.bf16.vlgmr.msra.gmra.mxu1 %v9413_v39  ;;  %6297 = vmatpush1.bf16.msra.mxu0 %v8623_v38  ;;  %v8715_v38 = vld [vmem:[#allocation12 + $0x10c] ss:$16 sps:$4 sm:$0xff]  }
 0x44f   :  { %6328 = vmatprep.mubr.bf16.mxu0 %v9403_v30  ;;  %6338 = vmatpush1.bf16.msra.mxu1 %v8626_v14  ;;  %v8644_v30 = vld [vmem:[#allocation12 + $0x288] ss:$16 sps:$4 sm:$0xff]   ;;  %v8718_v14 = vld [vmem:[#allocation12 + $0x30c] ss:$16 sps:$4 sm:$0xff]  }
 0x450   :  { %6369 = vmatprep.mubr.bf16.mxu1 %v9407_v32  ;;  %6298 = vmatprep.subr.bf16.mxu0 %v8631_v15  ;;  %v8647_v32 = vld [vmem:[#allocation12 + $0x68] ss:$16 sps:$4 sm:$0xff]  }
 0x451   :  { %6339 = vmatprep.subr.bf16.mxu1 %v8634_v21  ;;  %v8713_v15 = vld [vmem:[#allocation12 + $0x108] ss:$16 sps:$4 sm:$0xff]  }
 0x452   :  { %6299 = vmatpush1.bf16.msra.mxu0 %v8629_v40  ;;  %v8716_v21 = vld [vmem:[#allocation12 + $0x308] ss:$16 sps:$4 sm:$0xff]  }
 0x453   :  { %6340 = vmatpush1.bf16.msra.mxu1 %v8632_v41  ;;  %6300 = vmatprep.subr.bf16.mxu0 %v8637_v42 }
 0x454   :  { %6341 = vmatprep.subr.bf16.mxu1 %v8640_v16 }
 0x456   :  { %6301 = vmatpush1.bf16.msra.mxu0 %v8635_v43 }
 0x457   :  { %6342 = vmatpush1.bf16.msra.mxu1 %v8638_v23  ;;  %6302 = vmatprep.subr.bf16.mxu0 %v8643_v47 }
 0x458   :  { %6343 = vmatprep.subr.bf16.mxu1 %v8646_v49 }
 0x45a   :  { %6303 = vmatpush1.bf16.msra.mxu0 %v8641_v19 }
 0x45b   :  { %6344 = vmatpush1.bf16.msra.mxu1 %v8644_v30  ;;  %6304 = vmatprep.subr.bf16.mxu0 %v8649_v50 }
 0x45c   :  { %6345 = vmatprep.subr.bf16.mxu1 %v8652_v53 }
 0x45e   :  { %6305 = vmatpush1.bf16.msra.mxu0 %v8647_v32 }
 0x45f   :  { %6346 = vmatpush1.bf16.msra.mxu1 %v8650_v48  ;;  %6306 = vmatprep.subr.bf16.mxu0 %v8655_v54 }
 0x460   :  { %6347 = vmatprep.subr.bf16.mxu1 %v8658_v55 }
 0x462   :  { %6307 = vmatpush1.bf16.msra.mxu0 %v8653_v33 }
 0x463   :  { %6348 = vmatpush1.bf16.msra.mxu1 %v8656_v56  ;;  %6308 = vmatprep.subr.bf16.mxu0 %v8661_v58 }
 0x464   :  { %6349 = vmatprep.subr.bf16.mxu1 %v8664_v59 }
 0x466   :  { %6309 = vmatpush1.bf16.msra.mxu0 %v8659_v17 }
 0x467   :  { %6350 = vmatpush1.bf16.msra.mxu1 %v8662_v25  ;;  %6310 = vmatprep.subr.bf16.mxu0 %v8667_v62 }
 0x468   :  { %6351 = vmatprep.subr.bf16.mxu1 %v8670_v63 }
 0x46a   :  { %6311 = vmatpush1.bf16.msra.mxu0 %v8665_v0 }
 0x46b   :  { %6352 = vmatpush1.bf16.msra.mxu1 %v8668_v1  ;;  %6312 = vmatprep.subr.bf16.mxu0 %v8673_v44 }
 0x46c   :  { %6353 = vmatprep.subr.bf16.mxu1 %v8676_v45 }
 0x46e   :  { %6313 = vmatpush2.bf16.msra.mxu0 %v8671_v2 }
 0x46f   :  { %6354 = vmatpush2.bf16.msra.mxu1 %v8674_v60  ;;  %6314 = vmatprep.subr.bf16.mxu0 %v8679_v61 }
 0x470   :  { %6355 = vmatprep.subr.bf16.mxu1 %v8682_v3 }
 0x472   :  { %6315 = vmatpush2.bf16.msra.mxu0 %v8677_v4 }
 0x473   :  { %6356 = vmatpush2.bf16.msra.mxu1 %v8680_v5  ;;  %6316 = vmatprep.subr.bf16.mxu0 %v8685_v6 }
 0x474   :  { %6357 = vmatprep.subr.bf16.mxu1 %v8688_v7 }
 0x476   :  { %6317 = vmatpush2.bf16.msra.mxu0 %v8683_v8 }
 0x477   :  { %6358 = vmatpush2.bf16.msra.mxu1 %v8686_v10  ;;  %6318 = vmatprep.subr.bf16.mxu0 %v8691_v13 }
 0x478   :  { %6359 = vmatprep.subr.bf16.mxu1 %v8694_v18 }
 0x47a   :  { %6319 = vmatpush2.bf16.msra.mxu0 %v8689_v52 }
 0x47b   :  { %6360 = vmatpush2.bf16.msra.mxu1 %v8692_v20  ;;  %6320 = vmatprep.subr.bf16.mxu0 %v8697_v57 }
 0x47c   :  { %6361 = vmatprep.subr.bf16.mxu1 %v8700_v22 }
 0x47e   :  { %6321 = vmatpush2.bf16.msra.mxu0 %v8695_v24 }
 0x47f   :  { %6362 = vmatpush2.bf16.msra.mxu1 %v8698_v26  ;;  %6322 = vmatprep.subr.bf16.mxu0 %v8703_v28 }
 0x480   :  { %6363 = vmatprep.subr.bf16.mxu1 %v8706_v29 }
 0x482   :  { %6323 = vmatpush2.bf16.msra.mxu0 %v8701_v46 }
 0x483   :  { %6364 = vmatpush2.bf16.msra.mxu1 %v8704_v31  ;;  %6324 = vmatprep.subr.bf16.mxu0 %v8709_v35 }
 0x484   :  { %6365 = vmatprep.subr.bf16.mxu1 %v8712_v27 }
 0x486   :  { %6325 = vmatpush2.bf16.msra.mxu0 %v8707_v36 }
 0x487   :  { %6366 = vmatpush2.bf16.msra.mxu1 %v8710_v37  ;;  %6326 = vmatprep.subr.bf16.mxu0 %v8715_v38 }
 0x488   :  { %6367 = vmatprep.subr.bf16.mxu1 %v8718_v14 }
 0x48a   :  { %6327 = vmatpush2.bf16.msra.mxu0 %v8713_v15 }
 0x48b   :  { %6368 = vmatpush2.bf16.msra.mxu1 %v8716_v21 }
 0x48d   :  { %6329 = vmatmul.mubr.bf16.vlgmr.msra.gmra.mxu0 %v9411_v12  ;;  %v5444_v40 = vpop.f32.mrf.mxu0  ;;  %v5485_v41 = vpop.f32.mrf.mxu1 }
 0x48e   :  { %6370 = vmatmul.mubr.bf16.vlgmr.msra.gmra.mxu1 %v9413_v39  ;;  %v5486_v42 = vadd.f32 %v5485_v41, %v5444_v40  ;;  %v6378_v39 = vld [vmem:[%s9448_s7] sm:$0xf] }
 0x48f   :  { %v5446_v16 = vpop.f32.mrf.mxu0  ;;  %v5487_v43 = vpop.f32.mrf.mxu1  ;;  %v6383_v62 = vrot.slane %v6378_v39, %v9083_v9  ;;  %v6387_v45 = vrot.slane %v6378_v39, %v9090_v11  ;;  %v6391_v11 = vrot.slane %v6378_v39, %v9110_v51  ;;  %v6395_v22 = vrot.slane %v6378_v39, %v9115_v34 }
 0x490   :  { %v5488_v23 = vadd.f32 %v5487_v43, %v5446_v16 }
 0x491   :  { %v5448_v47 = vpop.f32.mrf.mxu0  ;;  %v5489_v49 = vpop.f32.mrf.mxu1 }
 0x493   :  { %v5449_v19 = vpop.f32.mrf.mxu0  ;;  %v5490_v30 = vpop.f32.mrf.mxu1 }
 0x4cd   :  { %v5526_v50 = vpop.f32.mrf.mxu0  ;;  %v5567_v53 = vpop.f32.mrf.mxu1 }
 0x4ce   :  { %v5568_v32 = vadd.f32 %v5567_v53, %v5526_v50 }
 0x4cf   :  { %v5528_v48 = vpop.f32.mrf.mxu0  ;;  %v5569_v54 = vpop.f32.mrf.mxu1 }
 0x4d0   :  { %v5570_v55 = vadd.f32 %v5569_v54, %v5528_v48 }
 0x4d1   :  { %v5530_v33 = vpop.f32.mrf.mxu0  ;;  %v5571_v12 = vpop.f32.mrf.mxu1 }
 0x4d3   :  { %v5531_v56 = vpop.f32.mrf.mxu0  ;;  %v5572_v58 = vpop.f32.mrf.mxu1 }
 0x50d   :  { %v6248_v59 = vpop.f32.mrf.mxu0 }
 0x50e   :  { %v6249_v17 = vadd.f32 %v6248_v59, %v5486_v42  ;;  %v6289_v25 = vpop.f32.mrf.mxu1 }
 0x50f   :  { %v6250_v63 = vpop.f32.mrf.mxu0 }
 0x510   :  { %v6290_v0 = vadd.f32 %v6289_v25, %v6249_v17  ;;  %v6251_v1 = vadd.f32 %v6250_v63, %v5488_v23  ;;  %v6291_v44 = vpop.f32.mrf.mxu1 }
 0x511   :  { %v6252_v2 = vpop.f32.mrf.mxu0 }
 0x512   :  { %v6400_v60 = vadd.f32 %v6383_v62, %v6290_v0  ;;  %v6292_v61 = vadd.f32 %v6291_v44, %v6251_v1  ;;  %v6293_v3 = vpop.f32.mrf.mxu1 }
 0x513   :  { %v6253_v4 = vpop.f32.mrf.mxu0 }
 0x514   :  { %8735 = vtanh.f32 %v6400_v60  ;;  %v6401_v5 = vadd.f32 %v6387_v45, %v6292_v61  ;;  %v6294_v6 = vpop.f32.mrf.mxu1 }
 0x516   :  { %8737 = vtanh.f32 %v6401_v5 }
 0x521   :  { %v8736_v7 = vpop.eup %8735 }
 0x522   :  { %6408 = vst [vmem:[#allocation2 + $0x60] sm:$0xff] %v8736_v7  ;;  %6432 = vst [vmem:[#allocation14 + $0x40] sm:$0xff] %v8736_v7 }
 0x523   :  { %v8738_v8 = vpop.eup %8737 }
 0x524   :  { %6409 = vst [vmem:[#allocation2 + $0x68] sm:$0xff] %v8738_v8  ;;  %6433 = vst [vmem:[#allocation14 + $0x48] sm:$0xff] %v8738_v8 }
 0x54d   :  { %v6330_v9 = vpop.f32.mrf.mxu0 }
 0x54e   :  { %v6331_v10 = vadd.f32 %v6330_v9, %v5568_v32  ;;  %v6371_v13 = vpop.f32.mrf.mxu1 }
 0x54f   :  { %v6332_v18 = vpop.f32.mrf.mxu0 }
 0x550   :  { %v6372_v52 = vadd.f32 %v6371_v13, %v6331_v10  ;;  %v6333_v20 = vadd.f32 %v6332_v18, %v5570_v55  ;;  %v6373_v57 = vpop.f32.mrf.mxu1 }
 0x551   :  { %v6334_v24 = vpop.f32.mrf.mxu0 }
 0x552   :  { %v6402_v26 = vadd.f32 %v6391_v11, %v6372_v52  ;;  %v6374_v28 = vadd.f32 %v6373_v57, %v6333_v20  ;;  %v6375_v29 = vpop.f32.mrf.mxu1 }
 0x553   :  { %v6335_v46 = vpop.f32.mrf.mxu0 }
 0x554   :  { %8739 = vtanh.f32 %v6402_v26  ;;  %v6403_v31 = vadd.f32 %v6395_v22, %v6374_v28  ;;  %v6376_v35 = vpop.f32.mrf.mxu1 }
 0x556   :  { %8741 = vtanh.f32 %v6403_v31 }
 0x561   :  { %v8740_v27 = vpop.eup %8739 }
 0x562   :  { %6410 = vst [vmem:[#allocation2 + $0x70] sm:$0xff] %v8740_v27  ;;  %6434 = vst [vmem:[#allocation14 + $0x50] sm:$0xff] %v8740_v27 }
 0x563   :  { %v8742_v51 = vpop.eup %8741 }
 0x564   :  { %6411 = vst [vmem:[#allocation2 + $0x78] sm:$0xff] %v8742_v51  ;;  %6435 = vst [vmem:[#allocation14 + $0x58] sm:$0xff] %v8742_v51 }
 0x565   :  { %8810 = shalt.err (!%p8807_p0)
}
 0x566   :  { %s8836_s19 = smov 512   ;;  %s8837_s9 = smov 32  }
 0x567   :  { %s9449_s8 = sld [smem:[#allocation22_spill]] }
 0x56d   :  { %6447 = dma.vmem_to_hbm [thread:$0]  %s6442_s18, 1536, %s9449_s8, [#allocation7], %s8836_s19, %s8836_s19, %s8837_s9  }
 0x56e   :  { %8827 = dma.done.wait [#allocation7], 1536  }
 0x56f   :  { %8828 = vsyncadd [#allocation7], 4294965760 }
 0x570   :  { %6451 = vsyncpa [#allocation6], 1 }
 0x571   :  { %6452 = vsyncpa [#allocation13], 1 }
 0x572   :  { %6453 = vsyncpa [#allocation7], 1 }
 0x573   :  { %6454 = vsyncpa [#allocation8], 1 }
 0x574   :  { %6455 = vsyncpa [#allocation10], 1 }

</bundles_post_ra>
